<compile_context>
chip_gen: v6e
topology: v6e:2x2x1
jax: 0.10.0
libtpu: 0.0.40
codegen_flags: <defaults>
</compile_context>

<pallas_src>
import jax
import jax.numpy as jnp
from jax import lax
from jax.experimental import pallas as pl
from jax.experimental.pallas import tpu as pltpu

K = 3          # conv kernel size
PAD = 1        # conv padding
CIN = 32
COUT = 32
BN_EPS = 1e-5


def _conv_bn_relu_kernel(x_ref, w_ref, b_ref, o_ref, patch_ref):
    """One batch element per grid step.

    x_ref     : (1, H+2, W+2, CIN) bf16  zero-padded NHWC input tile (VMEM)
    w_ref     : (K*K*CIN, COUT)    bf16  im2col weights, BN scale folded in
    b_ref     : (1, COUT)          f32   folded BN bias  (beta - mean*scale)
    o_ref     : (1, H*W, COUT)     f32   output tile (flattened spatial)
    patch_ref : (H*W, K*K*CIN)     bf16  VMEM scratch: im2col slab
    """
    _, Hp, Wp, cin = x_ref.shape
    H = Hp - 2 * PAD
    W = Wp - 2 * PAD
    cout = o_ref.shape[-1]

    # Build the im2col slab once: 9 shifted (H*W, CIN) views packed along the
    # contraction axis -> a single (H*W, 9*CIN) MXU operand instead of 9
    # small K=32 matmuls.
    for dh in range(K):
        for dw in range(K):
            t = dh * K + dw
            patch_ref[:, t * cin:(t + 1) * cin] = (
                x_ref[0, dh:dh + H, dw:dw + W, :].reshape(H * W, cin))

    # Single matmul, contraction K = 9*CIN = 288, bf16 operands, f32 accumulation.
    acc = jnp.dot(patch_ref[...], w_ref[...],
                  preferred_element_type=jnp.float32)        # (H*W, COUT) f32

    # Epilogue in f32: folded-BN bias + ReLU.
    y = jnp.maximum(acc + b_ref[...], 0.0)
    o_ref[...] = y.reshape(1, H * W, cout).astype(o_ref.dtype)


def conv_bn_relu(x_nchw, w_oihw, gamma, beta, running_mean, running_var):
    """x_nchw: (N, CIN, H, W) f32; w_oihw: (COUT, CIN, K, K) f32 (PyTorch layout).
    Returns (N, COUT, H, W) f32."""
    N, C, H, W = x_nchw.shape
    assert C == CIN

    # Fold eval-mode BatchNorm into the conv weights + a per-channel bias.
    scale = gamma / jnp.sqrt(running_var + BN_EPS)                 # (COUT,)
    bias = (beta - running_mean * scale).reshape(1, COUT)          # f32

    # (COUT, CIN, K, K) -> (K, K, CIN, COUT) -> scale fold -> (K*K*CIN, COUT) bf16.
    w_hwio = jnp.transpose(w_oihw, (2, 3, 1, 0))
    w_im2col = (w_hwio * scale).reshape(K * K * CIN, COUT).astype(jnp.bfloat16)

    # Activations: bf16, NHWC, zero-padded spatial ("same" conv, padding=1).
    x_bf = x_nchw.astype(jnp.bfloat16)
    x_nhwc = jnp.transpose(x_bf, (0, 2, 3, 1))
    x_pad = jnp.pad(x_nhwc, ((0, 0), (PAD, PAD), (PAD, PAD), (0, 0)))

    out_flat = pl.pallas_call(
        _conv_bn_relu_kernel,
        out_shape=jax.ShapeDtypeStruct((N, H * W, COUT), jnp.float32),
        grid_spec=pltpu.PrefetchScalarGridSpec(
            num_scalar_prefetch=0,
            grid=(N,),
            in_specs=[
                pl.BlockSpec((1, H + 2 * PAD, W + 2 * PAD, CIN),
                             lambda n: (n, 0, 0, 0)),
                pl.BlockSpec((K * K * CIN, COUT), lambda n: (0, 0)),
                pl.BlockSpec((1, COUT), lambda n: (0, 0)),
            ],
            out_specs=pl.BlockSpec((1, H * W, COUT), lambda n: (n, 0, 0)),
            scratch_shapes=[pltpu.VMEM((H * W, K * K * CIN), jnp.bfloat16)],
        ),
        compiler_params=pltpu.CompilerParams(
            dimension_semantics=("parallel",)),
    )(x_pad, w_im2col, bias)

    # (N, H*W, COUT) -> (N, H, W, COUT) (free trailing-dim split) -> NCHW.
    return jnp.transpose(out_flat.reshape(N, H, W, COUT), (0, 3, 1, 2))


def _reference(x_nchw, w_oihw, gamma, beta, running_mean, running_var):
    """Module semantics (conv 'same' + eval-mode BN + ReLU), using the same
    bf16 operand quantization as the kernel so the comparison is tight."""
    scale = gamma / jnp.sqrt(running_var + BN_EPS)
    bias = beta - running_mean * scale
    w_hwio = (jnp.transpose(w_oihw, (2, 3, 1, 0)) * scale).astype(jnp.bfloat16)
    x_nhwc = jnp.transpose(x_nchw.astype(jnp.bfloat16), (0, 2, 3, 1))
    y = lax.conv_general_dilated(
        x_nhwc, w_hwio, window_strides=(1, 1), padding="SAME",
        dimension_numbers=("NHWC", "HWIO", "NHWC"),
        preferred_element_type=jnp.float32)
    y = jnp.maximum(y + bias, 0.0)
    return jnp.transpose(y, (0, 3, 1, 2))


if __name__ == "__main__":
    key = jax.random.PRNGKey(0)
    k_x, k_w, k_g, k_b, k_m, k_v = jax.random.split(key, 6)

    # Small deterministic example: batch=2, channels=32, spatial=16x16 (NCHW).
    N, H, W = 2, 16, 16
    x = jax.random.uniform(k_x, (N, CIN, H, W), dtype=jnp.float32)

    # Conv weights in PyTorch layout (COUT, CIN, K, K).
    w = 0.05 * jax.random.normal(k_w, (COUT, CIN, K, K), dtype=jnp.float32)

    # BatchNorm2d(32) parameters / running stats (deterministic, eval mode).
    gamma = 1.0 + 0.1 * jax.random.normal(k_g, (COUT,), dtype=jnp.float32)
    beta = 0.1 * jax.random.normal(k_b, (COUT,), dtype=jnp.float32)
    running_mean = 0.1 * jax.random.normal(k_m, (COUT,), dtype=jnp.float32)
    running_var = 1.0 + 0.1 * jax.random.uniform(k_v, (COUT,),
                                                 dtype=jnp.float32)

    out = conv_bn_relu(x, w, gamma, beta, running_mean, running_var)
    out = jax.block_until_ready(out)

    ref = jax.block_until_ready(
        _reference(x, w, gamma, beta, running_mean, running_var))

    assert out.shape == (N, COUT, H, W)
    max_err = float(jnp.max(jnp.abs(out - ref)))
    assert jnp.allclose(out, ref, atol=1e-2, rtol=1e-2), f"max abs err {max_err}"

    print("KERNEL_OK")
</pallas_src>

<mosaic_0001>
module attributes {stable_mosaic.version = 11 : i64} {
  func.func @_conv_bn_relu_kernel(%arg0: i32, %arg1: memref<1x18x18x32xbf16, #tpu.memory_space<vmem>>, %arg2: memref<288x32xbf16, #tpu.memory_space<vmem>>, %arg3: memref<1x32xf32, #tpu.memory_space<vmem>>, %arg4: memref<1x256x32xf32, #tpu.memory_space<vmem>>, %arg5: memref<256x288xbf16, #tpu.memory_space<vmem>>) attributes {dimension_semantics = [#tpu.dimension_semantics<parallel>], iteration_bounds = array<i64: 2>, scalar_prefetch = 0 : i64, scratch_operands = 1 : i64, tpu.core_type = #tpu.core_type<tc>, window_params = [{transform_indices = @transform_0, window_bounds = array<i64: 1, 18, 18, 32>}, {pipeline_mode = #tpu.pipeline_mode<synchronous>, transform_indices = @transform_1, window_bounds = array<i64: 288, 32>}, {pipeline_mode = #tpu.pipeline_mode<synchronous>, transform_indices = @transform_2, window_bounds = array<i64: 1, 32>}, {transform_indices = @transform_3, window_bounds = array<i64: 1, 256, 32>}]} {
    %c0 = arith.constant 0 : index
    %c0_0 = arith.constant 0 : index
    %c0_1 = arith.constant 0 : index
    %c0_2 = arith.constant 0 : index
    %0 = vector.load %arg1[%c0, %c0_0, %c0_1, %c0_2] : memref<1x18x18x32xbf16, #tpu.memory_space<vmem>>, vector<1x16x16x32xbf16>
    %1 = vector.shape_cast %0 : vector<1x16x16x32xbf16> to vector<16x16x32xbf16>
    %2 = vector.shape_cast %1 : vector<16x16x32xbf16> to vector<256x32xbf16>
    %c0_3 = arith.constant 0 : index
    %c0_4 = arith.constant 0 : index
    %3 = vector.load %arg5[%c0_3, %c0_4] : memref<256x288xbf16, #tpu.memory_space<vmem>>, vector<256x32xbf16>
    tpu.vector_store %arg5[%c0_3, %c0_4], %2 {strides = array<i32>} : memref<256x288xbf16, #tpu.memory_space<vmem>>, vector<256x32xbf16>,
    %c0_5 = arith.constant 0 : index
    %c0_6 = arith.constant 0 : index
    %c1 = arith.constant 1 : index
    %c0_7 = arith.constant 0 : index
    %4 = vector.load %arg1[%c0_5, %c0_6, %c1, %c0_7] : memref<1x18x18x32xbf16, #tpu.memory_space<vmem>>, vector<1x16x16x32xbf16>
    %5 = vector.shape_cast %4 : vector<1x16x16x32xbf16> to vector<16x16x32xbf16>
    %6 = vector.shape_cast %5 : vector<16x16x32xbf16> to vector<256x32xbf16>
    %c0_8 = arith.constant 0 : index
    %c32 = arith.constant 32 : index
    %7 = vector.load %arg5[%c0_8, %c32] : memref<256x288xbf16, #tpu.memory_space<vmem>>, vector<256x32xbf16>
    tpu.vector_store %arg5[%c0_8, %c32], %6 {strides = array<i32>} : memref<256x288xbf16, #tpu.memory_space<vmem>>, vector<256x32xbf16>,
    %c0_9 = arith.constant 0 : index
    %c0_10 = arith.constant 0 : index
    %c2 = arith.constant 2 : index
    %c0_11 = arith.constant 0 : index
    %8 = vector.load %arg1[%c0_9, %c0_10, %c2, %c0_11] : memref<1x18x18x32xbf16, #tpu.memory_space<vmem>>, vector<1x16x16x32xbf16>
    %9 = vector.shape_cast %8 : vector<1x16x16x32xbf16> to vector<16x16x32xbf16>
    %10 = vector.shape_cast %9 : vector<16x16x32xbf16> to vector<256x32xbf16>
    %c0_12 = arith.constant 0 : index
    %c64 = arith.constant 64 : index
    %11 = vector.load %arg5[%c0_12, %c64] : memref<256x288xbf16, #tpu.memory_space<vmem>>, vector<256x32xbf16>
    tpu.vector_store %arg5[%c0_12, %c64], %10 {strides = array<i32>} : memref<256x288xbf16, #tpu.memory_space<vmem>>, vector<256x32xbf16>,
    %c0_13 = arith.constant 0 : index
    %c1_14 = arith.constant 1 : index
    %c0_15 = arith.constant 0 : index
    %c0_16 = arith.constant 0 : index
    %12 = vector.load %arg1[%c0_13, %c1_14, %c0_15, %c0_16] : memref<1x18x18x32xbf16, #tpu.memory_space<vmem>>, vector<1x16x16x32xbf16>
    %13 = vector.shape_cast %12 : vector<1x16x16x32xbf16> to vector<16x16x32xbf16>
    %14 = vector.shape_cast %13 : vector<16x16x32xbf16> to vector<256x32xbf16>
    %c0_17 = arith.constant 0 : index
    %c96 = arith.constant 96 : index
    %15 = vector.load %arg5[%c0_17, %c96] : memref<256x288xbf16, #tpu.memory_space<vmem>>, vector<256x32xbf16>
    tpu.vector_store %arg5[%c0_17, %c96], %14 {strides = array<i32>} : memref<256x288xbf16, #tpu.memory_space<vmem>>, vector<256x32xbf16>,
    %c0_18 = arith.constant 0 : index
    %c1_19 = arith.constant 1 : index
    %c1_20 = arith.constant 1 : index
    %c0_21 = arith.constant 0 : index
    %16 = vector.load %arg1[%c0_18, %c1_19, %c1_20, %c0_21] : memref<1x18x18x32xbf16, #tpu.memory_space<vmem>>, vector<1x16x16x32xbf16>
    %17 = vector.shape_cast %16 : vector<1x16x16x32xbf16> to vector<16x16x32xbf16>
    %18 = vector.shape_cast %17 : vector<16x16x32xbf16> to vector<256x32xbf16>
    %c0_22 = arith.constant 0 : index
    %c128 = arith.constant 128 : index
    %19 = vector.load %arg5[%c0_22, %c128] : memref<256x288xbf16, #tpu.memory_space<vmem>>, vector<256x32xbf16>
    tpu.vector_store %arg5[%c0_22, %c128], %18 {strides = array<i32>} : memref<256x288xbf16, #tpu.memory_space<vmem>>, vector<256x32xbf16>,
    %c0_23 = arith.constant 0 : index
    %c1_24 = arith.constant 1 : index
    %c2_25 = arith.constant 2 : index
    %c0_26 = arith.constant 0 : index
    %20 = vector.load %arg1[%c0_23, %c1_24, %c2_25, %c0_26] : memref<1x18x18x32xbf16, #tpu.memory_space<vmem>>, vector<1x16x16x32xbf16>
    %21 = vector.shape_cast %20 : vector<1x16x16x32xbf16> to vector<16x16x32xbf16>
    %22 = vector.shape_cast %21 : vector<16x16x32xbf16> to vector<256x32xbf16>
    %c0_27 = arith.constant 0 : index
    %c160 = arith.constant 160 : index
    %23 = vector.load %arg5[%c0_27, %c160] : memref<256x288xbf16, #tpu.memory_space<vmem>>, vector<256x32xbf16>
    tpu.vector_store %arg5[%c0_27, %c160], %22 {strides = array<i32>} : memref<256x288xbf16, #tpu.memory_space<vmem>>, vector<256x32xbf16>,
    %c0_28 = arith.constant 0 : index
    %c2_29 = arith.constant 2 : index
    %c0_30 = arith.constant 0 : index
    %c0_31 = arith.constant 0 : index
    %24 = vector.load %arg1[%c0_28, %c2_29, %c0_30, %c0_31] : memref<1x18x18x32xbf16, #tpu.memory_space<vmem>>, vector<1x16x16x32xbf16>
    %25 = vector.shape_cast %24 : vector<1x16x16x32xbf16> to vector<16x16x32xbf16>
    %26 = vector.shape_cast %25 : vector<16x16x32xbf16> to vector<256x32xbf16>
    %c0_32 = arith.constant 0 : index
    %c192 = arith.constant 192 : index
    %27 = vector.load %arg5[%c0_32, %c192] : memref<256x288xbf16, #tpu.memory_space<vmem>>, vector<256x32xbf16>
    tpu.vector_store %arg5[%c0_32, %c192], %26 {strides = array<i32>} : memref<256x288xbf16, #tpu.memory_space<vmem>>, vector<256x32xbf16>,
    %c0_33 = arith.constant 0 : index
    %c2_34 = arith.constant 2 : index
    %c1_35 = arith.constant 1 : index
    %c0_36 = arith.constant 0 : index
    %28 = vector.load %arg1[%c0_33, %c2_34, %c1_35, %c0_36] : memref<1x18x18x32xbf16, #tpu.memory_space<vmem>>, vector<1x16x16x32xbf16>
    %29 = vector.shape_cast %28 : vector<1x16x16x32xbf16> to vector<16x16x32xbf16>
    %30 = vector.shape_cast %29 : vector<16x16x32xbf16> to vector<256x32xbf16>
    %c0_37 = arith.constant 0 : index
    %c224 = arith.constant 224 : index
    %31 = vector.load %arg5[%c0_37, %c224] : memref<256x288xbf16, #tpu.memory_space<vmem>>, vector<256x32xbf16>
    tpu.vector_store %arg5[%c0_37, %c224], %30 {strides = array<i32>} : memref<256x288xbf16, #tpu.memory_space<vmem>>, vector<256x32xbf16>,
    %c0_38 = arith.constant 0 : index
    %c2_39 = arith.constant 2 : index
    %c2_40 = arith.constant 2 : index
    %c0_41 = arith.constant 0 : index
    %32 = vector.load %arg1[%c0_38, %c2_39, %c2_40, %c0_41] : memref<1x18x18x32xbf16, #tpu.memory_space<vmem>>, vector<1x16x16x32xbf16>
    %33 = vector.shape_cast %32 : vector<1x16x16x32xbf16> to vector<16x16x32xbf16>
    %34 = vector.shape_cast %33 : vector<16x16x32xbf16> to vector<256x32xbf16>
    %c0_42 = arith.constant 0 : index
    %c256 = arith.constant 256 : index
    %35 = vector.load %arg5[%c0_42, %c256] : memref<256x288xbf16, #tpu.memory_space<vmem>>, vector<256x32xbf16>
    tpu.vector_store %arg5[%c0_42, %c256], %34 {strides = array<i32>} : memref<256x288xbf16, #tpu.memory_space<vmem>>, vector<256x32xbf16>,
    %c0_43 = arith.constant 0 : index
    %c0_44 = arith.constant 0 : index
    %36 = vector.load %arg5[%c0_43, %c0_44] : memref<256x288xbf16, #tpu.memory_space<vmem>>, vector<256x288xbf16>
    %c0_45 = arith.constant 0 : index
    %c0_46 = arith.constant 0 : index
    %37 = vector.load %arg2[%c0_45, %c0_46] : memref<288x32xbf16, #tpu.memory_space<vmem>>, vector<288x32xbf16>
    %cst = arith.constant dense<0.000000e+00> : vector<256x32xf32>
    %38 = tpu.matmul %36, %37, %cst {dimension_numbers = #tpu.dot_dimension_numbers<[1], [0], [0], [1], [0, 0, 1, 1], [], []>} : vector<256x288xbf16>, vector<288x32xbf16>, vector<256x32xf32> -> vector<256x32xf32>
    %c0_47 = arith.constant 0 : index
    %c0_48 = arith.constant 0 : index
    %39 = vector.load %arg3[%c0_47, %c0_48] : memref<1x32xf32, #tpu.memory_space<vmem>>, vector<1x32xf32>
    %40 = vector.broadcast %39 : vector<1x32xf32> to vector<256x32xf32>
    %41 = arith.addf %38, %40 : vector<256x32xf32>
    %cst_49 = arith.constant 0.000000e+00 : f32
    %42 = vector.broadcast %cst_49 : f32 to vector<256x32xf32>
    %43 = arith.maximumf %41, %42 : vector<256x32xf32>
    %44 = vector.shape_cast %43 : vector<256x32xf32> to vector<1x256x32xf32>
    %c0_50 = arith.constant 0 : index
    %c0_51 = arith.constant 0 : index
    %c0_52 = arith.constant 0 : index
    %45 = vector.load %arg4[%c0_50, %c0_51, %c0_52] : memref<1x256x32xf32, #tpu.memory_space<vmem>>, vector<1x256x32xf32>
    tpu.vector_store %arg4[%c0_50, %c0_51, %c0_52], %44 {strides = array<i32>} : memref<1x256x32xf32, #tpu.memory_space<vmem>>, vector<1x256x32xf32>,
    return
  }
  func.func @transform_0(%arg0: i32) -> (i32, i32, i32, i32) {
    %c0_i32 = arith.constant 0 : i32
    %c0_i32_0 = arith.constant 0 : i32
    %c0_i32_1 = arith.constant 0 : i32
    %c0_i32_2 = arith.constant 0 : i32
    return %arg0, %c0_i32, %c0_i32_0, %c0_i32_1 : i32, i32, i32, i32
  }
  func.func @transform_1(%arg0: i32) -> (i32, i32) {
    %c0_i32 = arith.constant 0 : i32
    %c0_i32_0 = arith.constant 0 : i32
    %c0_i32_1 = arith.constant 0 : i32
    return %c0_i32, %c0_i32_0 : i32, i32
  }
  func.func @transform_2(%arg0: i32) -> (i32, i32) {
    %c0_i32 = arith.constant 0 : i32
    %c0_i32_0 = arith.constant 0 : i32
    %c0_i32_1 = arith.constant 0 : i32
    return %c0_i32, %c0_i32_0 : i32, i32
  }
  func.func @transform_3(%arg0: i32) -> (i32, i32, i32) {
    %c0_i32 = arith.constant 0 : i32
    %c0_i32_0 = arith.constant 0 : i32
    %c0_i32_1 = arith.constant 0 : i32
    return %arg0, %c0_i32, %c0_i32_0 : i32, i32, i32
  }
}

</mosaic_0001>

<bundles_post_ra>
// kernel: tpu_custom_call.1
= control target key start
LH: loop header
LB: loop body
LE: loop exit
PB: predicated region body
PF: predicated region fallthrough
CT: control target
= control target key end

     0   :  { %s4829_s12 = smov 0   ;;  %s6843_s0 = inlined_call_operand.vmem [shape: bf16[2,18,18,32], index: 0, kind: input, shape index: {}]   ;;  %s6844_s1 = inlined_call_operand.vmem [shape: bf16[288,32], index: 1, kind: input, shape index: {}]   ;;  %s6845_s2 = inlined_call_operand.vmem [shape: f32[1,32], index: 2, kind: input, shape index: {}]   ;;  %s6846_s3 = inlined_call_operand.vmem [shape: f32[2,256,32], index: 3, kind: output, shape index: {}]  }
   0x1 LB: > { %s4137_s13 = sadd.s32 4294967295, %s4804_s12   ;;  %p4141_p0 = scmp.ge.s32.totalorder %s4804_s12, 1  ;;  %s4804_s12 = sphi %s4829_s12, %s13_s12  }
   0x2   : > { %p137_p1 = scmp.lt.s32.totalorder %s4804_s12, 3 }
   0x4   : > { %p138_p2 = pnand %p4141_p0, %p137_p1 }
   0x5   : > { %p161_p3 = scmp.lt.s32.totalorder (!%p138_p2), %s4137_s13, 1  ;;  %s4806_s18 = smov (!%p138_p2), 32  }
   0x6   : > { %141 = sbr.rel (%p138_p2) target bundleno = 745 (0x2e9), region = 32  ;;  %s4807_s4 = smov (!%p138_p2), 64  }
   0x7   : > { %s4808_s15 = smov (!%p138_p2), 96  }
   0xb   : > { %vm897_vm0 = vcmask 1042432   ;;  %vm898_vm1 = vcmask 1046532   ;;  %s6852_s13 = smov (!%p161_p3, %s4137_s13), 1  ;;  %vm285_vm2 = vsmask.f32 3328  ;;  %v4729_v61 = vld [vmem:[%s6844_s1 + $0x78] sm:$0xff]  }
   0xc   : > { %vm286_vm3 = vsmask.f32 7440  ;;  %s4717_s14 = smul.u32 216, %s6852_s13  ;;  %vm4840_vm4 = vmor %vm897_vm0, %vm898_vm1  ;;  %4535 = vmatprep.subr.bf16.mxu0 %v4729_v61  ;;  %4701 = vmatprep.subr.bf16.mxu1 %v4729_v61  ;;  %vm204_vm6 = vcmask 257024   ;;  %vm768_vm7 = vcmask 519424   ;;  %vm1108_vm8 = vcmask 781824  }
   0xd   : > { %vm4868_vm5 = vmor %vm285_vm2, %vm286_vm3  ;;  %vm1302_vm9 = vcmask 1044224   ;;  %vm3647_vm10 = vcmask 261120  }
   0xe   : > { %s4847_s17 = scalar_lea.vmem %s6843_s0, %s4717_s14 }
   0xf   : > { %v4241_v1 = vld [vmem:[%s4847_s17 + $0xc] sm:$0xe]  ;;  %v4851_v2 = vld [vmem:[%s4847_s17 + $0x10] sm:$0xf]  ;;  %v237_v11 = vld [vmem:[%s4847_s17] sm:$0xf] }
  0x10   : > { %v240_v3 = vld [vmem:[%s4847_s17 + $0xc] sm:$0xf]  ;;  %v4289_v4 = vrot.slane %v4241_v1, 9  ;;  %v1929_v5 = vrot.slane %v4851_v2, 5  ;;  %v241_v6 = vld [vmem:[%s4847_s17 + $0x10] sm:$0xf] }
  0x11   : > { %v313_v7 = vshrl.u32 %v240_v3, 16  ;;  %v316_v8 = vshll.u32 %v240_v3, 16  ;;  %v322_v9 = vshll.u32 %v241_v6, 16  ;;  %v326_v10 = vshrl.u32 %v241_v6, 16  ;;  %v238_v12 = vld [vmem:[%s4847_s17 + $0x4] sm:$0xf] }
  0x12   : > { %v1930_v13 = vsel %vm4840_vm4, %v4289_v4, %v1929_v5  ;;  %v289_v16 = vshrl.u32 %v237_v11, 16  ;;  %v242_v17 = vld [vmem:[%s4847_s17 + $0x14] sm:$0x1]  ;;  %v292_v19 = vshll.u32 %v237_v11, 16  ;;  %v298_v20 = vshll.u32 %v238_v12, 16  ;;  %v4736_v2 = vld [vmem:[%s6844_s1 + $0x20] sm:$0xff]  }
  0x13   : > { %v315_v14 = vrot.slane %v313_v7, 4  ;;  %v318_v15 = vrot.slane %v316_v8, 5  ;;  %2039 = vrot.lane.b32.xlu1 %v1930_v13, %s4806_s18  ;;  %v324_v18 = vrot.slane %v322_v9, 5  ;;  %v302_v21 = vshrl.u32 %v238_v12, 16  ;;  %v239_v22 = vld [vmem:[%s4847_s17 + $0x8] sm:$0x1] }
  0x14   : > { %v291_v24 = vrot.slane %v289_v16, 4  ;;  %v328_v25 = vrot.slane %v326_v10, 4  ;;  %v332_v26 = vshll.u32 %v242_v17, 16  ;;  %v244_v27 = vld [vmem:[%s4847_s17 + $0x1c] sm:$0xf]  ;;  %v294_v29 = vrot.slane %v292_v19, 5 }
  0x15   : > { %v319_v23 = vor.u32 %v318_v15, %v315_v14  ;;  %v300_v30 = vrot.slane %v298_v20, 5  ;;  %v304_v31 = vrot.slane %v302_v21, 4  ;;  %v308_v32 = vshll.u32 %v239_v22, 16  ;;  %v245_v33 = vld [vmem:[%s4847_s17 + $0x20] sm:$0x1]  ;;  %v4730_v14 = vld [vmem:[%s6844_s1 + $0x38] sm:$0xff]  }
  0x16   : > { %v329_v35 = vor.u32 %v328_v25, %v324_v18  ;;  %v334_v36 = vrot.slane %v332_v26, 5  ;;  %v346_v37 = vshll.u32 %v244_v27, 16  ;;  %v243_v38 = vld [vmem:[%s4847_s17 + $0x18] sm:$0xf]  ;;  %v295_v39 = vor.u32 %v294_v29, %v291_v24  ;;  %v247_v43 = vld [vmem:[%s4847_s17 + $0x28] sm:$0xf]  ;;  %4536 = vmatpush3.bf16.msra.mxu0 %v4730_v14  ;;  %4709 = vmatpush3.bf16.msra.mxu1 %v4730_v14 }
  0x17   : > { %v320_v34 = vrot.slane %v319_v23, 4  ;;  %v305_v40 = vor.u32 %v304_v31, %v300_v30  ;;  %v310_v41 = vrot.slane %v308_v32, 5  ;;  %v350_v42 = vshrl.u32 %v244_v27, 16  ;;  %v248_v52 = vld [vmem:[%s4847_s17 + $0x2c] sm:$0x1]  ;;  %v4731_v20 = vld [vmem:[%s6844_s1 + $0x70] sm:$0xff]  }
  0x18   : > { %v330_v45 = vrot.slane %v329_v35, 4  ;;  %v348_v46 = vrot.slane %v346_v37, 5  ;;  %v356_v47 = vshll.u32 %v245_v33, 16  ;;  %v296_v48 = vrot.slane %v295_v39, 4  ;;  %v246_v56 = vld [vmem:[%s4847_s17 + $0x24] sm:$0xf]  ;;  %4537 = vmatprep.subr.bf16.mxu0 %v4731_v20  ;;  %4702 = vmatprep.subr.bf16.mxu1 %v4731_v20 }
  0x19   : > { %v325_v44 = vsel %vm4868_vm5, %v320_v34, %v324_v18  ;;  %v306_v49 = vrot.slane %v305_v40, 4  ;;  %v352_v50 = vrot.slane %v350_v42, 4  ;;  %v337_v51 = vshrl.u32 %v243_v38, 16  ;;  %v249_v4 = vld [vmem:[%s4847_s17 + $0x30] sm:$0xf]  ;;  %v4738_v14 = vld [vmem:[%s6844_s1 + $0x18] sm:$0xff]  }
  0x1a   : > { %676 = vrot.lane.b32.xlu1 %v325_v44, %s4806_s18  ;;  %v335_v53 = vsel %vm4868_vm5, %v330_v45, %v334_v36  ;;  %v340_v54 = vshll.u32 %v243_v38, 16  ;;  %v370_v55 = vshll.u32 %v247_v43, 16  ;;  %v301_v57 = vsel %vm4868_vm5, %v296_v48, %v300_v30  ;;  %v801_v12 = vld [vmem:[%s4847_s17] sm:$0xe]  ;;  %v4896_v13 = vld [vmem:[%s4847_s17 + $0x34] sm:$0xf] }
  0x1b   : > { %v353_v58 = vor.u32 %v352_v50, %v348_v46  ;;  %v358_v59 = vrot.slane %v356_v47, 5  ;;  %v339_v60 = vrot.slane %v337_v51, 4  ;;  %672 = vrot.lane.b32.xlu0 %v301_v57, %s4806_s18  ;;  %v374_v1 = vshrl.u32 %v247_v43, 16  ;;  %v4904_v18 = vld [vmem:[%s4847_s17 + $0x4] sm:$0xf]  ;;  %v4732_v31 = vld [vmem:[%s6844_s1 + $0x30] sm:$0xff]  }
  0x1c   : > { %v342_v62 = vrot.slane %v340_v54, 5  ;;  %v4888_v63 = vrot.slane %v370_v55, 5  ;;  %v380_v3 = vshll.u32 %v248_v52, 16  ;;  %v311_v6 = vsel %vm4868_vm5, %v306_v49, %v310_v41  ;;  %v4337_v30 = vld [vmem:[%s4847_s17 + $0x18] sm:$0xf]  ;;  %4538 = vmatpush3.bf16.msra.mxu0 %v4732_v31  ;;  %v4733_v48 = vld [vmem:[%s6844_s1 + $0x68] sm:$0xff]   ;;  %4710 = vmatpush3.bf16.msra.mxu1 %v4732_v31 }
  0x1d   : > { %v354_v7 = vrot.slane %v353_v58, 4  ;;  %v361_v8 = vshrl.u32 %v246_v56, 16  ;;  %v364_v9 = vshll.u32 %v246_v56, 16  ;;  %v376_v11 = vrot.slane %v374_v1, 4  ;;  %v273_v40 = vld [vmem:[%s4847_s17 + $0x90] sm:$0xf]  ;;  %4539 = vmatprep.subr.bf16.mxu0 %v4733_v48  ;;  %4703 = vmatprep.subr.bf16.mxu1 %v4733_v48 }
  0x1e   : > { %678 = vrot.lane.b32.xlu1 %v335_v53, %s4806_s18  ;;  %v343_v10 = vor.u32 %v342_v62, %v339_v60  ;;  %v385_v19 = vshrl.u32 %v249_v4, 16  ;;  %v382_v23 = vrot.slane %v380_v3, 5  ;;  %v388_v24 = vshll.u32 %v249_v4, 16  ;;  %v4338_v49 = vld [vmem:[%s4847_s17 + $0x1c] sm:$0xf]  ;;  %v4734_v53 = vld [vmem:[%s6844_s1 + $0x28] sm:$0xff]  }
  0x1f   : > { %v359_v15 = vsel %vm4868_vm5, %v354_v7, %v358_v59  ;;  %v363_v16 = vrot.slane %v361_v8, 4  ;;  %v366_v17 = vrot.slane %v364_v9, 5  ;;  %674 = vrot.lane.b32.xlu0 %v311_v6, %s4806_s18  ;;  %v377_v22 = vor.u32 %v376_v11, %v4888_v63  ;;  %v4305_v55 = vld [vmem:[%s4847_s17 + $0x18] sm:$0xf]  ;;  %v4735_v58 = vld [vmem:[%s6844_s1 + $0x60] sm:$0xff]  }
  0x20   : > { %v344_v21 = vrot.slane %v343_v10, 4  ;;  %v4145_v26 = vrot.slane %v801_v12, 9  ;;  %v387_v27 = vrot.slane %v385_v19, 4  ;;  %v394_v29 = vshll.u32 %v4896_v13, 16  ;;  %v803_v59 = vld [vmem:[%s4847_s17 + $0x8] sm:$0x1]  ;;  %4540 = vmatpush3.bf16.msra.mxu0 %v4734_v53  ;;  %4711 = vmatpush3.bf16.msra.mxu1 %v4734_v53 }
  0x21   : > { %v367_v25 = vor.u32 %v366_v17, %v363_v16  ;;  %v378_v33 = vrot.slane %v377_v22, 4  ;;  %v902_v34 = vrot.slane %v4904_v18, 5  ;;  %v390_v35 = vrot.slane %v388_v24, 5  ;;  %v274_v1 = vld [vmem:[%s4847_s17 + $0x94] sm:$0xf]  ;;  %4541 = vmatprep.subr.bf16.mxu0 %v4735_v58  ;;  %4704 = vmatprep.subr.bf16.mxu1 %v4735_v58  ;;  %v4737_v12 = vld [vmem:[%s6844_s1 + $0x58] sm:$0xff]  }
  0x22   : > { %682 = vrot.lane.b32.xlu1 %v359_v15, %s4806_s18  ;;  %v349_v32 = vsel %vm4868_vm5, %v344_v21, %v348_v46  ;;  %v2409_v39 = vshrl.u32 %v4337_v30, 16  ;;  %v4928_v42 = vrot.slane %v394_v29, 5  ;;  %v2412_v43 = vshll.u32 %v4337_v30, 16  ;;  %v4243_v46 = vld [vmem:[%s4847_s17 + $0x14] sm:$0x1] }
  0x23   : > { %v368_v36 = vrot.slane %v367_v25, 4  ;;  %680 = vrot.lane.b32.xlu0 %v349_v32, %s4806_s18  ;;  %v383_v37 = vsel %vm4868_vm5, %v378_v33, %v382_v23  ;;  %v391_v38 = vor.u32 %v390_v35, %v387_v27  ;;  %v903_v44 = vsel %vm4840_vm4, %v4145_v26, %v902_v34  ;;  %v4161_v7 = vld [vmem:[%s4847_s17 + $0xc] sm:$0xf]  ;;  %v4739_v18 = vld [vmem:[%s6844_s1 + $0x50] sm:$0xff]   ;;  %v4339_v22 = vld [vmem:[%s4847_s17 + $0x20] sm:$0x1] }
  0x24   : > { %v2411_v47 = vrot.slane %v2409_v39, 4  ;;  %v2414_v50 = vrot.slane %v2412_v43, 5  ;;  %v577_v51 = vshrl.u32 %v273_v40, 16  ;;  %v580_v52 = vshll.u32 %v273_v40, 16  ;;  %4542 = vmatpush3.bf16.msra.mxu0 %v4736_v2  ;;  %4712 = vmatpush3.bf16.msra.mxu1 %v4736_v2  ;;  %v4740_v23 = vld [vmem:[%s6844_s1 + $0x10] sm:$0xff]  }
  0x25   : > { %v373_v41 = vsel %vm4868_vm5, %v368_v36, %v4888_v63  ;;  %v392_v45 = vrot.slane %v391_v38, 4  ;;  %v1931_v56 = vrot.slane %v1929_v5, 4  ;;  %v1932_v57 = vrot.slane %v4243_v46, 5  ;;  %4543 = vmatprep.subr.bf16.mxu0 %v4737_v12  ;;  %4705 = vmatprep.subr.bf16.mxu1 %v4737_v12  ;;  %v4277_v24 = vld [vmem:[%s4847_s17 + $0x9c] sm:$0xe]  ;;  %v4741_v38 = vld [vmem:[%s6844_s1 + $0x48] sm:$0xff]  }
  0x26   : > { %686 = vrot.lane.b32.xlu1 %v383_v37, %s4806_s18  ;;  %v2415_v60 = vor.u32 %v2414_v50, %v2411_v47  ;;  %v2418_v61 = vshll.u32 %v4338_v49, 16  ;;  %v579_v62 = vrot.slane %v577_v51, 4  ;;  %v582_v63 = vrot.slane %v580_v52, 5  ;;  %v4278_v25 = vld [vmem:[%s4847_s17 + $0xa0] sm:$0xf]  ;;  %v4742_v46 = vld [vmem:[%s6844_s1 + $0x8] sm:$0xff]  }
  0x27   : > { %684 = vrot.lane.b32.xlu0 %v373_v41, %s4806_s18  ;;  %v397_v54 = vsel %vm4868_vm5, %v392_v45, %v4928_v42  ;;  %v1933_v5 = vsel %vm4840_vm4, %v1931_v56, %v1932_v57  ;;  %v904_v3 = vrot.slane %v902_v34, 4  ;;  %v905_v4 = vrot.slane %v803_v59, 5  ;;  %v4306_v26 = vld [vmem:[%s4847_s17 + $0x1c] sm:$0xf]  ;;  %v837_v30 = vld [vmem:[%s4847_s17 + $0x90] sm:$0xe] }
  0x28   : > { %v2422_v6 = vshrl.u32 %v4338_v49, 16  ;;  %v2416_v8 = vrot.slane %v2415_v60, 4  ;;  %v2420_v9 = vrot.slane %v2418_v61, 5  ;;  %v583_v10 = vor.u32 %v582_v63, %v579_v62  ;;  %4544 = vmatpush3.bf16.msra.mxu0 %v4738_v14  ;;  %4713 = vmatpush3.bf16.msra.mxu1 %v4738_v14  ;;  %v275_v35 = vld [vmem:[%s4847_s17 + $0x98] sm:$0x1]  ;;  %v4743_v51 = vld [vmem:[%s6844_s1 + $0x40] sm:$0xff]  }
  0x29   : > { %v586_v11 = vshll.u32 %v274_v1, 16  ;;  %v906_v15 = vsel %vm4840_vm4, %v904_v3, %v905_v4  ;;  %v590_v16 = vshrl.u32 %v274_v1, 16  ;;  %4545 = vmatprep.subr.bf16.mxu0 %v4739_v18  ;;  %4706 = vmatprep.subr.bf16.mxu1 %v4739_v18  ;;  %v2428_v29 = vshll.u32 %v4339_v22, 16  ;;  %v838_v36 = vld [vmem:[%s4847_s17 + $0x94] sm:$0xf]  ;;  %v4744_v60 = vld [vmem:[%s6844_s1] sm:$0xff]  }
  0x2a   : > { %1012 = vrot.lane.b32.xlu1 %v903_v44, %s4807_s4  ;;  %v2424_v17 = vrot.slane %v2422_v6, 4  ;;  %v2421_v19 = vsel %vm4868_vm5, %v2416_v8, %v2420_v9  ;;  %v584_v20 = vrot.slane %v583_v10, 4  ;;  %v4301_v33 = vrot.slane %v4277_v24, 9  ;;  %v4373_v37 = vld [vmem:[%s4847_s17 + $0xa8] sm:$0xf] }
  0x2b   : > { %688 = vrot.lane.b32.xlu0 %v397_v54, %s4806_s18  ;;  %v588_v21 = vrot.slane %v586_v11, 5  ;;  %v592_v31 = vrot.slane %v590_v16, 4  ;;  %v2013_v34 = vrot.slane %v4278_v25, 5  ;;  %v4157_v39 = vrot.slane %v837_v30, 9  ;;  %v4162_v40 = vld [vmem:[%s4847_s17 + $0x10] sm:$0xf] }
  0x2c   : > { %v2425_v27 = vor.u32 %v2424_v17, %v2420_v9  ;;  %4546 = vmatpush3.bf16.msra.mxu0 %v4740_v23  ;;  %4714 = vmatpush3.bf16.msra.mxu1 %v4740_v23  ;;  %v2430_v43 = vrot.slane %v2428_v29, 5  ;;  %v596_v45 = vshll.u32 %v275_v35, 16  ;;  %v986_v48 = vrot.slane %v838_v36, 5  ;;  %v4279_v56 = vld [vmem:[%s4847_s17 + $0xa4] sm:$0x1] }
  0x2d   : > { %v589_v32 = vsel %vm4868_vm5, %v584_v20, %v588_v21  ;;  %v593_v44 = vor.u32 %v592_v31, %v588_v21  ;;  %4547 = vmatprep.subr.bf16.mxu0 %v4741_v38  ;;  %v2014_v47 = vsel %vm4840_vm4, %v4301_v33, %v2013_v34  ;;  %v2697_v49 = vshrl.u32 %v4373_v37, 16  ;;  %4707 = vmatprep.subr.bf16.mxu1 %v4741_v38  ;;  %v4374_v59 = vld [vmem:[%s4847_s17 + $0xac] sm:$0xf]  ;;  %v839_v1 = vld [vmem:[%s4847_s17 + $0x98] sm:$0x1] }
  0x2e   : > { %2232 = vrot.lane.b32.xlu1 %v4305_v55, %s4807_s4  ;;  %v2426_v41 = vrot.slane %v2425_v27, 4  ;;  %v2700_v50 = vshll.u32 %v4373_v37, 16  ;;  %v598_v54 = vrot.slane %v596_v45, 5  ;;  %v987_v55 = vsel %vm4840_vm4, %v4157_v39, %v986_v48  ;;  %v4329_v2 = vld [vmem:[%s4847_s17 + $0xa8] sm:$0xf] }
  0x2f   : > { %2041 = vrot.lane.b32.xlu0 %v1933_v5, %s4806_s18  ;;  %v594_v53 = vrot.slane %v593_v44, 4  ;;  %v2699_v57 = vrot.slane %v2697_v49, 4  ;;  %v2015_v62 = vrot.slane %v2013_v34, 4  ;;  %v2016_v63 = vrot.slane %v4279_v56, 5  ;;  %v4185_v8 = vld [vmem:[%s4847_s17 + $0x9c] sm:$0xf] }
  0x30   : > { %4548 = vmatpush3.bf16.msra.mxu0 %v4742_v46  ;;  %4715 = vmatpush3.bf16.msra.mxu1 %v4742_v46  ;;  %v2431_v52 = vsel %vm4868_vm5, %v2426_v41, %v2430_v43  ;;  %v2702_v58 = vrot.slane %v2700_v50, 5  ;;  %v2706_v3 = vshll.u32 %v4374_v59, 16  ;;  %v988_v4 = vrot.slane %v986_v48, 4  ;;  %v4244_v12 = vld [vmem:[%s4847_s17 + $0x18] sm:$0xe] }
  0x31   : > { %4549 = vmatprep.subr.bf16.mxu0 %v4743_v51  ;;  %4708 = vmatprep.subr.bf16.mxu1 %v4743_v51  ;;  %v599_v61 = vsel %vm4868_vm5, %v594_v53, %v598_v54  ;;  %v989_v6 = vrot.slane %v839_v1, 5  ;;  %v2710_v9 = vshrl.u32 %v4374_v59, 16  ;;  %v4245_v14 = vld [vmem:[%s4847_s17 + $0x1c] sm:$0xf]  ;;  %v804_v16 = vld [vmem:[%s4847_s17 + $0xc] sm:$0xe] }
  0x32   : > { %1206 = vrot.lane.b32.xlu1 %v4161_v7, %s4808_s15  ;;  %v2703_v5 = vor.u32 %v2702_v58, %v2699_v57  ;;  %v2017_v7 = vsel %vm4840_vm4, %v2015_v62, %v2016_v63  ;;  %v2708_v11 = vrot.slane %v2706_v3, 5  ;;  %v4193_v17 = vld [vmem:[%s4847_s17 + $0xc] sm:$0xf]  ;;  %v4290_v18 = vrot.slane %v4244_v12, 9  ;;  %v5036_v21 = vld [vmem:[%s4847_s17 + $0x10] sm:$0xf] }
  0x33   : > { %1014 = vrot.lane.b32.xlu0 %v906_v15, %s4807_s4  ;;  %v990_v15 = vsel %vm4840_vm4, %v988_v4, %v989_v6  ;;  %v2712_v20 = vrot.slane %v2710_v9, 4  ;;  %v1384_v22 = vshrl.u32 %v4193_v17, 16  ;;  %v4375_v24 = vld [vmem:[%s4847_s17 + $0xb0] sm:$0x1]  ;;  %v4340_v25 = vld [vmem:[%s4847_s17 + $0x24] sm:$0xf] }
  0x34   : > { %4550 = vmatpush3.bf16.msra.mxu0 %v4744_v60  ;;  %4716 = vmatpush3.bf16.msra.mxu1 %v4744_v60  ;;  %v2704_v10 = vrot.slane %v2703_v5, 4  ;;  %v1393_v27 = vshll.u32 %v5036_v21, 16  ;;  %v5044_v29 = vld [vmem:[%s4847_s17 + $0x10] sm:$0xf]  ;;  %v4330_v31 = vld [vmem:[%s4847_s17 + $0xac] sm:$0xf] }
  0x35   : > { %v1386_v30 = vrot.slane %v1384_v22, 4  ;;  %v174_v34 = vld [vmem:[%s4847_s17 + $0xc] sm:$0xf]  ;;  %v2713_v35 = vor.u32 %v2712_v20, %v2708_v11  ;;  %v2716_v36 = vshll.u32 %v4375_v24, 16  ;;  %v2433_v37 = vshrl.u32 %v4340_v25, 16 }
  0x36   : > { %2792 = vrot.lane.b32.xlu1 %v2421_v19, %s4808_s15  ;;  %v1936_v19 = vrot.slane %v4245_v14, 5  ;;  %v2709_v23 = vsel %vm4868_vm5, %v2704_v10, %v2708_v11  ;;  %v2436_v38 = vshll.u32 %v4340_v25, 16  ;;  %207 = vst.msk [vmem:[#allocation2 + $0x18] sm:$0xf] %vm204_vm6, %v174_v34  ;;  %v172_v39 = vld [vmem:[%s4847_s17] sm:$0xf] }
  0x37   : > { %2234 = vrot.lane.b32.xlu0 %v4306_v26, %s4807_s4  ;;  %v1387_v26 = vshll.u32 %v4193_v17, 16  ;;  %v909_v41 = vrot.slane %v5044_v29, 5  ;;  %v5055_v44 = vrot.slane %v1393_v27, 5  ;;  %205 = vst.msk [vmem:[#allocation2] sm:$0xf] %vm204_vm6, %v172_v39  ;;  %v2714_v50 = vrot.slane %v2713_v35, 4 }
  0x38   : > { %v175_v45 = vld [vmem:[%s4847_s17 + $0x10] sm:$0xf]  ;;  %v276_v46 = vld [vmem:[%s4847_s17 + $0x9c] sm:$0xf]  ;;  %v4186_v48 = vld [vmem:[%s4847_s17 + $0xa0] sm:$0xf] }
  0x39   : > { %v1389_v33 = vrot.slane %v1387_v26, 5  ;;  %208 = vst.msk [vmem:[#allocation2 + $0x24] sm:$0xf] %vm204_vm6, %v175_v45  ;;  %v2718_v51 = vrot.slane %v2716_v36, 5  ;;  %v2435_v53 = vrot.slane %v2433_v37, 4  ;;  %v2438_v54 = vrot.slane %v2436_v38, 5 }
  0x3a   : > { %720 = vrot.lane.b32.xlu1 %v589_v32, %s4806_s18  ;;  %v4146_v32 = vrot.slane %v804_v16, 9  ;;  %v601_v56 = vshrl.u32 %v276_v46, 16  ;;  %v604_v57 = vshll.u32 %v276_v46, 16  ;;  %v177_v59 = vld [vmem:[%s4847_s17 + $0x1c] sm:$0xf]  ;;  %v1938_v63 = vrot.slane %v1936_v19, 4 }
  0x3b   : > { %1208 = vrot.lane.b32.xlu0 %v4162_v40, %s4808_s15  ;;  %v1937_v40 = vsel %vm4840_vm4, %v4290_v18, %v1936_v19  ;;  %v1390_v43 = vor.u32 %v1389_v33, %v1386_v30  ;;  %v176_v60 = vld [vmem:[%s4847_s17 + $0x18] sm:$0xf]  ;;  %210 = vst.msk [vmem:[#allocation2 + $0x3c] sm:$0xf] %vm204_vm6, %v177_v59  ;;  %v4307_v62 = vld [vmem:[%s4847_s17 + $0x24] sm:$0xf]  ;;  %v2719_v5 = vsel %vm4868_vm5, %v2714_v50, %v2718_v51 }
  0x3c   : > { %209 = vst.msk [vmem:[#allocation2 + $0x30] sm:$0xf] %vm204_vm6, %v176_v60  ;;  %v806_v3 = vld [vmem:[%s4847_s17 + $0x14] sm:$0x1]  ;;  %v179_v4 = vld [vmem:[%s4847_s17 + $0x28] sm:$0xf] }
  0x3d   : > { %v1391_v49 = vrot.slane %v1390_v43, 4  ;;  %v178_v6 = vld [vmem:[%s4847_s17 + $0x24] sm:$0xf]  ;;  %v277_v9 = vld [vmem:[%s4847_s17 + $0xa0] sm:$0xf]  ;;  %v603_v10 = vrot.slane %v601_v56, 4 }
  0x3e   : > { %2087 = vrot.lane.b32.xlu1 %v2014_v47, %s4806_s18  ;;  %v173_v47 = vld [vmem:[%s4847_s17 + $0x4] sm:$0xf]  ;;  %v606_v11 = vrot.slane %v604_v57, 5  ;;  %212 = vst.msk [vmem:[#allocation2 + $0x54] sm:$0xf] %vm204_vm6, %v179_v4  ;;  %v398_v12 = vshrl.u32 %v4896_v13, 16 }
  0x3f   : > { %2794 = vrot.lane.b32.xlu0 %v2431_v52, %s4808_s15  ;;  %206 = vst.msk [vmem:[#allocation2 + $0xc] sm:$0xf] %vm204_vm6, %v173_v47  ;;  %v4246_v52 = vld [vmem:[%s4847_s17 + $0x20] sm:$0x1]  ;;  %v1396_v58 = vsel %vm4868_vm5, %v1391_v49, %v5055_v44  ;;  %211 = vst.msk [vmem:[#allocation2 + $0x48] sm:$0xf] %vm204_vm6, %v178_v6 }
  0x40   : > { %1799 = vst.msk [vmem:[#allocation2 + $0x4] sm:$0xf] %vm204_vm6, %v1396_v58  ;;  %v1939_v1 = vrot.slane %v4246_v52, 5  ;;  %v911_v18 = vrot.slane %v909_v41, 4  ;;  %v912_v19 = vrot.slane %v806_v3, 5  ;;  %v610_v20 = vshll.u32 %v277_v9, 16 }
  0x41   : > { %v4163_v13 = vld [vmem:[%s4847_s17 + $0x18] sm:$0xf]  ;;  %v607_v24 = vor.u32 %v606_v11, %v603_v10  ;;  %v4280_v25 = vld [vmem:[%s4847_s17 + $0xa8] sm:$0xe]  ;;  %v614_v27 = vshrl.u32 %v277_v9, 16 }
  0x42   : > { %1060 = vrot.lane.b32.xlu1 %v987_v55, %s4807_s4  ;;  %v910_v55 = vsel %vm4840_vm4, %v4146_v32, %v909_v41  ;;  %v1940_v17 = vsel %vm4840_vm4, %v1938_v63, %v1939_v1  ;;  %v5102_v29 = vld [vmem:[%s4847_s17 + $0xac] sm:$0xf]  ;;  %v5104_v32 = vrot.slane %v398_v12, 4  ;;  %v913_v35 = vsel %vm4840_vm4, %v911_v18, %v912_v19  ;;  %v840_v47 = vld [vmem:[%s4847_s17 + $0x9c] sm:$0xe] }
  0x43   : > { %722 = vrot.lane.b32.xlu0 %v599_v61, %s4806_s18  ;;  %v4341_v61 = vld [vmem:[%s4847_s17 + $0x28] sm:$0xf]  ;;  %v4342_v33 = vld [vmem:[%s4847_s17 + $0x2c] sm:$0x1]  ;;  %v612_v36 = vrot.slane %v610_v20, 5  ;;  %v4302_v37 = vrot.slane %v4280_v25, 9 }
  0x44   : > { %v2446_v14 = vshrl.u32 %v4341_v61, 16  ;;  %v2020_v41 = vrot.slane %v5102_v29, 5  ;;  %v401_v43 = vor.u32 %v5104_v32, %v4928_v42  ;;  %v2452_v46 = vshll.u32 %v4342_v33, 16  ;;  %v278_v51 = vld [vmem:[%s4847_s17 + $0xa4] sm:$0x1] }
  0x45   : > { %v616_v49 = vrot.slane %v614_v27, 4  ;;  %v4376_v52 = vld [vmem:[%s4847_s17 + $0xb4] sm:$0xf]  ;;  %v4164_v56 = vld [vmem:[%s4847_s17 + $0x1c] sm:$0xf] }
  0x46   : > { %2280 = vrot.lane.b32.xlu1 %v4329_v2, %s4807_s4  ;;  %v1397_v2 = vshrl.u32 %v5036_v21, 16  ;;  %v4195_v21 = vld [vmem:[%s4847_s17 + $0x14] sm:$0x1]  ;;  %v2448_v30 = vrot.slane %v2446_v14, 4  ;;  %v2454_v58 = vrot.slane %v2452_v46, 5  ;;  %v2021_v63 = vsel %vm4840_vm4, %v4302_v37, %v2020_v41 }
  0x47   : > { %2089 = vrot.lane.b32.xlu0 %v2017_v7, %s4806_s18  ;;  %v2439_v7 = vor.u32 %v2438_v54, %v2435_v53  ;;  %v196_v53 = vld [vmem:[%s4847_s17 + $0x90] sm:$0xf]  ;;  %v617_v60 = vor.u32 %v616_v49, %v612_v36  ;;  %v4229_v1 = vld [vmem:[%s4847_s17 + $0x9c] sm:$0xf]  ;;  %v2022_v25 = vrot.slane %v2020_v41, 4 }
  0x48   : > { %v1399_v16 = vrot.slane %v1397_v2, 4  ;;  %229 = vst.msk [vmem:[#allocation2 + $0x120] sm:$0xf] %vm204_vm6, %v196_v53  ;;  %v4230_v2 = vld [vmem:[%s4847_s17 + $0xa0] sm:$0xf]  ;;  %v1672_v3 = vshrl.u32 %v4229_v1, 16 }
  0x49   : > { %v2440_v22 = vrot.slane %v2439_v7, 4  ;;  %v1675_v4 = vshll.u32 %v4229_v1, 16  ;;  %v1681_v6 = vshll.u32 %v4230_v2, 16  ;;  %v618_v7 = vrot.slane %v617_v60, 4  ;;  %v4282_v9 = vld [vmem:[%s4847_s17 + $0xb0] sm:$0x1] }
  0x4a   : > { %1254 = vrot.lane.b32.xlu1 %v4185_v8, %s4808_s15  ;;  %v2442_v8 = vshll.u32 %v4341_v61, 16  ;;  %v1400_v26 = vor.u32 %v1399_v16, %v5055_v44  ;;  %v4308_v44 = vld [vmem:[%s4847_s17 + $0x28] sm:$0xf]  ;;  %v620_v61 = vshll.u32 %v278_v51, 16  ;;  %v1674_v10 = vrot.slane %v1672_v3, 4 }
  0x4b   : > { %1062 = vrot.lane.b32.xlu0 %v990_v15, %s4807_s4  ;;  %v180_v15 = vld [vmem:[%s4847_s17 + $0x30] sm:$0xf]  ;;  %v1677_v11 = vrot.slane %v1675_v4, 5  ;;  %v1685_v12 = vshrl.u32 %v4230_v2, 16  ;;  %v197_v16 = vld [vmem:[%s4847_s17 + $0x94] sm:$0xf] }
  0x4c   : > { %213 = vst.msk [vmem:[#allocation2 + $0x60] sm:$0xf] %vm204_vm6, %v180_v15  ;;  %v1401_v34 = vrot.slane %v1400_v26, 4  ;;  %v1683_v20 = vrot.slane %v1681_v6, 5  ;;  %230 = vst.msk [vmem:[#allocation2 + $0x12c] sm:$0xf] %vm204_vm6, %v197_v16 }
  0x4d   : > { %v1678_v19 = vor.u32 %v1677_v11, %v1674_v10  ;;  %v2023_v26 = vrot.slane %v4282_v9, 5  ;;  %v4331_v29 = vld [vmem:[%s4847_s17 + $0xb4] sm:$0xf]  ;;  %v4248_v49 = vld [vmem:[%s4847_s17 + $0x28] sm:$0xf] }
  0x4e   : > { %2840 = vrot.lane.b32.xlu1 %v2709_v23, %s4808_s15  ;;  %v2444_v23 = vrot.slane %v2442_v8, 5  ;;  %v622_v8 = vrot.slane %v620_v61, 5  ;;  %v4197_v53 = vld [vmem:[%s4847_s17 + $0x1c] sm:$0xf]  ;;  %v1943_v60 = vrot.slane %v4248_v49, 5 }
  0x4f   : > { %2282 = vrot.lane.b32.xlu0 %v4330_v31, %s4807_s4  ;;  %v1403_v31 = vshll.u32 %v4195_v21, 16  ;;  %v4377_v21 = vld [vmem:[%s4847_s17 + $0xb8] sm:$0xf]  ;;  %v4378_v61 = vld [vmem:[%s4847_s17 + $0xbc] sm:$0x1] }
  0x50   : > { %v2445_v39 = vsel %vm4868_vm5, %v2440_v22, %v2444_v23  ;;  %v2449_v45 = vor.u32 %v2448_v30, %v2444_v23  ;;  %v4231_v22 = vld [vmem:[%s4847_s17 + $0xa4] sm:$0x1]  ;;  %v1687_v23 = vrot.slane %v1685_v12, 4  ;;  %v2730_v33 = vshll.u32 %v4377_v21, 16  ;;  %v4198_v12 = vld [vmem:[%s4847_s17 + $0x20] sm:$0x1] }
  0x51   : > { %v1405_v38 = vrot.slane %v1403_v31, 5  ;;  %v1691_v27 = vshll.u32 %v4231_v22, 16  ;;  %v842_v30 = vld [vmem:[%s4847_s17 + $0xa4] sm:$0x1]  ;;  %v2734_v37 = vshrl.u32 %v4377_v21, 16  ;;  %v2740_v9 = vshll.u32 %v4378_v61, 16 }
  0x52   : > { %2043 = vrot.lane.b32.xlu1 %v1937_v40, %s4806_s18  ;;  %v608_v40 = vrot.slane %v607_v24, 4  ;;  %v2450_v57 = vrot.slane %v2449_v45, 4  ;;  %v623_v24 = vsel %vm4868_vm5, %v618_v7, %v622_v8  ;;  %v996_v41 = vrot.slane %v842_v30, 5  ;;  %v4187_v45 = vld [vmem:[%s4847_s17 + $0xa8] sm:$0xf] }
  0x53   : > { %1256 = vrot.lane.b32.xlu0 %v4186_v48, %s4808_s15  ;;  %v5119_v48 = vld [vmem:[%s4847_s17 + $0xa0] sm:$0xf]  ;;  %v1406_v50 = vsel %vm4868_vm5, %v1401_v34, %v1405_v38  ;;  %v2736_v51 = vrot.slane %v2734_v37, 4  ;;  %v4332_v8 = vld [vmem:[%s4847_s17 + $0xb8] sm:$0xf] }
  0x54   : > { %1800 = vst.msk [vmem:[#allocation2 + $0x10] sm:$0xf] %vm204_vm6, %v1406_v50  ;;  %v613_v54 = vsel %vm4868_vm5, %v608_v40, %v612_v36  ;;  %v993_v59 = vrot.slane %v5119_v48, 5  ;;  %v2455_v14 = vsel %vm4868_vm5, %v2450_v57, %v2454_v58  ;;  %v1693_v36 = vrot.slane %v1691_v27, 5  ;;  %v198_v37 = vld [vmem:[%s4847_s17 + $0x9c] sm:$0xf] }
  0x55   : > { %231 = vst.msk [vmem:[#allocation2 + $0x138] sm:$0xf] %vm204_vm6, %v198_v37  ;;  %v4232_v49 = vld [vmem:[%s4847_s17 + $0xa8] sm:$0xf]  ;;  %v281_v37 = vld [vmem:[%s4847_s17 + $0xb0] sm:$0x1] }
  0x56   : > { %1016 = vrot.lane.b32.xlu1 %v910_v55, %s4807_s4  ;;  %v4158_v55 = vrot.slane %v840_v47, 9  ;;  %v995_v40 = vrot.slane %v993_v59, 4  ;;  %v2732_v47 = vrot.slane %v2730_v33, 5  ;;  %v4327_v0 = vld [vmem:[%s4847_s17 + $0x9c] sm:$0xf] }
  0x57   : > { %2842 = vrot.lane.b32.xlu0 %v2719_v5, %s4808_s15  ;;  %v2724_v5 = vshll.u32 %v4376_v52, 16 }
  0x58   : > { %v994_v15 = vsel %vm4840_vm4, %v4158_v55, %v993_v59  ;;  %v807_v55 = vld [vmem:[%s4847_s17 + $0x18] sm:$0xe]  ;;  %v2737_v6 = vor.u32 %v2736_v51, %v2732_v47 }
  0x59   : > { %v2726_v18 = vrot.slane %v2724_v5, 5  ;;  %v1421_v5 = vshrl.u32 %v4197_v53, 16  ;;  %v4147_v3 = vrot.slane %v807_v55, 9 }
  0x5a   : > { %2236 = vrot.lane.b32.xlu1 %v4307_v62, %s4807_s4  ;;  %v2721_v62 = vshrl.u32 %v4376_v52, 16  ;;  %v4196_v52 = vld [vmem:[%s4847_s17 + $0x18] sm:$0xf]  ;;  %v2738_v21 = vrot.slane %v2737_v6, 4  ;;  %v4234_v6 = vld [vmem:[%s4847_s17 + $0xb0] sm:$0x1] }
  0x5b   : > { %2045 = vrot.lane.b32.xlu0 %v1940_v17, %s4806_s18  ;;  %v1408_v57 = vshrl.u32 %v4196_v52, 16  ;;  %v1411_v58 = vshll.u32 %v4196_v52, 16  ;;  %v1423_v16 = vrot.slane %v1421_v5, 4 }
  0x5c   : > { %v2723_v17 = vrot.slane %v2721_v62, 4  ;;  %v4343_v62 = vld [vmem:[%s4847_s17 + $0x30] sm:$0xf] }
  0x5d   : > { %v1410_v1 = vrot.slane %v1408_v57, 4  ;;  %v1413_v2 = vrot.slane %v1411_v58, 5  ;;  %v2457_v10 = vshrl.u32 %v4343_v62, 16 }
  0x5e   : > { %1210 = vrot.lane.b32.xlu1 %v4163_v13, %s4808_s15  ;;  %v1679_v13 = vrot.slane %v1678_v19, 4  ;;  %v2727_v31 = vor.u32 %v2726_v18, %v2723_v17  ;;  %v279_v17 = vld [vmem:[%s4847_s17 + $0xa8] sm:$0xf]  ;;  %v1427_v19 = vshll.u32 %v4198_v12, 16 }
  0x5f   : > { %1018 = vrot.lane.b32.xlu0 %v913_v35, %s4807_s4  ;;  %v1688_v35 = vor.u32 %v1687_v23, %v1683_v20  ;;  %v1414_v11 = vor.u32 %v1413_v2, %v1410_v1  ;;  %v4188_v23 = vld [vmem:[%s4847_s17 + $0xac] sm:$0xf]  ;;  %v628_v33 = vshll.u32 %v279_v17, 16  ;;  %v4165_v1 = vld [vmem:[%s4847_s17 + $0x24] sm:$0xf] }
  0x60   : > { %v1684_v34 = vsel %vm4868_vm5, %v1679_v13, %v1683_v20  ;;  %v2728_v46 = vrot.slane %v2727_v31, 4  ;;  %v4249_v13 = vld [vmem:[%s4847_s17 + $0x2c] sm:$0x1]  ;;  %v1429_v27 = vrot.slane %v1427_v19, 5  ;;  %v625_v31 = vshrl.u32 %v279_v17, 16 }
  0x61   : > { %1823 = vst.msk [vmem:[#allocation2 + $0x124] sm:$0xf] %vm204_vm6, %v1684_v34  ;;  %v1689_v38 = vrot.slane %v1688_v35, 4  ;;  %v1415_v18 = vrot.slane %v1414_v11, 4  ;;  %v1945_v35 = vrot.slane %v1943_v60, 4  ;;  %v1715_v17 = vshll.u32 %v4234_v6, 16 }
  0x62   : > { %2796 = vrot.lane.b32.xlu1 %v2445_v39, %s4808_s15  ;;  %v2024_v39 = vsel %vm4840_vm4, %v2022_v25, %v2023_v26  ;;  %v2733_v59 = vsel %vm4868_vm5, %v2728_v46, %v2732_v47  ;;  %v2459_v25 = vrot.slane %v2457_v10, 4  ;;  %v627_v47 = vrot.slane %v625_v31, 4  ;;  %v843_v31 = vld [vmem:[%s4847_s17 + $0xa8] sm:$0xe]  ;;  %v4285_v6 = vld [vmem:[%s4847_s17 + $0xbc] sm:$0x1] }
  0x63   : > { %2238 = vrot.lane.b32.xlu0 %v4308_v44, %s4807_s4  ;;  %v4247_v44 = vld [vmem:[%s4847_s17 + $0x24] sm:$0xe]  ;;  %v1694_v48 = vsel %vm4868_vm5, %v1689_v38, %v1693_v36  ;;  %v1946_v36 = vrot.slane %v4249_v13, 5  ;;  %v4309_v38 = vld [vmem:[%s4847_s17 + $0x30] sm:$0xf] }
  0x64   : > { %1824 = vst.msk [vmem:[#allocation2 + $0x130] sm:$0xf] %vm204_vm6, %v1694_v48  ;;  %v4291_v50 = vrot.slane %v4247_v44, 9  ;;  %v630_v48 = vrot.slane %v628_v33, 5 }
  0x65   : > { %v1947_v51 = vsel %vm4840_vm4, %v1945_v35, %v1946_v36  ;;  %v5251_v36 = vld [vmem:[%s4847_s17 + $0xac] sm:$0xf] }
  0x66   : > { %724 = vrot.lane.b32.xlu1 %v613_v54, %s4806_s18  ;;  %v997_v54 = vsel %vm4840_vm4, %v995_v40, %v996_v41  ;;  %v809_v41 = vld [vmem:[%s4847_s17 + $0x20] sm:$0x1]  ;;  %v631_v5 = vor.u32 %v630_v48, %v627_v47 }
  0x67   : > { %1212 = vrot.lane.b32.xlu0 %v4164_v56, %s4808_s15  ;;  %v5178_v56 = vld [vmem:[%s4847_s17 + $0x1c] sm:$0xf] }
  0x68   : > { %v916_v4 = vrot.slane %v5178_v56, 5  ;;  %v1699_v56 = vshll.u32 %v4232_v49, 16  ;;  %v632_v19 = vrot.slane %v631_v5, 4 }
  0x6a   : > { %2091 = vrot.lane.b32.xlu1 %v2021_v63, %s4806_s18  ;;  %v1417_v63 = vshll.u32 %v4197_v53, 16  ;;  %v917_v20 = vsel %vm4840_vm4, %v4147_v3, %v916_v4  ;;  %v918_v52 = vrot.slane %v916_v4, 4  ;;  %v1696_v53 = vshrl.u32 %v4232_v49, 16 }
  0x6b   : > { %2798 = vrot.lane.b32.xlu0 %v2455_v14, %s4808_s15  ;;  %v1944_v14 = vsel %vm4840_vm4, %v4291_v50, %v1943_v60  ;;  %v4233_v50 = vld [vmem:[%s4847_s17 + $0xac] sm:$0xf]  ;;  %v1701_v3 = vrot.slane %v1699_v56, 5 }
  0x6c   : > { %v1419_v7 = vrot.slane %v1417_v63, 5  ;;  %v1705_v57 = vshll.u32 %v4233_v50, 16  ;;  %v1698_v61 = vrot.slane %v1696_v53, 4  ;;  %v199_v63 = vld [vmem:[%s4847_s17 + $0xa0] sm:$0xf] }
  0x6d   : > { %232 = vst.msk [vmem:[#allocation2 + $0x144] sm:$0xf] %vm204_vm6, %v199_v63 }
  0x6e   : > { %1064 = vrot.lane.b32.xlu1 %v994_v15, %s4807_s4  ;;  %v2460_v15 = vshll.u32 %v4343_v62, 16  ;;  %v1424_v22 = vor.u32 %v1423_v16, %v1419_v7  ;;  %v1420_v26 = vsel %vm4868_vm5, %v1415_v18, %v1419_v7  ;;  %v1709_v62 = vshrl.u32 %v4233_v50, 16  ;;  %v4283_v7 = vld [vmem:[%s4847_s17 + $0xb4] sm:$0xe]  ;;  %v4345_v16 = vld [vmem:[%s4847_s17 + $0x38] sm:$0x1] }
  0x6f   : > { %726 = vrot.lane.b32.xlu0 %v623_v24, %s4806_s18  ;;  %v2742_v24 = vrot.slane %v2740_v9, 5  ;;  %1801 = vst.msk [vmem:[#allocation2 + $0x1c] sm:$0xf] %vm204_vm6, %v1420_v26  ;;  %v1707_v4 = vrot.slane %v1705_v57, 5  ;;  %v1702_v10 = vor.u32 %v1701_v3, %v1698_v61  ;;  %v2476_v26 = vshll.u32 %v4345_v16, 16 }
  0x70   : > { %v2462_v30 = vrot.slane %v2460_v15, 5  ;;  %v1425_v34 = vrot.slane %v1424_v22, 4  ;;  %v1711_v11 = vrot.slane %v1709_v62, 4  ;;  %v4303_v22 = vrot.slane %v4283_v7, 9 }
  0x71   : > { %v2743_v40 = vsel %vm4868_vm5, %v2738_v21, %v2742_v24  ;;  %v1717_v24 = vrot.slane %v1715_v17, 5  ;;  %v2478_v48 = vrot.slane %v2476_v26, 5  ;;  %v1000_v57 = vrot.slane %v5251_v36, 5  ;;  %v4333_v26 = vld [vmem:[%s4847_s17 + $0xc0] sm:$0xf] }
  0x72   : > { %2284 = vrot.lane.b32.xlu1 %v4331_v29, %s4807_s4  ;;  %v4344_v29 = vld [vmem:[%s4847_s17 + $0x34] sm:$0xf]  ;;  %v2463_v46 = vor.u32 %v2462_v30, %v2459_v25  ;;  %v1712_v21 = vor.u32 %v1711_v11, %v1707_v4 }
  0x73   : > { %2093 = vrot.lane.b32.xlu0 %v2024_v39, %s4806_s18  ;;  %v1430_v39 = vsel %vm4868_vm5, %v1425_v34, %v1429_v27  ;;  %v2466_v44 = vshll.u32 %v4344_v29, 16  ;;  %v2470_v55 = vshrl.u32 %v4344_v29, 16  ;;  %v4310_v30 = vld [vmem:[%s4847_s17 + $0x34] sm:$0xf] }
  0x74   : > { %1802 = vst.msk [vmem:[#allocation2 + $0x28] sm:$0xf] %vm204_vm6, %v1430_v39  ;;  %v2464_v2 = vrot.slane %v2463_v46, 4  ;;  %v1713_v29 = vrot.slane %v1712_v21, 4  ;;  %v4199_v39 = vld [vmem:[%s4847_s17 + $0x24] sm:$0xf] }
  0x75   : > { %v2472_v9 = vrot.slane %v2470_v55, 4  ;;  %v1432_v46 = vshrl.u32 %v4199_v39, 16  ;;  %v1435_v49 = vshll.u32 %v4199_v39, 16 }
  0x76   : > { %1258 = vrot.lane.b32.xlu1 %v4187_v45, %s4808_s15  ;;  %v280_v45 = vld [vmem:[%s4847_s17 + $0xac] sm:$0xf] }
  0x77   : > { %1066 = vrot.lane.b32.xlu0 %v997_v54, %s4807_s4  ;;  %v919_v54 = vrot.slane %v809_v41, 5  ;;  %v634_v60 = vshll.u32 %v280_v45, 16  ;;  %v638_v15 = vshrl.u32 %v280_v45, 16  ;;  %v4200_v45 = vld [vmem:[%s4847_s17 + $0x28] sm:$0xf]  ;;  %v1434_v55 = vrot.slane %v1432_v46, 4 }
  0x78   : > { %v1441_v50 = vshll.u32 %v4200_v45, 16  ;;  %v1445_v62 = vshrl.u32 %v4200_v45, 16  ;;  %v5309_v45 = vld [vmem:[%s4847_s17 + $0x34] sm:$0xf]  ;;  %v4236_v46 = vld [vmem:[%s4847_s17 + $0xb8] sm:$0xf] }
  0x79   : > { %v920_v12 = vsel %vm4840_vm4, %v918_v52, %v919_v54  ;;  %v640_v33 = vrot.slane %v638_v15, 4  ;;  %v4159_v52 = vrot.slane %v843_v31, 9  ;;  %v644_v54 = vshll.u32 %v281_v37, 16  ;;  %v4189_v31 = vld [vmem:[%s4847_s17 + $0xb4] sm:$0xf] }
  0x7a   : > { %2844 = vrot.lane.b32.xlu1 %v2733_v59, %s4808_s15  ;;  %v2468_v59 = vrot.slane %v2466_v44, 5  ;;  %v4379_v44 = vld [vmem:[%s4847_s17 + $0xc0] sm:$0xf]  ;;  %v1447_v16 = vrot.slane %v1445_v62, 4  ;;  %v4346_v62 = vld [vmem:[%s4847_s17 + $0x3c] sm:$0xf] }
  0x7b   : > { %2286 = vrot.lane.b32.xlu0 %v4332_v8, %s4807_s4  ;;  %v5228_v8 = vld [vmem:[%s4847_s17 + $0xb8] sm:$0xf] }
  0x7c   : > { %v2469_v18 = vsel %vm4868_vm5, %v2464_v2, %v2468_v59  ;;  %v2473_v25 = vor.u32 %v2472_v9, %v2468_v59  ;;  %v2748_v59 = vshll.u32 %v4379_v44, 16  ;;  %v4201_v2 = vld [vmem:[%s4847_s17 + $0x2c] sm:$0x1]  ;;  %v1001_v9 = vsel %vm4840_vm4, %v4159_v52, %v1000_v57 }
  0x7d   : > { %v1451_v17 = vshll.u32 %v4201_v2, 16 }
  0x7e   : > { %2047 = vrot.lane.b32.xlu1 %v1944_v14, %s4806_s18  ;;  %v5233_v14 = vrot.slane %v634_v60, 5  ;;  %v2474_v47 = vrot.slane %v2473_v25, 4  ;;  %v1437_v60 = vrot.slane %v1435_v49, 5 }
  0x7f   : > { %1260 = vrot.lane.b32.xlu0 %v4188_v23, %s4808_s15  ;;  %v2027_v23 = vrot.slane %v5228_v8, 5 }
  0x80   : > { %v637_v35 = vsel %vm4868_vm5, %v632_v19, %v5233_v14  ;;  %v641_v53 = vor.u32 %v640_v33, %v5233_v14  ;;  %v1438_v63 = vor.u32 %v1437_v60, %v1434_v55  ;;  %v2479_v5 = vsel %vm4868_vm5, %v2474_v47, %v2478_v48 }
  0x81   : > { %v2028_v41 = vsel %vm4840_vm4, %v4303_v22, %v2027_v23  ;;  %v2030_v19 = vrot.slane %v4285_v6, 5  ;;  %v1002_v33 = vrot.slane %v1000_v57, 4  ;;  %v1950_v55 = vrot.slane %v5309_v45, 5  ;;  %v4381_v57 = vld [vmem:[%s4847_s17 + $0xc8] sm:$0x1] }
  0x82   : > { %1020 = vrot.lane.b32.xlu1 %v917_v20, %s4807_s4  ;;  %v1703_v20 = vrot.slane %v1702_v10, 4  ;;  %v642_v3 = vrot.slane %v641_v53, 4  ;;  %v4380_v10 = vld [vmem:[%s4847_s17 + $0xc4] sm:$0xf]  ;;  %v1439_v14 = vrot.slane %v1438_v63, 4  ;;  %v1729_v53 = vshll.u32 %v4236_v46, 16 }
  0x83   : > { %2846 = vrot.lane.b32.xlu0 %v2743_v40, %s4808_s15  ;;  %v201_v63 = vld [vmem:[%s4847_s17 + $0xac] sm:$0xf]  ;;  %v1952_v45 = vrot.slane %v1950_v55, 4 }
  0x84   : > { %v1708_v27 = vsel %vm4868_vm5, %v1703_v20, %v1707_v4  ;;  %v646_v4 = vrot.slane %v644_v54, 5  ;;  %234 = vst.msk [vmem:[#allocation2 + $0x15c] sm:$0xf] %vm204_vm6, %v201_v63 }
  0x85   : > { %v2040_v58 = vpop.permute.xlu1 %2039  ;;  %1825 = vst.msk [vmem:[#allocation2 + $0x13c] sm:$0xf] %vm204_vm6, %v1708_v27  ;;  %v845_v27 = vld [vmem:[%s4847_s17 + $0xb0] sm:$0x1] }
  0x86   : > { %2240 = vrot.lane.b32.xlu1 %v4309_v38, %s4807_s4  ;;  %2135 = vst.msk [vmem:[#allocation2 + $0x4] sm:$0xf] %vm768_vm7, %v2040_v58  ;;  %v1718_v38 = vsel %vm4868_vm5, %v1713_v29, %v1717_v24  ;;  %v2745_v58 = vshrl.u32 %v4379_v44, 16  ;;  %v647_v21 = vsel %vm4868_vm5, %v642_v3, %v646_v4  ;;  %v1453_v24 = vrot.slane %v1451_v17, 5  ;;  %v4334_v4 = vld [vmem:[%s4847_s17 + $0xc4] sm:$0xf] }
  0x87   : > { %2049 = vrot.lane.b32.xlu0 %v1947_v51, %s4806_s18  ;;  %1826 = vst.msk [vmem:[#allocation2 + $0x148] sm:$0xf] %vm204_vm6, %v1718_v38  ;;  %v4166_v51 = vld [vmem:[%s4847_s17 + $0x28] sm:$0xf]  ;;  %v1003_v36 = vrot.slane %v845_v27, 5  ;;  %v1733_v3 = vshrl.u32 %v4236_v46, 16 }
  0x88   : > { %v2747_v11 = vrot.slane %v2745_v58, 4  ;;  %v4250_v38 = vld [vmem:[%s4847_s17 + $0x30] sm:$0xe]  ;;  %v2484_v17 = vshll.u32 %v4346_v62, 16  ;;  %v4252_v27 = vld [vmem:[%s4847_s17 + $0x38] sm:$0x1] }
  0x89   : > { %v1004_v54 = vsel %vm4840_vm4, %v1002_v33, %v1003_v36  ;;  %v4203_v36 = vld [vmem:[%s4847_s17 + $0x34] sm:$0xf] }
  0x8a   : > { %1214 = vrot.lane.b32.xlu1 %v4165_v1, %s4808_s15  ;;  %v1443_v1 = vrot.slane %v1441_v50, 5  ;;  %v4292_v50 = vrot.slane %v4250_v38, 9  ;;  %v2486_v33 = vrot.slane %v2484_v17, 5 }
  0x8b   : > { %1022 = vrot.lane.b32.xlu0 %v920_v12, %s4807_s4  ;;  %v2750_v12 = vrot.slane %v2748_v59, 5 }
  0x8c   : > { %v677_v13 = vpop.permute.xlu1 %676  ;;  %v1444_v20 = vsel %vm4868_vm5, %v1439_v14, %v1443_v1  ;;  %v1448_v22 = vor.u32 %v1447_v16, %v1443_v1  ;;  %v4237_v14 = vld [vmem:[%s4847_s17 + $0xbc] sm:$0x1]  ;;  %v1951_v16 = vsel %vm4840_vm4, %v4292_v50, %v1950_v55  ;;  %v812_v50 = vld [vmem:[%s4847_s17 + $0x2c] sm:$0x1] }
  0x8d   : > { %771 = vst.msk [vmem:[#allocation2 + $0x18] sm:$0xf] %vm768_vm7, %v677_v13  ;;  %v673_v34 = vpop.permute.xlu0 %672  ;;  %v2754_v13 = vshll.u32 %v4380_v10, 16  ;;  %v2751_v8 = vor.u32 %v2750_v12, %v2747_v11  ;;  %v2481_v11 = vshrl.u32 %v4346_v62, 16 }
  0x8e   : > { %2800 = vrot.lane.b32.xlu1 %v2469_v18, %s4808_s15  ;;  %769 = vst.msk [vmem:[#allocation2] sm:$0xf] %vm768_vm7, %v673_v34  ;;  %v2029_v18 = vrot.slane %v2027_v23, 4  ;;  %v200_v23 = vld [vmem:[%s4847_s17 + $0xa8] sm:$0xf]  ;;  %v2758_v34 = vshrl.u32 %v4380_v10, 16 }
  0x8f   : > { %2242 = vrot.lane.b32.xlu0 %v4310_v30, %s4807_s4  ;;  %1803 = vst.msk [vmem:[#allocation2 + $0x34] sm:$0xf] %vm204_vm6, %v1444_v20  ;;  %v1449_v30 = vrot.slane %v1448_v22, 4  ;;  %233 = vst.msk [vmem:[#allocation2 + $0x150] sm:$0xf] %vm204_vm6, %v200_v23  ;;  %v2756_v37 = vrot.slane %v2754_v13, 5 }
  0x90   : > { %v679_v40 = vpop.permute.xlu1 %678  ;;  %v2752_v44 = vrot.slane %v2751_v8, 4  ;;  %v1739_v13 = vshll.u32 %v4237_v14, 16  ;;  %v4190_v22 = vld [vmem:[%s4847_s17 + $0xb8] sm:$0xf]  ;;  %v2483_v8 = vrot.slane %v2481_v11, 4 }
  0x91   : > { %772 = vst.msk [vmem:[#allocation2 + $0x24] sm:$0xf] %vm768_vm7, %v679_v40  ;;  %v675_v56 = vpop.permute.xlu0 %674  ;;  %v1454_v39 = vsel %vm4868_vm5, %v1449_v30, %v1453_v24  ;;  %v4235_v40 = vld [vmem:[%s4847_s17 + $0xb4] sm:$0xf]  ;;  %v4202_v30 = vld [vmem:[%s4847_s17 + $0x30] sm:$0xf] }
  0x92   : > { %728 = vrot.lane.b32.xlu1 %v637_v35, %s4806_s18  ;;  %770 = vst.msk [vmem:[#allocation2 + $0xc] sm:$0xf] %vm768_vm7, %v675_v56  ;;  %v2031_v35 = vsel %vm4840_vm4, %v2029_v18, %v2030_v19  ;;  %v1720_v47 = vshrl.u32 %v4235_v40, 16  ;;  %v1723_v49 = vshll.u32 %v4235_v40, 16  ;;  %v810_v56 = vld [vmem:[%s4847_s17 + $0x24] sm:$0xe]  ;;  %v2757_v60 = vsel %vm4868_vm5, %v2752_v44, %v2756_v37 }
  0x93   : > { %1216 = vrot.lane.b32.xlu0 %v4166_v51, %s4808_s15  ;;  %1804 = vst.msk [vmem:[#allocation2 + $0x40] sm:$0xf] %vm204_vm6, %v1454_v39  ;;  %v2760_v51 = vrot.slane %v2758_v34, 4  ;;  %v282_v19 = vld [vmem:[%s4847_s17 + $0xb4] sm:$0xf]  ;;  %v1465_v44 = vshll.u32 %v4203_v36, 16 }
  0x94   : > { %v683_v61 = vpop.permute.xlu1 %682  ;;  %v1722_v52 = vrot.slane %v1720_v47, 4  ;;  %v1725_v58 = vrot.slane %v1723_v49, 5  ;;  %v649_v34 = vshrl.u32 %v282_v19, 16  ;;  %v4347_v39 = vld [vmem:[%s4847_s17 + $0x40] sm:$0xf]  ;;  %v1953_v49 = vrot.slane %v4252_v27, 5 }
  0x95   : > { %774 = vst.msk [vmem:[#allocation2 + $0x3c] sm:$0xf] %vm768_vm7, %v683_v61  ;;  %v681_v7 = vpop.permute.xlu0 %680  ;;  %v5325_v61 = vld [vmem:[%s4847_s17 + $0x28] sm:$0xf]  ;;  %v2761_v6 = vor.u32 %v2760_v51, %v2756_v37  ;;  %v1456_v37 = vshrl.u32 %v4202_v30, 16  ;;  %v1467_v63 = vrot.slane %v1465_v44, 5 }
  0x96   : > { %2095 = vrot.lane.b32.xlu1 %v2028_v41, %s4806_s18  ;;  %773 = vst.msk [vmem:[#allocation2 + $0x30] sm:$0xf] %vm768_vm7, %v681_v7  ;;  %v1726_v2 = vor.u32 %v1725_v58, %v1722_v52  ;;  %v2764_v7 = vshll.u32 %v4381_v57, 16  ;;  %v923_v10 = vrot.slane %v5325_v61, 5  ;;  %v283_v57 = vld [vmem:[%s4847_s17 + $0xb8] sm:$0xf] }
  0x97   : > { %2802 = vrot.lane.b32.xlu0 %v2479_v5, %s4808_s15  ;;  %v1731_v5 = vrot.slane %v1729_v53, 5  ;;  %v2762_v24 = vrot.slane %v2761_v6, 4  ;;  %v1458_v46 = vrot.slane %v1456_v37, 4  ;;  %v651_v58 = vrot.slane %v649_v34, 4  ;;  %v4167_v11 = vld [vmem:[%s4847_s17 + $0x30] sm:$0xf] }
  0x98   : > { %v687_v15 = vpop.permute.xlu1 %686  ;;  %v1727_v12 = vrot.slane %v1726_v2, 4  ;;  %v925_v2 = vrot.slane %v923_v10, 4  ;;  %v202_v37 = vld [vmem:[%s4847_s17 + $0xb4] sm:$0xf]  ;;  %v4382_v44 = vld [vmem:[%s4847_s17 + $0xcc] sm:$0xf] }
  0x99   : > { %776 = vst.msk [vmem:[#allocation2 + $0x54] sm:$0xf] %vm768_vm7, %v687_v15  ;;  %v685_v25 = vpop.permute.xlu0 %684 }
  0x9a   : > { %1068 = vrot.lane.b32.xlu1 %v1001_v9, %s4807_s4  ;;  %775 = vst.msk [vmem:[#allocation2 + $0x48] sm:$0xf] %vm768_vm7, %v685_v25  ;;  %v4148_v9 = vrot.slane %v810_v56, 9  ;;  %v1732_v20 = vsel %vm4868_vm5, %v1727_v12, %v1731_v5  ;;  %v2766_v25 = vrot.slane %v2764_v7, 5  ;;  %v2490_v56 = vshll.u32 %v4347_v39, 16 }
  0x9b   : > { %730 = vrot.lane.b32.xlu0 %v647_v21, %s4806_s18  ;;  %v1735_v21 = vrot.slane %v1733_v3, 4  ;;  %1827 = vst.msk [vmem:[#allocation2 + $0x154] sm:$0xf] %vm204_vm6, %v1732_v20  ;;  %v1954_v3 = vsel %vm4840_vm4, %v1952_v45, %v1953_v49  ;;  %v4204_v7 = vld [vmem:[%s4847_s17 + $0x38] sm:$0x1] }
  0x9c   : > { %v1013_v29 = vpop.permute.xlu1 %1012  ;;  %v2767_v47 = vsel %vm4868_vm5, %v2762_v24, %v2766_v25  ;;  %v2492_v14 = vrot.slane %v2490_v56, 5  ;;  %v662_v24 = vshrl.u32 %v283_v57, 16  ;;  %235 = vst.msk [vmem:[#allocation2 + $0x168] sm:$0xf] %vm204_vm6, %v202_v37  ;;  %v848_v37 = vld [vmem:[%s4847_s17 + $0xbc] sm:$0x1] }
  0x9d   : > { %1109 = vst.msk [vmem:[#allocation2] sm:$0xf] %vm1108_vm8, %v1013_v29  ;;  %v689_v41 = vpop.permute.xlu0 %688  ;;  %v1736_v23 = vor.u32 %v1735_v21, %v1731_v5  ;;  %v1741_v29 = vrot.slane %v1739_v13, 5  ;;  %v926_v5 = vrot.slane %v812_v50, 5  ;;  %v4348_v21 = vld [vmem:[%s4847_s17 + $0x44] sm:$0x1] }
  0x9e   : > { %2288 = vrot.lane.b32.xlu1 %v4333_v26, %s4807_s4  ;;  %777 = vst.msk [vmem:[#allocation2 + $0x60] sm:$0xf] %vm768_vm7, %v689_v41  ;;  %v924_v26 = vsel %vm4840_vm4, %v4148_v9, %v923_v10  ;;  %v1459_v41 = vshll.u32 %v4202_v30, 16  ;;  %v5381_v10 = vld [vmem:[%s4847_s17 + $0xc4] sm:$0xf]  ;;  %v1475_v13 = vshll.u32 %v4204_v7, 16 }
  0x9f   : > { %2097 = vrot.lane.b32.xlu0 %v2031_v35, %s4806_s18  ;;  %v652_v35 = vshll.u32 %v282_v19, 16  ;;  %v1737_v40 = vrot.slane %v1736_v23, 4  ;;  %v927_v20 = vsel %vm4840_vm4, %v925_v2, %v926_v5  ;;  %v2769_v5 = vshrl.u32 %v4382_v44, 16 }
  0xa0   : > { %v2233_v48 = vpop.permute.xlu1 %2232  ;;  %v1461_v52 = vrot.slane %v1459_v41, 5  ;;  %v1477_v30 = vrot.slane %v1475_v13, 5  ;;  %v664_v41 = vrot.slane %v662_v24, 4  ;;  %v4288_v13 = vld [vmem:[%s4847_s17 + $0xc8] sm:$0x1] }
  0xa1   : > { %2328 = vst.msk [vmem:[#allocation2 + $0x4] sm:$0xf] %vm1108_vm8, %v2233_v48  ;;  %v2042_v59 = vpop.permute.xlu0 %2041  ;;  %v4311_v48 = vld [vmem:[%s4847_s17 + $0x3c] sm:$0xf]  ;;  %v1742_v51 = vsel %vm4868_vm5, %v1737_v40, %v1741_v29  ;;  %v2034_v29 = vrot.slane %v5381_v10, 5 }
  0xa2   : > { %1262 = vrot.lane.b32.xlu1 %v4189_v31, %s4808_s15  ;;  %2136 = vst.msk [vmem:[#allocation2 + $0x10] sm:$0xf] %vm768_vm7, %v2042_v59  ;;  %v654_v59 = vrot.slane %v652_v35, 5  ;;  %v1462_v62 = vor.u32 %v1461_v52, %v1458_v46  ;;  %v2500_v35 = vshll.u32 %v4348_v21, 16  ;;  %v284_v40 = vld [vmem:[%s4847_s17 + $0xbc] sm:$0x1] }
  0xa3   : > { %1070 = vrot.lane.b32.xlu0 %v1004_v54, %s4807_s4  ;;  %v2487_v54 = vor.u32 %v2486_v33, %v2483_v8  ;;  %1828 = vst.msk [vmem:[#allocation2 + $0x160] sm:$0xf] %vm204_vm6, %v1742_v51  ;;  %v4312_v33 = vld [vmem:[%s4847_s17 + $0x40] sm:$0xf]  ;;  %v668_v2 = vshll.u32 %v284_v40, 16 }
  0xa4   : > { %v1207_v1 = vpop.permute.xlu1 %1206  ;;  %v1463_v6 = vrot.slane %v1462_v62, 4  ;;  %v4238_v46 = vld [vmem:[%s4847_s17 + $0xc0] sm:$0xf]  ;;  %v251_v40 = vld [vmem:[%s4847_s17 + $0x38] sm:$0x1] }
  0xa5   : > { %1303 = vst.msk [vmem:[#allocation2] sm:$0xf] %vm1302_vm9, %v1207_v1  ;;  %v1015_v15 = vpop.permute.xlu0 %1014  ;;  %v1469_v1 = vshrl.u32 %v4203_v36, 16  ;;  %v2488_v12 = vrot.slane %v2487_v54, 4  ;;  %v2502_v54 = vrot.slane %v2500_v35, 5  ;;  %v2037_v35 = vrot.slane %v4288_v13, 5 }
  0xa6   : > { %2848 = vrot.lane.b32.xlu1 %v2757_v60, %s4808_s15  ;;  %1110 = vst.msk [vmem:[#allocation2 + $0xc] sm:$0xf] %vm1108_vm8, %v1015_v15  ;;  %v2494_v60 = vshrl.u32 %v4347_v39, 16  ;;  %v655_v15 = vor.u32 %v654_v59, %v651_v58  ;;  %v5404_v39 = vld [vmem:[%s4847_s17 + $0xb8] sm:$0xf]  ;;  %v1744_v58 = vshrl.u32 %v4238_v46, 16 }
  0xa7   : > { %2290 = vrot.lane.b32.xlu0 %v4334_v4, %s4807_s4  ;;  %v658_v4 = vshll.u32 %v283_v57, 16  ;;  %v1471_v19 = vrot.slane %v1469_v1, 4  ;;  %v2493_v8 = vsel %vm4868_vm5, %v2488_v12, %v2492_v14  ;;  %v4239_v57 = vld [vmem:[%s4847_s17 + $0xc4] sm:$0xf]  ;;  %v1007_v59 = vrot.slane %v5404_v39, 5 }
  0xa8   : > { %v2793_v18 = vpop.permute.xlu1 %2792  ;;  %v2496_v17 = vrot.slane %v2494_v60, 4  ;;  %v656_v23 = vrot.slane %v655_v15, 4  ;;  %v1753_v60 = vshll.u32 %v4239_v57, 16  ;;  %v1757_v62 = vshrl.u32 %v4239_v57, 16  ;;  %v4191_v10 = vld [vmem:[%s4847_s17 + $0xc0] sm:$0xf] }
  0xa9   : > { %2888 = vst.msk [vmem:[#allocation2 + $0x4] sm:$0xf] %vm1302_vm9, %v2793_v18  ;;  %v2235_v31 = vpop.permute.xlu0 %2234  ;;  %v1468_v18 = vsel %vm4868_vm5, %v1463_v6, %v1467_v63  ;;  %v2772_v6 = vshll.u32 %v4382_v44, 16  ;;  %v4255_v57 = vld [vmem:[%s4847_s17 + $0x44] sm:$0x1] }
  0xaa   : > { %2051 = vrot.lane.b32.xlu1 %v1951_v16, %s4806_s18  ;;  %2329 = vst.msk [vmem:[#allocation2 + $0x10] sm:$0xf] %vm1108_vm8, %v2235_v31  ;;  %v4286_v16 = vld [vmem:[%s4847_s17 + $0xc0] sm:$0xe]  ;;  %v2497_v34 = vor.u32 %v2496_v17, %v2492_v14  ;;  %v203_v14 = vld [vmem:[%s4847_s17 + $0xb8] sm:$0xf] }
  0xab   : > { %1264 = vrot.lane.b32.xlu0 %v4190_v22, %s4808_s15  ;;  %1805 = vst.msk [vmem:[#allocation2 + $0x4c] sm:$0xf] %vm204_vm6, %v1468_v18  ;;  %v5392_v22 = vrot.slane %v658_v4, 5  ;;  %v4304_v25 = vrot.slane %v4286_v16, 9  ;;  %236 = vst.msk [vmem:[#allocation2 + $0x174] sm:$0xf] %vm204_vm6, %v203_v14 }
  0xac   : > { %v721_v38 = vpop.permute.xlu1 %720  ;;  %v670_v18 = vrot.slane %v668_v2, 5  ;;  %v2774_v24 = vrot.slane %v2772_v6, 5  ;;  %v4207_v2 = vld [vmem:[%s4847_s17 + $0x44] sm:$0x1]  ;;  %v4205_v14 = vld [vmem:[%s4847_s17 + $0x3c] sm:$0xf] }
  0xad   : > { %793 = vst.msk [vmem:[#allocation2 + $0x120] sm:$0xf] %vm768_vm7, %v721_v38  ;;  %v1209_v53 = vpop.permute.xlu0 %1208  ;;  %v846_v38 = vld [vmem:[%s4847_s17 + $0xb4] sm:$0xe]  ;;  %v661_v50 = vsel %vm4868_vm5, %v656_v23, %v5392_v22  ;;  %v2035_v51 = vsel %vm4840_vm4, %v4304_v25, %v2034_v29  ;;  %v665_v1 = vor.u32 %v664_v41, %v5392_v22  ;;  %v2771_v22 = vrot.slane %v2769_v5, 4 }
  0xae   : > { %1024 = vrot.lane.b32.xlu1 %v924_v26, %s4807_s4  ;;  %1304 = vst.msk [vmem:[#allocation2 + $0xc] sm:$0xf] %vm1302_vm9, %v1209_v53  ;;  %v1472_v26 = vor.u32 %v1471_v19, %v1467_v63  ;;  %v2498_v53 = vrot.slane %v2497_v34, 4  ;;  %v4160_v56 = vrot.slane %v846_v38, 9  ;;  %v4168_v63 = vld [vmem:[%s4847_s17 + $0x34] sm:$0xf] }
  0xaf   : > { %2850 = vrot.lane.b32.xlu0 %v2767_v47, %s4808_s15  ;;  %v666_v17 = vrot.slane %v665_v1, 4  ;;  %v4240_v19 = vld [vmem:[%s4847_s17 + $0xc8] sm:$0x1]  ;;  %v2036_v34 = vrot.slane %v2034_v29, 4  ;;  %v2775_v38 = vor.u32 %v2774_v24, %v2771_v22  ;;  %v1009_v29 = vrot.slane %v1007_v59, 4 }
  0xb0   : > { %v2088_v55 = vpop.permute.xlu1 %2087  ;;  %v1473_v36 = vrot.slane %v1472_v26, 4  ;;  %v1008_v21 = vsel %vm4840_vm4, %v4160_v56, %v1007_v59  ;;  %v5502_v13 = vld [vmem:[%s4847_s17 + $0x38] sm:$0x1]  ;;  %v5505_v22 = vld [vmem:[%s4847_s17 + $0x3c] sm:$0xe] }
  0xb1   : > { %2159 = vst.msk [vmem:[#allocation2 + $0x124] sm:$0xf] %vm768_vm7, %v2088_v55  ;;  %v2795_v9 = vpop.permute.xlu0 %2794  ;;  %v1747_v55 = vshll.u32 %v4238_v46, 16 }
  0xb2   : > { %2244 = vrot.lane.b32.xlu1 %v4311_v48, %s4807_s4  ;;  %2889 = vst.msk [vmem:[#allocation2 + $0x10] sm:$0xf] %vm1302_vm9, %v2795_v9  ;;  %v1478_v45 = vsel %vm4868_vm5, %v1473_v36, %v1477_v30  ;;  %v1755_v9 = vrot.slane %v1753_v60, 5  ;;  %v1763_v30 = vshll.u32 %v4240_v19, 16  ;;  %v402_v60 = vrot.slane %v401_v43, 4 }
  0xb3   : > { %2053 = vrot.lane.b32.xlu0 %v1954_v3, %s4806_s18  ;;  %1806 = vst.msk [vmem:[#allocation2 + $0x58] sm:$0xf] %vm204_vm6, %v1478_v45  ;;  %v1746_v3 = vrot.slane %v1744_v58, 4  ;;  %v1749_v7 = vrot.slane %v1747_v55, 5  ;;  %v1960_v43 = vrot.slane %v4255_v57, 5  ;;  %v1483_v19 = vshll.u32 %v4205_v14, 16 }
  0xb4   : > { %v1061_v61 = vpop.permute.xlu1 %1060  ;;  %v1765_v41 = vrot.slane %v1763_v30, 5 }
  0xb5   : > { %1133 = vst.msk [vmem:[#allocation2 + $0x120] sm:$0xf] %vm1108_vm8, %v1061_v61  ;;  %v723_v27 = vpop.permute.xlu0 %722  ;;  %v4745_v48 = vld [vmem:[#allocation2] ss:$12 sps:$4 sm:$0xff]   ;;  %v1750_v15 = vor.u32 %v1749_v7, %v1746_v3  ;;  %v2503_v61 = vsel %vm4868_vm5, %v2498_v53, %v2502_v54  ;;  %v2776_v54 = vrot.slane %v2775_v38, 4 }
  0xb6   : > { %1218 = vrot.lane.b32.xlu1 %v4167_v11, %s4808_s15  ;;  %794 = vst.msk [vmem:[#allocation2 + $0x12c] sm:$0xf] %vm768_vm7, %v723_v27  ;;  %v1759_v11 = vrot.slane %v1757_v62, 4  ;;  %v4383_v27 = vld [vmem:[%s4847_s17 + $0xd0] sm:$0xf] }
  0xb7   : > { %1026 = vrot.lane.b32.xlu0 %v927_v20, %s4807_s4  ;;  %v1751_v25 = vrot.slane %v1750_v15, 4  ;;  %v2778_v39 = vshll.u32 %v4383_v27, 16  ;;  %v2782_v45 = vshrl.u32 %v4383_v27, 16  ;;  %v4384_v62 = vld [vmem:[%s4847_s17 + $0xd4] sm:$0x1] }
  0xb8   : > { %v2281_v31 = vpop.permute.xlu1 %2280  ;;  %v1760_v16 = vor.u32 %v1759_v11, %v1755_v9  ;;  %v4350_v11 = vld [vmem:[%s4847_s17 + $0x4c] sm:$0xf]  ;;  %v253_v27 = vld [vmem:[%s4847_s17 + $0x40] sm:$0xf]  ;;  %v5516_v38 = vld [vmem:[%s4847_s17 + $0x30] sm:$0xe] }
  0xb9   : > { %2352 = vst.msk [vmem:[#allocation2 + $0x124] sm:$0xf] %vm1108_vm8, %v2281_v31  ;;  %v2090_v47 = vpop.permute.xlu0 %2089  ;;  %v4747_v49 = vld [vmem:[#allocation2 + $0x4] ss:$12 sps:$4 sm:$0xff]   ;;  %v671_v31 = vsel %vm4868_vm5, %v666_v17, %v670_v18  ;;  %v2780_v56 = vrot.slane %v2778_v39, 5  ;;  %v2784_v1 = vrot.slane %v2782_v45, 4 }
  0xba   : > { %2804 = vrot.lane.b32.xlu1 %v2493_v8, %s4808_s15  ;;  %2160 = vst.msk [vmem:[#allocation2 + $0x130] sm:$0xf] %vm768_vm7, %v2090_v47  ;;  %3728 = vmatprep.mubr.bf16.mxu0 %v4747_v49  ;;  %v1756_v8 = vsel %vm4868_vm5, %v1751_v25, %v1755_v9  ;;  %v1761_v23 = vrot.slane %v1760_v16, 4  ;;  %v181_v47 = vld [vmem:[%s4847_s17 + $0x34] sm:$0xf]  ;;  %v1010_v49 = vrot.slane %v848_v37, 5 }
  0xbb   : > { %2246 = vrot.lane.b32.xlu0 %v4312_v33, %s4807_s4  ;;  %3729 = vmatmul.mubr.bf16.vlgmr.msra.gmra.mxu0 %v4745_v48  ;;  %v4335_v33 = vld [vmem:[%s4847_s17 + $0xcc] sm:$0xf]  ;;  %1829 = vst.msk [vmem:[#allocation2 + $0x16c] sm:$0xf] %vm204_vm6, %v1756_v8  ;;  %v2038_v48 = vsel %vm4840_vm4, %v2036_v34, %v2037_v35  ;;  %214 = vst.msk [vmem:[#allocation2 + $0x6c] sm:$0xf] %vm204_vm6, %v181_v47  ;;  %v2781_v7 = vsel %vm4868_vm5, %v2776_v54, %v2780_v56 }
  0xbc   : > { %v1255_v52 = vpop.permute.xlu1 %1254  ;;  %v1766_v46 = vsel %vm4868_vm5, %v1761_v23, %v1765_v41  ;;  %v1011_v42 = vsel %vm4840_vm4, %v1009_v29, %v1010_v49  ;;  %v5490_v9 = vld [vmem:[%s4847_s17 + $0x34] sm:$0xf]  ;;  %v4336_v16 = vld [vmem:[%s4847_s17 + $0xd0] sm:$0xf]  ;;  %v1480_v18 = vshrl.u32 %v4205_v14, 16  ;;  %v1485_v23 = vrot.slane %v1483_v19, 5 }
  0xbd   : > { %1327 = vst.msk [vmem:[#allocation2 + $0x120] sm:$0xf] %vm1302_vm9, %v1255_v52  ;;  %v1063_v4 = vpop.permute.xlu0 %1062  ;;  %v4206_v52 = vld [vmem:[%s4847_s17 + $0x40] sm:$0xf]  ;;  %v930_v25 = vrot.slane %v5490_v9, 5  ;;  %v2518_v35 = vshrl.u32 %v4350_v11, 16 }
  0xbe   : > { %732 = vrot.lane.b32.xlu1 %v661_v50, %s4806_s18  ;;  %1134 = vst.msk [vmem:[#allocation2 + $0x12c] sm:$0xf] %vm1108_vm8, %v1063_v4  ;;  %v404_v50 = vshll.u32 %v251_v40, 16  ;;  %v1489_v58 = vshll.u32 %v4206_v52, 16  ;;  %v1493_v59 = vshrl.u32 %v4206_v52, 16  ;;  %v1499_v4 = vshll.u32 %v4207_v2, 16 }
  0xbf   : > { %1220 = vrot.lane.b32.xlu0 %v4168_v63, %s4808_s15  ;;  %1830 = vst.msk [vmem:[#allocation2 + $0x178] sm:$0xf] %vm204_vm6, %v1766_v46  ;;  %v1482_v8 = vrot.slane %v1480_v18, 4  ;;  %v4349_v29 = vld [vmem:[%s4847_s17 + $0x48] sm:$0xf]  ;;  %v932_v46 = vrot.slane %v930_v25, 4 }
  0xc0   : > { %v2841_v12 = vpop.permute.xlu1 %2840  ;;  %v5482_v5 = vrot.slane %v1489_v58, 5  ;;  %v1495_v3 = vrot.slane %v1493_v59, 4  ;;  %v406_v32 = vrot.slane %v404_v50, 5  ;;  %v1501_v17 = vrot.slane %v1499_v4, 5  ;;  %v4192_v45 = vld [vmem:[%s4847_s17 + $0xc4] sm:$0xf] }
  0xc1   : > { %2912 = vst.msk [vmem:[#allocation2 + $0x124] sm:$0xf] %vm1302_vm9, %v2841_v12  ;;  %v2283_v20 = vpop.permute.xlu0 %2282  ;;  %v1486_v39 = vor.u32 %v1485_v23, %v1482_v8  ;;  %v933_v47 = vrot.slane %v5502_v13, 5  ;;  %v4149_v52 = vrot.slane %v5516_v38, 9  ;;  %v5533_v54 = vrot.slane %v2518_v35, 4 }
  0xc2   : > { %2099 = vrot.lane.b32.xlu1 %v2035_v51, %s4806_s18  ;;  %2353 = vst.msk [vmem:[#allocation2 + $0x130] sm:$0xf] %vm1108_vm8, %v2283_v20  ;;  %v5467_v51 = vld [vmem:[%s4847_s17 + $0x40] sm:$0xf]  ;;  %v1496_v12 = vor.u32 %v1495_v3, %v5482_v5  ;;  %v407_v34 = vsel %vm4868_vm5, %v402_v60, %v406_v32  ;;  %v2505_v58 = vshrl.u32 %v4349_v29, 16  ;;  %v2508_v2 = vshll.u32 %v4349_v29, 16 }
  0xc3   : > { %2806 = vrot.lane.b32.xlu0 %v2503_v61, %s4808_s15  ;;  %v1957_v63 = vrot.slane %v5467_v51, 5  ;;  %v2788_v61 = vshll.u32 %v4384_v62, 16  ;;  %v1487_v49 = vrot.slane %v1486_v39, 4  ;;  %v5545_v60 = vld [vmem:[%s4847_s17 + $0x50] sm:$0x1]  ;;  %v4764_v51 = vld [vmem:[%s6844_s1 + $0x80] sm:$0xff]  }
  0xc4   : > { %v2044_v26 = vpop.permute.xlu1 %2043  ;;  %v1497_v24 = vrot.slane %v1496_v12, 4  ;;  %v5548_v62 = vld [vmem:[%s4847_s17 + $0x44] sm:$0x1]  ;;  %v4385_v3 = vld [vmem:[%s4847_s17 + $0x18] sm:$0xe]  ;;  %v5569_v18 = vrot.slane %v2505_v58, 4 }
  0xc5   : > { %2137 = vst.msk [vmem:[#allocation2 + $0x1c] sm:$0xf] %vm768_vm7, %v2044_v26  ;;  %v1257_v36 = vpop.permute.xlu0 %1256  ;;  %v1959_v20 = vrot.slane %v1957_v63, 4  ;;  %v2514_v26 = vshll.u32 %v4350_v11, 16  ;;  %v1492_v59 = vsel %vm4868_vm5, %v1487_v49, %v5482_v5  ;;  %v4386_v5 = vld [vmem:[%s4847_s17 + $0x1c] sm:$0xf]  ;;  %v934_v11 = vsel %vm4840_vm4, %v932_v46, %v933_v47 }
  0xc6   : > { %1072 = vrot.lane.b32.xlu1 %v1008_v21, %s4807_s4  ;;  %1328 = vst.msk [vmem:[#allocation2 + $0x12c] sm:$0xf] %vm1302_vm9, %v1257_v36  ;;  %v2785_v21 = vor.u32 %v2784_v1, %v2780_v56  ;;  %v1502_v36 = vsel %vm4868_vm5, %v1497_v24, %v1501_v17  ;;  %v422_v56 = vshrl.u32 %v253_v27, 16  ;;  %v252_v32 = vld [vmem:[%s4847_s17 + $0x3c] sm:$0xf]  ;;  %v4433_v4 = vrot.slane %v4385_v3, 9 }
  0xc7   : > { %734 = vrot.lane.b32.xlu0 %v671_v31, %s4806_s18  ;;  %1808 = vst.msk [vmem:[#allocation2 + $0x70] sm:$0xf] %vm204_vm6, %v1502_v36  ;;  %v1961_v40 = vsel %vm4840_vm4, %v1959_v20, %v1960_v43  ;;  %1807 = vst.msk [vmem:[#allocation2 + $0x64] sm:$0xf] %vm204_vm6, %v1492_v59  ;;  %v4387_v43 = vld [vmem:[%s4847_s17 + $0x20] sm:$0x1] }
  0xc8   : > { %v1017_v44 = vpop.permute.xlu1 %1016  ;;  %v2786_v41 = vrot.slane %v2785_v21, 4  ;;  %v424_v14 = vrot.slane %v422_v56, 4  ;;  %v5572_v19 = vld [vmem:[%s4847_s17 + $0x4c] sm:$0xf]  ;;  %v2510_v13 = vrot.slane %v2508_v2, 5  ;;  %v412_v24 = vshll.u32 %v252_v32, 16 }
  0xc9   : > { %1111 = vst.msk [vmem:[#allocation2 + $0x18] sm:$0xf] %vm1108_vm8, %v1017_v44  ;;  %v2843_v53 = vpop.permute.xlu0 %2842  ;;  %v2790_v44 = vrot.slane %v2788_v61, 5  ;;  %v4389_v61 = vld [vmem:[%s4847_s17 + $0x28] sm:$0xf]  ;;  %v2524_v8 = vshll.u32 %v5545_v60, 16 }
  0xca   : > { %2292 = vrot.lane.b32.xlu1 %v4335_v33, %s4807_s4  ;;  %2913 = vst.msk [vmem:[#allocation2 + $0x130] sm:$0xf] %vm1302_vm9, %v2843_v53  ;;  %v5531_v53 = vrot.slane %v2514_v26, 5  ;;  %v4390_v26 = vld [vmem:[%s4847_s17 + $0x2c] sm:$0x1]  ;;  %v428_v23 = vshll.u32 %v5548_v62, 16  ;;  %v2511_v29 = vor.u32 %v2510_v13, %v5569_v18 }
  0xcb   : > { %2101 = vrot.lane.b32.xlu0 %v2038_v48, %s4806_s18  ;;  %v4293_v48 = vrot.slane %v5505_v22, 9  ;;  %v409_v22 = vshrl.u32 %v252_v32, 16  ;;  %v414_v46 = vrot.slane %v412_v24, 5  ;;  %v183_v47 = vld [vmem:[%s4847_s17 + $0x40] sm:$0xf] }
  0xcc   : > { %v2237_v55 = vpop.permute.xlu1 %2236  ;;  %v2521_v35 = vor.u32 %v5533_v54, %v5531_v53  ;;  %v4209_v49 = vld [vmem:[%s4847_s17 + $0x4c] sm:$0xf]  ;;  %v2526_v54 = vrot.slane %v2524_v8, 5  ;;  %v5619_v56 = vld [vmem:[%s4847_s17 + $0x44] sm:$0x1]  ;;  %v5626_v38 = vrot.slane %v428_v23, 5 }
  0xcd   : > { %2330 = vst.msk [vmem:[#allocation2 + $0x1c] sm:$0xf] %vm1108_vm8, %v2237_v55  ;;  %v2046_v6 = vpop.permute.xlu0 %2045  ;;  %v4748_v31 = vld [vmem:[#allocation2 + $0x120] ss:$12 sps:$4 sm:$0xff]   ;;  %v1958_v12 = vsel %vm4840_vm4, %v4293_v48, %v1957_v63  ;;  %v1517_v58 = vshrl.u32 %v4209_v49, 16  ;;  %v5638_v32 = vrot.slane %v2511_v29, 4 }
  0xce   : > { %1266 = vrot.lane.b32.xlu1 %v4191_v10, %s4808_s15  ;;  %2138 = vst.msk [vmem:[#allocation2 + $0x28] sm:$0xf] %vm768_vm7, %v2046_v6  ;;  %v418_v10 = vshll.u32 %v253_v27, 16  ;;  %v4763_v55 = vld [vmem:[%s6844_s1 + $0x88] sm:$0xff]   ;;  %v3018_v6 = vrot.slane %v4386_v5, 5  ;;  %v3025_v27 = vrot.slane %v4389_v61, 5 }
  0xcf   : > { %1074 = vrot.lane.b32.xlu0 %v1011_v42, %s4807_s4  ;;  %v2791_v42 = vsel %vm4868_vm5, %v2786_v41, %v2790_v44  ;;  %4665 = vmatprep.subr.bf16.mxu1 %v4763_v55  ;;  %v5597_v41 = vld [vmem:[%s4847_s17 + $0x50] sm:$0x1]  ;;  %v1964_v44 = vrot.slane %v5572_v19, 5  ;;  %216 = vst.msk [vmem:[#allocation2 + $0x84] sm:$0xf] %vm204_vm6, %v183_v47  ;;  %v2522_v60 = vrot.slane %v2521_v35, 4 }
  0xd0   : > { %v1211_v15 = vpop.permute.xlu1 %1210  ;;  %v5550_v1 = vrot.slane %v418_v10, 5  ;;  %v3019_v63 = vsel %vm4840_vm4, %v4433_v4, %v3018_v6  ;;  %v3020_v20 = vrot.slane %v3018_v6, 4  ;;  %v3027_v39 = vrot.slane %v3025_v27, 4  ;;  %v5601_v10 = vld [vmem:[%s4847_s17 + $0x40] sm:$0xf] }
  0xd1   : > { %1305 = vst.msk [vmem:[#allocation2 + $0x18] sm:$0xf] %vm1302_vm9, %v1211_v15  ;;  %v1019_v30 = vpop.permute.xlu0 %1018  ;;  %v4750_v33 = vld [vmem:[#allocation2 + $0x124] ss:$12 sps:$4 sm:$0xff]   ;;  %v3021_v15 = vrot.slane %v4387_v43, 5  ;;  %v1966_v2 = vrot.slane %v1964_v44, 4  ;;  %v2527_v18 = vsel %vm4868_vm5, %v2522_v60, %v2526_v54 }
  0xd2   : > { %2852 = vrot.lane.b32.xlu1 %v2781_v7, %s4808_s15  ;;  %1112 = vst.msk [vmem:[#allocation2 + $0x24] sm:$0xf] %vm1108_vm8, %v1019_v30  ;;  %3824 = vmatprep.mubr.bf16.mxu1 %v4750_v33  ;;  %v425_v36 = vor.u32 %v424_v14, %v5550_v1  ;;  %v4313_v62 = vld [vmem:[%s4847_s17 + $0x48] sm:$0xf]  ;;  %v1967_v3 = vrot.slane %v5597_v41, 5  ;;  %v940_v4 = vrot.slane %v5619_v56, 5 }
  0xd3   : > { %2294 = vrot.lane.b32.xlu0 %v4336_v16, %s4807_s4  ;;  %3825 = vmatmul.mubr.bf16.vlgmr.msra.gmra.mxu1 %v4748_v31  ;;  %v4388_v16 = vld [vmem:[%s4847_s17 + $0x24] sm:$0xe]  ;;  %3160 = vst.msk [vmem:[#allocation2 + $0x8] sm:$0xf] %vm204_vm6, %v3019_v63  ;;  %v3022_v30 = vsel %vm4840_vm4, %v3020_v20, %v3021_v15  ;;  %v3028_v31 = vrot.slane %v4390_v26, 5 }
  0xd4   : > { %v2797_v37 = vpop.permute.xlu1 %2796  ;;  %4666 = vmatpush3.bf16.msra.mxu1 %v4763_v55  ;;  %v4434_v21 = vrot.slane %v4388_v16, 9  ;;  %3161 = vst.msk [vmem:[#allocation2 + $0x14] sm:$0xf] %vm204_vm6, %v3022_v30  ;;  %v4170_v55 = vld [vmem:[%s4847_s17 + $0x40] sm:$0xf]  ;;  %v5624_v9 = vrot.slane %v425_v36, 4 }
  0xd5   : > { %2890 = vst.msk [vmem:[#allocation2 + $0x1c] sm:$0xf] %vm1302_vm9, %v2797_v37  ;;  %v2239_v50 = vpop.permute.xlu0 %2238  ;;  %4667 = vmatprep.subr.bf16.mxu1 %v4764_v51  ;;  %v3029_v48 = vsel %vm4840_vm4, %v3027_v39, %v3028_v31  ;;  %v5642_v6 = vld [vmem:[%s4847_s17 + $0x58] sm:$0xf]  ;;  %v4391_v15 = vld [vmem:[%s4847_s17 + $0x30] sm:$0xe] }
  0xd6   : > { %690 = vrot.lane.b32.xlu1 %v407_v34, %s4806_s18  ;;  %2331 = vst.msk [vmem:[#allocation2 + $0x28] sm:$0xf] %vm1108_vm8, %v2239_v50  ;;  %v4314_v34 = vld [vmem:[%s4847_s17 + $0x4c] sm:$0xf]  ;;  %v3026_v37 = vsel %vm4840_vm4, %v4434_v21, %v3025_v27  ;;  %v931_v50 = vsel %vm4840_vm4, %v4149_v52, %v930_v25  ;;  %v937_v25 = vrot.slane %v5601_v10, 5  ;;  %v2538_v23 = vshll.u32 %v5642_v6, 16 }
  0xd7   : > { %1268 = vrot.lane.b32.xlu0 %v4192_v45, %s4808_s15  ;;  %3162 = vst.msk [vmem:[#allocation2 + $0x20] sm:$0xf] %vm204_vm6, %v3026_v37  ;;  %v411_v45 = vrot.slane %v409_v22, 4  ;;  %3163 = vst.msk [vmem:[#allocation2 + $0x2c] sm:$0xf] %vm204_vm6, %v3029_v48  ;;  %v2542_v30 = vshrl.u32 %v5642_v6, 16 }
  0xd8   : > { %v725_v57 = vpop.permute.xlu1 %724  ;;  %4668 = vmatpush3.bf16.msra.mxu1 %v4764_v51  ;;  %v5652_v51 = vrot.slane %v937_v25, 4  ;;  %v4169_v21 = vld [vmem:[%s4847_s17 + $0x3c] sm:$0xf]  ;;  %v5657_v13 = vld [vmem:[%s4847_s17 + $0x4c] sm:$0xf]  ;;  %v4435_v31 = vrot.slane %v4391_v15, 9 }
  0xd9   : > { %795 = vst.msk [vmem:[#allocation2 + $0x138] sm:$0xf] %vm768_vm7, %v725_v57  ;;  %v1213_v7 = vpop.permute.xlu0 %1212  ;;  %v1513_v57 = vshll.u32 %v4209_v49, 16  ;;  %v415_v43 = vor.u32 %v414_v46, %v411_v45  ;;  %v182_v26 = vld [vmem:[%s4847_s17 + $0x3c] sm:$0xf]  ;;  %v442_v41 = vshll.u32 %v5657_v13, 16  ;;  %v2517_v49 = vsel %vm4868_vm5, %v5638_v32, %v5531_v53 }
  0xda   : > { %2057 = vrot.lane.b32.xlu1 %v1961_v40, %s4806_s18  ;;  %1306 = vst.msk [vmem:[#allocation2 + $0x24] sm:$0xf] %vm1302_vm9, %v1213_v7  ;;  %v4210_v7 = vld [vmem:[%s4847_s17 + $0x50] sm:$0x1]  ;;  %v5665_v8 = vld [vmem:[%s4847_s17 + $0x5c] sm:$0x1] }
  0xdb   : > { %2854 = vrot.lane.b32.xlu0 %v2791_v42, %s4808_s15  ;;  %v5634_v5 = vrot.slane %v1513_v57, 5  ;;  %v1519_v42 = vrot.slane %v1517_v58, 4  ;;  %v1523_v14 = vshll.u32 %v4210_v7, 16  ;;  %v5662_v27 = vrot.slane %v415_v43, 4  ;;  %215 = vst.msk [vmem:[#allocation2 + $0x78] sm:$0xf] %vm204_vm6, %v182_v26 }
  0xdc   : > { %v2092_v17 = vpop.permute.xlu1 %2091  ;;  %v4392_v36 = vld [vmem:[%s4847_s17 + $0x34] sm:$0xf]  ;;  %v4393_v37 = vld [vmem:[%s4847_s17 + $0x38] sm:$0x1]  ;;  %v4208_v39 = vld [vmem:[%s4847_s17 + $0x48] sm:$0xf] }
  0xdd   : > { %2161 = vst.msk [vmem:[#allocation2 + $0x13c] sm:$0xf] %vm768_vm7, %v2092_v17  ;;  %v2799_v33 = vpop.permute.xlu0 %2798  ;;  %v1525_v24 = vrot.slane %v1523_v14, 5  ;;  %v3032_v29 = vrot.slane %v4392_v36, 5  ;;  %v3035_v45 = vrot.slane %v4393_v37, 5  ;;  %v1504_v46 = vshrl.u32 %v4208_v39, 16 }
  0xde   : > { %1030 = vrot.lane.b32.xlu1 %v934_v11, %s4807_s4  ;;  %2891 = vst.msk [vmem:[#allocation2 + $0x28] sm:$0xf] %vm1302_vm9, %v2799_v33  ;;  %v3196_v11 = vld [vmem:[#allocation2 + $0x18] sm:$0xff]  ;;  %v431_v33 = vsel %vm4868_vm5, %v5624_v9, %v5626_v38  ;;  %v446_v54 = vshrl.u32 %v5657_v13, 16  ;;  %v1507_v57 = vshll.u32 %v4208_v39, 16  ;;  %v5707_v43 = vrot.slane %v2538_v23, 5 }
  0xdf   : > { %2055 = vrot.lane.b32.xlu0 %v1958_v12, %s4806_s18  ;;  %v1520_v12 = vor.u32 %v1519_v42, %v5634_v5  ;;  %v4394_v47 = vld [vmem:[%s4847_s17 + $0x3c] sm:$0xe]  ;;  %v4395_v58 = vld [vmem:[%s4847_s17 + $0x40] sm:$0xf]  ;;  %v3033_v60 = vsel %vm4840_vm4, %v4435_v31, %v3032_v29  ;;  %v3034_v9 = vrot.slane %v3032_v29, 4  ;;  %v1506_v53 = vrot.slane %v1504_v46, 4 }
  0xe0   : > { %v1065_v40 = vpop.permute.xlu1 %1064  ;;  %v4436_v38 = vrot.slane %v4394_v47, 9  ;;  %3164 = vst.msk [vmem:[#allocation2 + $0x38] sm:$0xf] %vm204_vm6, %v3033_v60  ;;  %v2544_v6 = vrot.slane %v2542_v30, 4  ;;  %v257_v7 = vld [vmem:[%s4847_s17 + $0x50] sm:$0x1] }
  0xe1   : > { %1135 = vst.msk [vmem:[#allocation2 + $0x138] sm:$0xf] %vm1108_vm8, %v1065_v40  ;;  %v727_v59 = vpop.permute.xlu0 %726  ;;  %v1521_v22 = vrot.slane %v1520_v12, 4  ;;  %v5715_v15 = vld [vmem:[%s4847_s17 + $0x54] sm:$0xf] }
  0xe2   : > { %2250 = vrot.lane.b32.xlu1 %v4314_v34, %s4807_s4  ;;  %796 = vst.msk [vmem:[#allocation2 + $0x144] sm:$0xf] %vm768_vm7, %v727_v59  ;;  %v5676_v34 = vld [vmem:[%s4847_s17 + $0x48] sm:$0xe]  ;;  %v4396_v59 = vld [vmem:[%s4847_s17 + $0x44] sm:$0x1] }
  0xe3   : > { %1028 = vrot.lane.b32.xlu0 %v931_v50, %s4807_s4  ;;  %v1526_v35 = vsel %vm4868_vm5, %v1521_v22, %v1525_v24  ;;  %v1968_v50 = vsel %vm4840_vm4, %v1966_v2, %v1967_v3  ;;  %v3039_v2 = vrot.slane %v4395_v58, 5  ;;  %v3042_v3 = vrot.slane %v4396_v59, 5  ;;  %v5734_v13 = vld [vmem:[%s4847_s17 + $0x48] sm:$0xf]  ;;  %v4399_v30 = vld [vmem:[%s4847_s17 + $0x50] sm:$0x1] }
  0xe4   : > { %v2285_v52 = vpop.permute.xlu1 %2284  ;;  %1810 = vst.msk [vmem:[#allocation2 + $0x88] sm:$0xf] %vm204_vm6, %v1526_v35  ;;  %v4294_v32 = vrot.slane %v5676_v34, 9  ;;  %v4397_v22 = vld [vmem:[%s4847_s17 + $0x48] sm:$0xe]  ;;  %v2532_v23 = vshll.u32 %v5715_v15, 16 }
  0xe5   : > { %2354 = vst.msk [vmem:[#allocation2 + $0x13c] sm:$0xf] %vm1108_vm8, %v2285_v52  ;;  %v2094_v16 = vpop.permute.xlu0 %2093  ;;  %v3198_v61 = vld [vmem:[#allocation2 + $0x24] sm:$0xff]  ;;  %v2548_v52 = vshll.u32 %v5665_v8, 16  ;;  %v2529_v8 = vshrl.u32 %v5715_v15, 16  ;;  %v4437_v31 = vrot.slane %v4397_v22, 9 }
  0xe6   : > { %1224 = vrot.lane.b32.xlu1 %v4170_v55, %s4808_s15  ;;  %v4751_v17 = vld [vmem:[#allocation2 + $0x1c] ss:$12 sps:$4 sm:$0xff]   ;;  %2162 = vst.msk [vmem:[#allocation2 + $0x148] sm:$0xf] %vm768_vm7, %v2094_v16  ;;  %v4453_v20 = vcombine.low %v3196_v11, %v3198_v61  ;;  %v3036_v11 = vsel %vm4840_vm4, %v3034_v9, %v3035_v45  ;;  %v3040_v61 = vsel %vm4840_vm4, %v4436_v38, %v3039_v2  ;;  %v433_v34 = vshrl.u32 %v5734_v13, 16 }
  0xe7   : > { %2248 = vrot.lane.b32.xlu0 %v4313_v62, %s4807_s4  ;;  %3736 = vmatprep.mubr.bf16.mxu0 %v4751_v17  ;;  %v5699_v55 = vld [vmem:[%s4847_s17 + $0x3c] sm:$0xe]  ;;  %v1509_v62 = vrot.slane %v1507_v57, 5  ;;  %3165 = vst.msk [vmem:[#allocation2 + $0x44] sm:$0xf] %vm204_vm6, %v3036_v11  ;;  %v3041_v17 = vrot.slane %v3039_v2, 4 }
  0xe8   : > { %v1259_v63 = vpop.permute.xlu1 %1258  ;;  %3737 = vmatmul.mubr.bf16.gmra.mxu0 %v4453_v20  ;;  %v4150_v14 = vrot.slane %v5699_v55, 9  ;;  %v5731_v20 = vrot.slane %v442_v41, 5  ;;  %3166 = vst.msk [vmem:[#allocation2 + $0x50] sm:$0xf] %vm204_vm6, %v3040_v61  ;;  %v5739_v24 = vrot.slane %v2548_v52, 5  ;;  %v3049_v37 = vrot.slane %v4399_v30, 5 }
  0xe9   : > { %1329 = vst.msk [vmem:[#allocation2 + $0x138] sm:$0xf] %vm1302_vm9, %v1259_v63  ;;  %v1067_v40 = vpop.permute.xlu0 %1066  ;;  %v1510_v16 = vor.u32 %v1509_v62, %v1506_v53  ;;  %v941_v63 = vsel %vm4840_vm4, %v5652_v51, %v940_v4  ;;  %v3043_v56 = vsel %vm4840_vm4, %v3041_v17, %v3042_v3  ;;  %v4398_v4 = vld [vmem:[%s4847_s17 + $0x4c] sm:$0xf]  ;;  %v4400_v39 = vld [vmem:[%s4847_s17 + $0x54] sm:$0xe] }
  0xea   : > { %2810 = vrot.lane.b32.xlu1 %v2527_v18, %s4808_s15  ;;  %1136 = vst.msk [vmem:[#allocation2 + $0x144] sm:$0xf] %vm1108_vm8, %v1067_v40  ;;  %v421_v18 = vsel %vm4868_vm5, %v5662_v27, %v5550_v1  ;;  %v452_v1 = vshll.u32 %v257_v7, 16  ;;  %v2545_v27 = vor.u32 %v2544_v6, %v5707_v43  ;;  %v3046_v36 = vrot.slane %v4398_v4, 5  ;;  %v4316_v41 = vld [vmem:[%s4847_s17 + $0x58] sm:$0xf] }
  0xeb   : > { %1222 = vrot.lane.b32.xlu0 %v4169_v21, %s4808_s15  ;;  %v448_v21 = vrot.slane %v446_v54, 4  ;;  %v1511_v26 = vrot.slane %v1510_v16, 4  ;;  %3167 = vst.msk [vmem:[#allocation2 + $0x5c] sm:$0xf] %vm204_vm6, %v3043_v56  ;;  %v1965_v40 = vsel %vm4840_vm4, %v4294_v32, %v1964_v44  ;;  %v4401_v45 = vld [vmem:[%s4847_s17 + $0x58] sm:$0xf]  ;;  %v938_v32 = vsel %vm4840_vm4, %v4150_v14, %v937_v25 }
  0xec   : > { %v2845_v48 = vpop.permute.xlu1 %2844  ;;  %v4402_v46 = vld [vmem:[%s4847_s17 + $0x5c] sm:$0x1]  ;;  %v3047_v47 = vsel %vm4840_vm4, %v4437_v31, %v3046_v36  ;;  %v3053_v19 = vrot.slane %v4401_v45, 5  ;;  %v5772_v44 = vrot.slane %v452_v1, 5  ;;  %v5774_v54 = vrot.slane %v2529_v8, 4 }
  0xed   : > { %2914 = vst.msk [vmem:[#allocation2 + $0x13c] sm:$0xf] %vm1302_vm9, %v2845_v48  ;;  %v2287_v42 = vpop.permute.xlu0 %2286  ;;  %v1516_v35 = vsel %vm4868_vm5, %v1511_v26, %v5634_v5  ;;  %v449_v29 = vor.u32 %v448_v21, %v5731_v20  ;;  %v5768_v5 = vld [vmem:[%s4847_s17 + $0x58] sm:$0xf]  ;;  %v3048_v48 = vrot.slane %v3046_v36, 4  ;;  %v436_v57 = vshll.u32 %v5734_v13, 16 }
  0xee   : > { %694 = vrot.lane.b32.xlu1 %v431_v33, %s4806_s18  ;;  %2355 = vst.msk [vmem:[#allocation2 + $0x148] sm:$0xf] %vm1108_vm8, %v2287_v42  ;;  %v3056_v58 = vrot.slane %v4402_v46, 5  ;;  %v5779_v60 = vrot.slane %v2545_v27, 4  ;;  %v3055_v38 = vrot.slane %v3053_v19, 4  ;;  %v2534_v2 = vrot.slane %v2532_v23, 5 }
  0xef   : > { %2808 = vrot.lane.b32.xlu0 %v2517_v49, %s4808_s15  ;;  %1809 = vst.msk [vmem:[#allocation2 + $0x7c] sm:$0xf] %vm204_vm6, %v1516_v35  ;;  %v4438_v49 = vrot.slane %v4400_v39, 9  ;;  %3168 = vst.msk [vmem:[#allocation2 + $0x68] sm:$0xf] %vm204_vm6, %v3047_v47  ;;  %v3050_v9 = vsel %vm4840_vm4, %v3048_v48, %v3049_v37  ;;  %v5788_v62 = vrot.slane %v449_v29, 4 }
  0xf0   : > { %v2048_v12 = vpop.permute.xlu1 %2047  ;;  %v4172_v52 = vld [vmem:[%s4847_s17 + $0x4c] sm:$0xf]  ;;  %v1971_v3 = vrot.slane %v5768_v5, 5  ;;  %v5791_v42 = vrot.slane %v433_v34, 4  ;;  %3169 = vst.msk [vmem:[#allocation2 + $0x74] sm:$0xf] %vm204_vm6, %v3050_v9  ;;  %v3057_v11 = vsel %vm4840_vm4, %v3055_v38, %v3056_v58  ;;  %v2535_v1 = vor.u32 %v2534_v2, %v5774_v54 }
  0xf1   : > { %2139 = vst.msk [vmem:[#allocation2 + $0x34] sm:$0xf] %vm768_vm7, %v2048_v12  ;;  %v1261_v51 = vpop.permute.xlu0 %1260  ;;  %v3054_v53 = vsel %vm4840_vm4, %v4438_v49, %v3053_v19  ;;  %v5803_v6 = vld [vmem:[%s4847_s17 + $0x4c] sm:$0xf]  ;;  %v4356_v7 = vld [vmem:[%s4847_s17 + $0x64] sm:$0xf]  ;;  %v2551_v36 = vsel %vm4868_vm5, %v5779_v60, %v5739_v24  ;;  %v455_v60 = vsel %vm4868_vm5, %v5788_v62, %v5772_v44 }
  0xf2   : > { %2061 = vrot.lane.b32.xlu1 %v1968_v50, %s4806_s18  ;;  %1330 = vst.msk [vmem:[#allocation2 + $0x144] sm:$0xf] %vm1302_vm9, %v1261_v51  ;;  %v4403_v12 = vld [vmem:[%s4847_s17 + $0x60] sm:$0xe]  ;;  %v5810_v16 = vld [vmem:[%s4847_s17 + $0x5c] sm:$0x1] }
  0xf3   : > { %692 = vrot.lane.b32.xlu0 %v421_v18, %s4806_s18  ;;  %3170 = vst.msk [vmem:[#allocation2 + $0x80] sm:$0xf] %vm204_vm6, %v3054_v53  ;;  %v438_v61 = vrot.slane %v436_v57, 5  ;;  %3171 = vst.msk [vmem:[#allocation2 + $0x8c] sm:$0xf] %vm204_vm6, %v3057_v11  ;;  %v4439_v25 = vrot.slane %v4403_v12, 9 }
  0xf4   : > { %v1021_v33 = vpop.permute.xlu1 %1020  ;;  %v4404_v10 = vld [vmem:[%s4847_s17 + $0x64] sm:$0xf]  ;;  %v4405_v55 = vld [vmem:[%s4847_s17 + $0x68] sm:$0x1]  ;;  %v4315_v17 = vld [vmem:[%s4847_s17 + $0x54] sm:$0xf] }
  0xf5   : > { %1113 = vst.msk [vmem:[#allocation2 + $0x30] sm:$0xf] %vm1108_vm8, %v1021_v33  ;;  %v2847_v50 = vpop.permute.xlu0 %2846  ;;  %v5818_v18 = vld [vmem:[%s4847_s17 + $0x50] sm:$0x1]  ;;  %v3063_v21 = vrot.slane %v4405_v55, 5  ;;  %v2562_v26 = vshll.u32 %v4356_v7, 16  ;;  %v439_v37 = vor.u32 %v438_v61, %v5791_v42 }
  0xf6   : > { %1034 = vrot.lane.b32.xlu1 %v941_v63, %s4807_s4  ;;  %2915 = vst.msk [vmem:[#allocation2 + $0x148] sm:$0xf] %vm1302_vm9, %v2847_v50  ;;  %v3060_v63 = vrot.slane %v4404_v10, 5  ;;  %v185_v13 = vld [vmem:[%s4847_s17 + $0x4c] sm:$0xf]  ;;  %v2566_v27 = vshrl.u32 %v4356_v7, 16 }
  0xf7   : > { %2059 = vrot.lane.b32.xlu0 %v1965_v40, %s4806_s18  ;;  %v4406_v22 = vld [vmem:[%s4847_s17 + $0x6c] sm:$0xe]  ;;  %218 = vst.msk [vmem:[#allocation2 + $0x9c] sm:$0xf] %vm204_vm6, %v185_v13  ;;  %v4407_v56 = vld [vmem:[%s4847_s17 + $0x70] sm:$0xf] }
  0xf8   : > { %v2241_v59 = vpop.permute.xlu1 %2240  ;;  %v4408_v4 = vld [vmem:[%s4847_s17 + $0x74] sm:$0x1]  ;;  %v4440_v51 = vrot.slane %v4406_v22, 9  ;;  %v3061_v8 = vsel %vm4840_vm4, %v4439_v25, %v3060_v63  ;;  %v3062_v23 = vrot.slane %v3060_v63, 4  ;;  %v3067_v30 = vrot.slane %v4407_v56, 5  ;;  %v3244_v33 = vld [vmem:[#allocation2 + $0x138] sm:$0xff] }
  0xf9   : > { %2332 = vst.msk [vmem:[#allocation2 + $0x34] sm:$0xf] %vm1108_vm8, %v2241_v59  ;;  %v2050_v15 = vpop.permute.xlu0 %2049  ;;  %v944_v39 = vrot.slane %v5803_v6, 5  ;;  %v3070_v40 = vrot.slane %v4408_v4, 5  ;;  %v1974_v45 = vrot.slane %v5810_v16, 5  ;;  %v2536_v48 = vrot.slane %v2535_v1, 4 }
  0xfa   : > { %2254 = vrot.lane.b32.xlu1 %v4316_v41, %s4807_s4  ;;  %2140 = vst.msk [vmem:[#allocation2 + $0x40] sm:$0xf] %vm768_vm7, %v2050_v15  ;;  %v3064_v46 = vsel %vm4840_vm4, %v3062_v23, %v3063_v21  ;;  %v3068_v24 = vsel %vm4840_vm4, %v4440_v51, %v3067_v30  ;;  %v4171_v47 = vld [vmem:[%s4847_s17 + $0x48] sm:$0xf]  ;;  %v1973_v49 = vrot.slane %v1971_v3, 4  ;;  %v947_v19 = vrot.slane %v5818_v18, 5 }
  0xfb   : > { %1032 = vrot.lane.b32.xlu0 %v938_v32, %s4807_s4  ;;  %3172 = vst.msk [vmem:[#allocation2 + $0x98] sm:$0xf] %vm204_vm6, %v3061_v8  ;;  %3173 = vst.msk [vmem:[#allocation2 + $0xa4] sm:$0xf] %vm204_vm6, %v3064_v46  ;;  %v3069_v50 = vrot.slane %v3067_v30, 4  ;;  %v5854_v57 = vrot.slane %v2562_v26, 5  ;;  %v2541_v55 = vsel %vm4868_vm5, %v2536_v48, %v5707_v43 }
  0xfc   : > { %v1215_v14 = vpop.permute.xlu1 %1214  ;;  %3174 = vst.msk [vmem:[#allocation2 + $0xb0] sm:$0xf] %vm204_vm6, %v3068_v24  ;;  %v4357_v54 = vld [vmem:[%s4847_s17 + $0x68] sm:$0x1]  ;;  %v2568_v58 = vrot.slane %v2566_v27, 4  ;;  %v5860_v9 = vrot.slane %v439_v37, 4  ;;  %v1975_v21 = vsel %vm4840_vm4, %v1973_v49, %v1974_v45 }
  0xfd   : > { %1307 = vst.msk [vmem:[#allocation2 + $0x30] sm:$0xf] %vm1302_vm9, %v1215_v14  ;;  %v1023_v31 = vpop.permute.xlu0 %1022  ;;  %v3246_v34 = vld [vmem:[#allocation2 + $0x144] sm:$0xff]  ;;  %v946_v53 = vrot.slane %v944_v39, 4  ;;  %v259_v38 = vld [vmem:[%s4847_s17 + $0x58] sm:$0xf] }
  0xfe   : > { %1228 = vrot.lane.b32.xlu1 %v4172_v52, %s4808_s15  ;;  %v4753_v35 = vld [vmem:[#allocation2 + $0x13c] ss:$12 sps:$4 sm:$0xff]   ;;  %1114 = vst.msk [vmem:[#allocation2 + $0x3c] sm:$0xf] %vm1108_vm8, %v1023_v31  ;;  %v4489_v29 = vcombine.low %v3244_v33, %v3246_v34  ;;  %v3071_v52 = vsel %vm4840_vm4, %v3069_v50, %v3070_v40  ;;  %v4212_v2 = vld [vmem:[%s4847_s17 + $0x58] sm:$0xf]  ;;  %v2569_v25 = vor.u32 %v2568_v58, %v5854_v57 }
  0xff   : > { %2252 = vrot.lane.b32.xlu0 %v4315_v17, %s4807_s4  ;;  %3832 = vmatprep.mubr.bf16.mxu1 %v4753_v35  ;;  %v5870_v32 = vld [vmem:[%s4847_s17 + $0x54] sm:$0xe]  ;;  %v5873_v7 = vld [vmem:[%s4847_s17 + $0x48] sm:$0xe]  ;;  %v260_v44 = vld [vmem:[%s4847_s17 + $0x5c] sm:$0x1]  ;;  %v445_v31 = vsel %vm4868_vm5, %v5860_v9, %v5731_v20  ;;  %v948_v33 = vsel %vm4840_vm4, %v946_v53, %v947_v19 }
 0x100   : > { %v2801_v41 = vpop.permute.xlu1 %2800  ;;  %3833 = vmatmul.mubr.bf16.gmra.mxu1 %v4489_v29  ;;  %3175 = vst.msk [vmem:[#allocation2 + $0xbc] sm:$0xf] %vm204_vm6, %v3071_v52  ;;  %v4213_v62 = vld [vmem:[%s4847_s17 + $0x5c] sm:$0x1]  ;;  %v1537_v11 = vshll.u32 %v4212_v2, 16  ;;  %v1541_v12 = vshrl.u32 %v4212_v2, 16 }
 0x101   : > { %2892 = vst.msk [vmem:[#allocation2 + $0x34] sm:$0xf] %vm1302_vm9, %v2801_v41  ;;  %v2243_v59 = vpop.permute.xlu0 %2242  ;;  %v2572_v15 = vshll.u32 %v4357_v54, 16  ;;  %v4355_v16 = vld [vmem:[%s4847_s17 + $0x60] sm:$0xf]  ;;  %v1547_v61 = vshll.u32 %v4213_v62, 16 }
 0x102   : > { %2814 = vrot.lane.b32.xlu1 %v2551_v36, %s4808_s15  ;;  %2333 = vst.msk [vmem:[#allocation2 + $0x40] sm:$0xf] %vm1108_vm8, %v2243_v59  ;;  %v184_v10 = vld [vmem:[%s4847_s17 + $0x48] sm:$0xf]  ;;  %v5888_v14 = vld [vmem:[%s4847_s17 + $0x64] sm:$0xf] }
 0x103   : > { %1226 = vrot.lane.b32.xlu0 %v4171_v47, %s4808_s15  ;;  %v5890_v17 = vrot.slane %v1537_v11, 5  ;;  %v1543_v18 = vrot.slane %v1541_v12, 4  ;;  %217 = vst.msk [vmem:[#allocation2 + $0x90] sm:$0xf] %vm204_vm6, %v184_v10  ;;  %v466_v13 = vshll.u32 %v259_v38, 16  ;;  %v470_v22 = vshrl.u32 %v259_v38, 16 }
 0x104   : > { %v729_v42 = vpop.permute.xlu1 %728  ;;  %v476_v1 = vshll.u32 %v260_v44, 16  ;;  %v2553_v26 = vshrl.u32 %v4355_v16, 16  ;;  %v2556_v56 = vshll.u32 %v4355_v16, 16  ;;  %v1549_v51 = vrot.slane %v1547_v61, 5  ;;  %v258_v35 = vld [vmem:[%s4847_s17 + $0x54] sm:$0xf] }
 0x105   : > { %797 = vst.msk [vmem:[#allocation2 + $0x150] sm:$0xf] %vm768_vm7, %v729_v42  ;;  %v1217_v63 = vpop.permute.xlu0 %1216  ;;  %v1544_v4 = vor.u32 %v1543_v18, %v5890_v17  ;;  %v4295_v27 = vrot.slane %v5870_v32, 9  ;;  %v4151_v8 = vrot.slane %v5873_v7, 9  ;;  %v5901_v23 = vrot.slane %v2572_v15, 5 }
 0x106   : > { %698 = vrot.lane.b32.xlu1 %v455_v60, %s4806_s18  ;;  %1308 = vst.msk [vmem:[#allocation2 + $0x3c] sm:$0xf] %vm1302_vm9, %v1217_v63  ;;  %v1978_v30 = vrot.slane %v5888_v14, 5  ;;  %v5911_v34 = vrot.slane %v2569_v25, 4  ;;  %v4409_v37 = vld [vmem:[%s4847_s17 + $0x78] sm:$0xe] }
 0x107   : > { %2812 = vrot.lane.b32.xlu0 %v2541_v55, %s4808_s15  ;;  %v1545_v36 = vrot.slane %v1544_v4, 4  ;;  %v5915_v41 = vrot.slane %v466_v13, 5  ;;  %v472_v29 = vrot.slane %v470_v22, 4  ;;  %v5917_v45 = vrot.slane %v476_v1, 5  ;;  %v4410_v49 = vld [vmem:[%s4847_s17 + $0x7c] sm:$0xf] }
 0x108   : > { %v2096_v43 = vpop.permute.xlu1 %2095  ;;  %v4441_v46 = vrot.slane %v4409_v37, 9  ;;  %v5920_v24 = vrot.slane %v2553_v26, 4  ;;  %v2558_v47 = vrot.slane %v2556_v56, 5  ;;  %v4411_v19 = vld [vmem:[%s4847_s17 + $0x80] sm:$0x1]  ;;  %v457_v54 = vshrl.u32 %v258_v35, 16 }
 0x109   : > { %2163 = vst.msk [vmem:[#allocation2 + $0x154] sm:$0xf] %vm768_vm7, %v2096_v43  ;;  %v2803_v40 = vpop.permute.xlu0 %2802  ;;  %v1550_v48 = vsel %vm4868_vm5, %v1545_v36, %v1549_v51  ;;  %v4318_v50 = vld [vmem:[%s4847_s17 + $0x64] sm:$0xf]  ;;  %v460_v58 = vshll.u32 %v258_v35, 16  ;;  %v3074_v59 = vrot.slane %v4410_v49, 5  ;;  %v1972_v53 = vsel %vm4840_vm4, %v4295_v27, %v1971_v3 }
 0x10a   : > { %2065 = vrot.lane.b32.xlu1 %v1975_v21, %s4806_s18  ;;  %2893 = vst.msk [vmem:[#allocation2 + $0x40] sm:$0xf] %vm1302_vm9, %v2803_v40  ;;  %v3077_v60 = vrot.slane %v4411_v19, 5  ;;  %v4211_v9 = vld [vmem:[%s4847_s17 + $0x54] sm:$0xf]  ;;  %v945_v38 = vsel %vm4840_vm4, %v4151_v8, %v944_v39  ;;  %v473_v44 = vor.u32 %v472_v29, %v5915_v41  ;;  %v2559_v12 = vor.u32 %v2558_v47, %v5920_v24 }
 0x10b   : > { %696 = vrot.lane.b32.xlu0 %v445_v31, %s4806_s18  ;;  %1812 = vst.msk [vmem:[#allocation2 + $0xa0] sm:$0xf] %vm204_vm6, %v1550_v48  ;;  %v1528_v52 = vshrl.u32 %v4211_v9, 16  ;;  %v1531_v2 = vshll.u32 %v4211_v9, 16  ;;  %v4412_v42 = vld [vmem:[%s4847_s17 + $0x84] sm:$0xe]  ;;  %v3075_v5 = vsel %vm4840_vm4, %v4441_v46, %v3074_v59 }
 0x10c   : > { %v1069_v20 = vpop.permute.xlu1 %1068  ;;  %v4413_v32 = vld [vmem:[%s4847_s17 + $0x88] sm:$0xf]  ;;  %v3076_v3 = vrot.slane %v3074_v59, 4  ;;  %v4414_v6 = vld [vmem:[%s4847_s17 + $0x8c] sm:$0x1]  ;;  %v4442_v11 = vrot.slane %v4412_v42, 9  ;;  %v2575_v42 = vsel %vm4868_vm5, %v5911_v34, %v5901_v23 }
 0x10d   : > { %1137 = vst.msk [vmem:[#allocation2 + $0x150] sm:$0xf] %vm1108_vm8, %v1069_v20  ;;  %v731_v7 = vpop.permute.xlu0 %730  ;;  %v5944_v62 = vld [vmem:[%s4847_s17 + $0x68] sm:$0x1]  ;;  %v5952_v15 = vld [vmem:[%s4847_s17 + $0x58] sm:$0xf] }
 0x10e   : > { %1038 = vrot.lane.b32.xlu1 %v948_v33, %s4807_s4  ;;  %798 = vst.msk [vmem:[#allocation2 + $0x15c] sm:$0xf] %vm768_vm7, %v731_v7  ;;  %v1530_v16 = vrot.slane %v1528_v52, 4  ;;  %v1533_v61 = vrot.slane %v1531_v2, 5  ;;  %v3081_v10 = vrot.slane %v4413_v32, 5  ;;  %v5958_v25 = vrot.slane %v457_v54, 4 }
 0x10f   : > { %3176 = vst.msk [vmem:[#allocation2 + $0xc8] sm:$0xf] %vm204_vm6, %v3075_v5  ;;  %2063 = vrot.lane.b32.xlu0 %v1972_v53, %s4806_s18  ;;  %v4174_v55 = vld [vmem:[%s4847_s17 + $0x58] sm:$0xf]  ;;  %v5960_v18 = vrot.slane %v460_v58, 5  ;;  %v3078_v21 = vsel %vm4840_vm4, %v3076_v3, %v3077_v60  ;;  %v3084_v13 = vrot.slane %v4414_v6, 5 }
 0x110   : > { %v2289_v39 = vpop.permute.xlu1 %2288  ;;  %v5963_v63 = vld [vmem:[%s4847_s17 + $0x5c] sm:$0x1]  ;;  %v5970_v22 = vrot.slane %v1978_v30, 4  ;;  %v5973_v1 = vld [vmem:[%s4847_s17 + $0x70] sm:$0xf]  ;;  %v1534_v26 = vor.u32 %v1533_v61, %v1530_v16  ;;  %v3082_v56 = vsel %vm4840_vm4, %v4442_v11, %v3081_v10  ;;  %v3083_v4 = vrot.slane %v3081_v10, 4 }
 0x111   : > { %2356 = vst.msk [vmem:[#allocation2 + $0x154] sm:$0xf] %vm1108_vm8, %v2289_v39  ;;  %v5976_v43 = vld [vmem:[%s4847_s17 + $0x64] sm:$0xf]  ;;  %v2098_v51 = vpop.permute.xlu0 %2097  ;;  %v3200_v27 = vld [vmem:[#allocation2 + $0x30] sm:$0xff]  ;;  %v3202_v8 = vld [vmem:[#allocation2 + $0x3c] sm:$0xff]  ;;  %v463_v48 = vor.u32 %v5960_v18, %v5958_v25 }
 0x112   : > { %2258 = vrot.lane.b32.xlu1 %v4318_v50, %s4807_s4  ;;  %3177 = vst.msk [vmem:[#allocation2 + $0xd4] sm:$0xf] %vm204_vm6, %v3078_v21  ;;  %v4755_v31 = vld [vmem:[#allocation2 + $0x34] ss:$12 sps:$4 sm:$0xff]   ;;  %v5981_v33 = vrot.slane %v473_v44, 4  ;;  %v1981_v35 = vrot.slane %v5944_v62, 5  ;;  %v4456_v37 = vcombine.low %v3200_v27, %v3202_v8  ;;  %v3085_v24 = vsel %vm4840_vm4, %v3083_v4, %v3084_v13 }
 0x113   : > { %3178 = vst.msk [vmem:[#allocation2 + $0xe0] sm:$0xf] %vm204_vm6, %v3082_v56  ;;  %v4317_v40 = vld [vmem:[%s4847_s17 + $0x60] sm:$0xf]  ;;  %v5987_v29 = vrot.slane %v2559_v12, 4  ;;  %v1535_v20 = vrot.slane %v1534_v26, 4  ;;  %1036 = vrot.lane.b32.xlu0 %v945_v38, %s4807_s4  ;;  %3744 = vmatprep.mubr.bf16.mxu0 %v4755_v31 }
 0x114   : > { %2164 = vst.msk [vmem:[#allocation2 + $0x160] sm:$0xf] %vm768_vm7, %v2098_v51  ;;  %v1263_v36 = vpop.permute.xlu1 %1262  ;;  %v5990_v46 = vld [vmem:[%s4847_s17 + $0x60] sm:$0xe]  ;;  %v4415_v47 = vld [vmem:[%s4847_s17 + $0x90] sm:$0xe]  ;;  %3745 = vmatmul.mubr.bf16.gmra.mxu0 %v4456_v37 }
 0x115   : > { %1331 = vst.msk [vmem:[#allocation2 + $0x150] sm:$0xf] %vm1302_vm9, %v1263_v36  ;;  %v951_v49 = vrot.slane %v5952_v15, 5  ;;  %v954_v19 = vrot.slane %v5963_v63, 5  ;;  %v6002_v50 = vld [vmem:[%s4847_s17 + $0x54] sm:$0xe]  ;;  %v1540_v53 = vsel %vm4868_vm5, %v1535_v20, %v5890_v17  ;;  %v1071_v2 = vpop.permute.xlu0 %1070  ;;  %v479_v17 = vsel %vm4868_vm5, %v5981_v33, %v5917_v45 }
 0x116   : > { %v2586_v54 = vshll.u32 %v5973_v1, 16  ;;  %3179 = vst.msk [vmem:[#allocation2 + $0xec] sm:$0xf] %vm204_vm6, %v3085_v24  ;;  %v4416_v58 = vld [vmem:[%s4847_s17 + $0x94] sm:$0xf]  ;;  %1232 = vrot.lane.b32.xlu1 %v4174_v55, %s4808_s15  ;;  %v2590_v60 = vshrl.u32 %v5973_v1, 16 }
 0x117   : > { %v6009_v59 = vld [vmem:[%s4847_s17 + $0x74] sm:$0x1]  ;;  %v490_v9 = vshll.u32 %v5976_v43, 16  ;;  %v4417_v38 = vld [vmem:[%s4847_s17 + $0x98] sm:$0x1]  ;;  %v4443_v52 = vrot.slane %v4415_v47, 9  ;;  %2256 = vrot.lane.b32.xlu0 %v4317_v40, %s4807_s4  ;;  %v2565_v40 = vsel %vm4868_vm5, %v5987_v29, %v5854_v57 }
 0x118   : > { %1811 = vst.msk [vmem:[#allocation2 + $0x94] sm:$0xf] %vm204_vm6, %v1540_v53  ;;  %v3088_v32 = vrot.slane %v4416_v58, 5  ;;  %v3091_v7 = vrot.slane %v4417_v38, 5  ;;  %v4418_v44 = vld [vmem:[%s4847_s17 + $0x9c] sm:$0xe]  ;;  %v2849_v5 = vpop.permute.xlu1 %2848 }
 0x119   : > { %1138 = vst.msk [vmem:[#allocation2 + $0x15c] sm:$0xf] %vm1108_vm8, %v1071_v2  ;;  %v4173_v3 = vld [vmem:[%s4847_s17 + $0x54] sm:$0xf]  ;;  %v494_v6 = vshrl.u32 %v5976_v43, 16  ;;  %v4444_v12 = vrot.slane %v4418_v44, 9  ;;  %v2291_v18 = vpop.permute.xlu0 %2290 }
 0x11a   : > { %v4419_v11 = vld [vmem:[%s4847_s17 + $0xa0] sm:$0xf]  ;;  %v4420_v39 = vld [vmem:[%s4847_s17 + $0xa4] sm:$0x1]  ;;  %2916 = vst.msk [vmem:[#allocation2 + $0x154] sm:$0xf] %vm1302_vm9, %v2849_v5  ;;  %v3089_v16 = vsel %vm4840_vm4, %v4443_v52, %v3088_v32  ;;  %2818 = vrot.lane.b32.xlu1 %v2575_v42, %s4808_s15 }
 0x11b   : > { %v6036_v23 = vrot.slane %v951_v49, 4  ;;  %v4296_v34 = vrot.slane %v5990_v46, 9  ;;  %v3090_v45 = vrot.slane %v3088_v32, 4  ;;  %v6042_v61 = vrot.slane %v463_v48, 4  ;;  %3180 = vst.msk [vmem:[#allocation2 + $0xf8] sm:$0xf] %vm204_vm6, %v3089_v16  ;;  %1230 = vrot.lane.b32.xlu0 %v4173_v3, %s4808_s15 }
 0x11c   : > { %v4152_v10 = vrot.slane %v6002_v50, 9  ;;  %v3095_v55 = vrot.slane %v4419_v11, 5  ;;  %v3098_v25 = vrot.slane %v4420_v39, 5  ;;  %v6046_v21 = vrot.slane %v2586_v54, 5  ;;  %2357 = vst.msk [vmem:[#allocation2 + $0x160] sm:$0xf] %vm1108_vm8, %v2291_v18  ;;  %v2052_v26 = vpop.permute.xlu1 %2051 }
 0x11d   : > { %v6048_v13 = vrot.slane %v2590_v60, 4  ;;  %v2596_v1 = vshll.u32 %v6009_v59, 16  ;;  %v3092_v43 = vsel %vm4840_vm4, %v3090_v45, %v3091_v7  ;;  %v6055_v56 = vld [vmem:[%s4847_s17 + $0x68] sm:$0x1]  ;;  %v6057_v4 = vrot.slane %v490_v9, 5  ;;  %v1265_v58 = vpop.permute.xlu0 %1264 }
 0x11e   : > { %v6059_v51 = vrot.slane %v494_v6, 4  ;;  %v6062_v27 = vld [vmem:[%s4847_s17 + $0x6c] sm:$0xf]  ;;  %3181 = vst.msk [vmem:[#allocation2 + $0x104] sm:$0xf] %vm204_vm6, %v3092_v43  ;;  %v3096_v8 = vsel %vm4840_vm4, %v4444_v12, %v3095_v55  ;;  %v3097_v31 = vrot.slane %v3095_v55, 4  ;;  %702 = vrot.lane.b32.xlu1 %v479_v17, %s4806_s18  ;;  %v1982_v60 = vsel %vm4840_vm4, %v5970_v22, %v1981_v35 }
 0x11f   : > { %2141 = vst.msk [vmem:[#allocation2 + $0x4c] sm:$0xf] %vm768_vm7, %v2052_v26  ;;  %v4421_v33 = vld [vmem:[%s4847_s17 + $0xa8] sm:$0xe]  ;;  %v4422_v36 = vld [vmem:[%s4847_s17 + $0xac] sm:$0xf]  ;;  %2816 = vrot.lane.b32.xlu0 %v2565_v40, %s4808_s15  ;;  %v469_v22 = vsel %vm4868_vm5, %v6042_v61, %v5915_v41  ;;  %v2593_v35 = vor.u32 %v6048_v13, %v6046_v21  ;;  %v955_v39 = vsel %vm4840_vm4, %v6036_v23, %v954_v19 }
 0x120   : > { %3182 = vst.msk [vmem:[#allocation2 + $0x110] sm:$0xf] %vm204_vm6, %v3096_v8  ;;  %v4423_v37 = vld [vmem:[%s4847_s17 + $0xb0] sm:$0x1]  ;;  %v3099_v20 = vsel %vm4840_vm4, %v3097_v31, %v3098_v25  ;;  %v4445_v24 = vrot.slane %v4421_v33, 9  ;;  %v3102_v47 = vrot.slane %v4422_v36, 5  ;;  %v1025_v38 = vpop.permute.xlu1 %1024  ;;  %v497_v12 = vor.u32 %v6059_v51, %v6057_v4 }
 0x121   : > { %v187_v48 = vld [vmem:[%s4847_s17 + $0x58] sm:$0xf]  ;;  %v4424_v54 = vld [vmem:[%s4847_s17 + $0xb4] sm:$0xe]  ;;  %3183 = vst.msk [vmem:[#allocation2 + $0x11c] sm:$0xf] %vm204_vm6, %v3099_v20  ;;  %v2851_v11 = vpop.permute.xlu0 %2850  ;;  %v1979_v63 = vsel %vm4840_vm4, %v4296_v34, %v1978_v30 }
 0x122   : > { %v3105_v9 = vrot.slane %v4423_v37, 5  ;;  %220 = vst.msk [vmem:[#allocation2 + $0xb4] sm:$0xf] %vm204_vm6, %v187_v48  ;;  %v4425_v57 = vld [vmem:[%s4847_s17 + $0xb8] sm:$0xf]  ;;  %v4446_v53 = vrot.slane %v4424_v54, 9  ;;  %v3103_v52 = vsel %vm4840_vm4, %v4445_v24, %v3102_v47  ;;  %2069 = vrot.lane.b32.xlu1 %v1982_v60, %s4806_s18 }
 0x123   : > { %v4426_v29 = vld [vmem:[%s4847_s17 + $0xbc] sm:$0x1]  ;;  %1332 = vst.msk [vmem:[#allocation2 + $0x15c] sm:$0xf] %vm1302_vm9, %v1265_v58  ;;  %v3104_v62 = vrot.slane %v3102_v47, 4  ;;  %v3109_v2 = vrot.slane %v4425_v57, 5  ;;  %700 = vrot.lane.b32.xlu0 %v469_v22, %s4806_s18  ;;  %v952_v57 = vsel %vm4840_vm4, %v4152_v10, %v951_v49 }
 0x124   : > { %v3112_v42 = vrot.slane %v4426_v29, 5  ;;  %1115 = vst.msk [vmem:[#allocation2 + $0x48] sm:$0xf] %vm1108_vm8, %v1025_v38  ;;  %v500_v32 = vshll.u32 %v6055_v56, 16  ;;  %v2577_v7 = vshrl.u32 %v6062_v27, 16  ;;  %v2580_v44 = vshll.u32 %v6062_v27, 16  ;;  %v2245_v61 = vpop.permute.xlu1 %2244 }
 0x125   : > { %3184 = vst.msk [vmem:[#allocation2 + $0x128] sm:$0xf] %vm204_vm6, %v3103_v52  ;;  %v6108_v5 = vld [vmem:[%s4847_s17 + $0x70] sm:$0xf]  ;;  %v3106_v3 = vsel %vm4840_vm4, %v3104_v62, %v3105_v9  ;;  %v3110_v41 = vsel %vm4840_vm4, %v4446_v53, %v3109_v2  ;;  %v3111_v17 = vrot.slane %v3109_v2, 4  ;;  %v6137_v19 = vrot.slane %v2596_v1, 5  ;;  %v2054_v56 = vpop.permute.xlu0 %2053 }
 0x126   : > { %v4215_v6 = vld [vmem:[%s4847_s17 + $0x64] sm:$0xf]  ;;  %v6123_v16 = vld [vmem:[%s4847_s17 + $0x74] sm:$0x1]  ;;  %v261_v45 = vld [vmem:[%s4847_s17 + $0x60] sm:$0xf]  ;;  %1042 = vrot.lane.b32.xlu1 %v955_v39, %s4807_s4 }
 0x127   : > { %3185 = vst.msk [vmem:[#allocation2 + $0x134] sm:$0xf] %vm204_vm6, %v3106_v3  ;;  %3186 = vst.msk [vmem:[#allocation2 + $0x140] sm:$0xf] %vm204_vm6, %v3110_v41  ;;  %v3113_v23 = vsel %vm4840_vm4, %v3111_v17, %v3112_v42  ;;  %v4216_v55 = vld [vmem:[%s4847_s17 + $0x68] sm:$0x1]  ;;  %2067 = vrot.lane.b32.xlu0 %v1979_v63, %s4806_s18 }
 0x128   : > { %2917 = vst.msk [vmem:[#allocation2 + $0x160] sm:$0xf] %vm1302_vm9, %v2851_v11  ;;  %v1561_v25 = vshll.u32 %v4215_v6, 16  ;;  %v4320_v18 = vld [vmem:[%s4847_s17 + $0x70] sm:$0xf]  ;;  %v6145_v14 = vrot.slane %v2593_v35, 4  ;;  %v1219_v36 = vpop.permute.xlu1 %1218 }
 0x129   : > { %2334 = vst.msk [vmem:[#allocation2 + $0x4c] sm:$0xf] %vm1108_vm8, %v2245_v61  ;;  %v6147_v46 = vrot.slane %v500_v32, 5  ;;  %v1565_v30 = vshrl.u32 %v4215_v6, 16  ;;  %v1571_v59 = vshll.u32 %v4216_v55, 16  ;;  %v6152_v13 = vrot.slane %v2577_v7, 4  ;;  %v1027_v38 = vpop.permute.xlu0 %1026 }
 0x12a   : > { %3187 = vst.msk [vmem:[#allocation2 + $0x14c] sm:$0xf] %vm204_vm6, %v3113_v23  ;;  %v186_v34 = vld [vmem:[%s4847_s17 + $0x54] sm:$0xf]  ;;  %v1985_v1 = vrot.slane %v6108_v5, 5  ;;  %v481_v43 = vshrl.u32 %v261_v45, 16  ;;  %2262 = vrot.lane.b32.xlu1 %v4320_v18, %s4807_s4  ;;  %v2599_v55 = vsel %vm4868_vm5, %v6145_v14, %v6137_v19 }
 0x12b   : > { %v6155_v26 = vrot.slane %v1561_v25, 5  ;;  %219 = vst.msk [vmem:[#allocation2 + $0xa8] sm:$0xf] %vm204_vm6, %v186_v34  ;;  %v6158_v51 = vrot.slane %v497_v12, 4  ;;  %v6160_v27 = vrot.slane %v2580_v44, 5  ;;  %v1988_v8 = vrot.slane %v6123_v16, 5  ;;  %1040 = vrot.lane.b32.xlu0 %v952_v57, %s4807_s4 }
 0x12c   : > { %v1567_v31 = vrot.slane %v1565_v30, 4  ;;  %v4427_v33 = vld [vmem:[%s4847_s17 + $0xc0] sm:$0xe]  ;;  %2142 = vst.msk [vmem:[#allocation2 + $0x58] sm:$0xf] %vm768_vm7, %v2054_v56  ;;  %v484_v37 = vshll.u32 %v261_v45, 16  ;;  %v2805_v49 = vpop.permute.xlu1 %2804 }
 0x12d   : > { %v6166_v40 = vld [vmem:[%s4847_s17 + $0x64] sm:$0xf]  ;;  %v4447_v24 = vrot.slane %v4427_v33, 9  ;;  %1309 = vst.msk [vmem:[#allocation2 + $0x48] sm:$0xf] %vm1302_vm9, %v1219_v36  ;;  %v1573_v54 = vrot.slane %v1571_v59, 5  ;;  %v2583_v44 = vor.u32 %v6160_v27, %v6152_v13  ;;  %v2247_v23 = vpop.permute.xlu0 %2246  ;;  %v503_v57 = vsel %vm4868_vm5, %v6158_v51, %v6147_v46 }
 0x12e   : > { %v4428_v20 = vld [vmem:[%s4847_s17 + $0xc4] sm:$0xf]  ;;  %v1568_v48 = vor.u32 %v1567_v31, %v6155_v26  ;;  %v4429_v58 = vld [vmem:[%s4847_s17 + $0xc8] sm:$0x1]  ;;  %v4214_v9 = vld [vmem:[%s4847_s17 + $0x60] sm:$0xf] }
 0x12f   : > { %v4176_v47 = vld [vmem:[%s4847_s17 + $0x64] sm:$0xf]  ;;  %v3116_v60 = vrot.slane %v4428_v20, 5  ;;  %v6184_v29 = vrot.slane %v1985_v1, 4  ;;  %v6186_v53 = vrot.slane %v481_v43, 4  ;;  %v3248_v52 = vld [vmem:[#allocation2 + $0x150] sm:$0xff] }
 0x130   : > { %v3250_v62 = vld [vmem:[#allocation2 + $0x15c] sm:$0xff]  ;;  %v1569_v42 = vrot.slane %v1568_v48, 4  ;;  %1116 = vst.msk [vmem:[#allocation2 + $0x54] sm:$0xf] %vm1108_vm8, %v1027_v38  ;;  %v4319_v10 = vld [vmem:[%s4847_s17 + $0x6c] sm:$0xf]  ;;  %1236 = vrot.lane.b32.xlu1 %v4176_v47, %s4808_s15  ;;  %v733_v34 = vpop.permute.xlu1 %732 }
 0x131   : > { %v4757_v2 = vld [vmem:[#allocation2 + $0x154] ss:$12 sps:$4 sm:$0xff]   ;;  %v3117_v22 = vsel %vm4840_vm4, %v4447_v24, %v3116_v60  ;;  %v3118_v15 = vrot.slane %v3116_v60, 4  ;;  %v4492_v50 = vcombine.low %v3248_v52, %v3250_v62  ;;  %v6192_v35 = vrot.slane %v484_v37, 5  ;;  %2894 = vst.msk [vmem:[#allocation2 + $0x4c] sm:$0xf] %vm1302_vm9, %v2805_v49  ;;  %2260 = vrot.lane.b32.xlu0 %v4319_v10, %s4807_s4 }
 0x132   : > { %v3119_v32 = vrot.slane %v4429_v58, 5  ;;  %3188 = vst.msk [vmem:[#allocation2 + $0x158] sm:$0xf] %vm204_vm6, %v3117_v22  ;;  %v1552_v7 = vshrl.u32 %v4214_v9, 16  ;;  %3840 = vmatprep.mubr.bf16.mxu1 %v4757_v2  ;;  %v958_v3 = vrot.slane %v6166_v40, 5  ;;  %v1574_v41 = vsel %vm4868_vm5, %v1569_v42, %v1573_v54 }
 0x133   : > { %v1555_v17 = vshll.u32 %v4214_v9, 16  ;;  %v4430_v6 = vld [vmem:[%s4847_s17 + $0xcc] sm:$0xe]  ;;  %v4431_v11 = vld [vmem:[%s4847_s17 + $0xd0] sm:$0xf]  ;;  %3841 = vmatmul.mubr.bf16.gmra.mxu1 %v4492_v50  ;;  %v2584_v31 = vrot.slane %v2583_v44, 4  ;;  %v487_v33 = vor.u32 %v6192_v35, %v6186_v53  ;;  %v1221_v9 = vpop.permute.xlu0 %1220 }
 0x134   : > { %1814 = vst.msk [vmem:[#allocation2 + $0xb8] sm:$0xf] %vm204_vm6, %v1574_v41  ;;  %v3120_v39 = vsel %vm4840_vm4, %v3118_v15, %v3119_v32  ;;  %v1554_v12 = vrot.slane %v1552_v7, 4  ;;  %v4432_v45 = vld [vmem:[%s4847_s17 + $0xd4] sm:$0x1]  ;;  %v4448_v61 = vrot.slane %v4430_v6, 9  ;;  %2822 = vrot.lane.b32.xlu1 %v2599_v55, %s4808_s15  ;;  %v2100_v62 = vpop.permute.xlu1 %2099 }
 0x135   : > { %v3123_v63 = vrot.slane %v4431_v11, 5  ;;  %3189 = vst.msk [vmem:[#allocation2 + $0x164] sm:$0xf] %vm204_vm6, %v3120_v39  ;;  %v1557_v25 = vrot.slane %v1555_v17, 5  ;;  %v3126_v18 = vrot.slane %v4432_v45, 5  ;;  %v960_v15 = vrot.slane %v958_v3, 4 }
 0x136   : > { %v189_v30 = vld [vmem:[%s4847_s17 + $0x64] sm:$0xf]  ;;  %v4218_v59 = vld [vmem:[%s4847_s17 + $0x70] sm:$0xf]  ;;  %2335 = vst.msk [vmem:[#allocation2 + $0x58] sm:$0xf] %vm1108_vm8, %v2247_v23  ;;  %v2589_v50 = vsel %vm4868_vm5, %v2584_v31, %v6046_v21 }
 0x137   : > { %v4175_v13 = vld [vmem:[%s4847_s17 + $0x60] sm:$0xf]  ;;  %v3124_v43 = vsel %vm4840_vm4, %v4448_v61, %v3123_v63  ;;  %v3125_v56 = vrot.slane %v3123_v63, 4  ;;  %222 = vst.msk [vmem:[#allocation2 + $0xcc] sm:$0xf] %vm204_vm6, %v189_v30  ;;  %v1585_v14 = vshll.u32 %v4218_v59, 16  ;;  %v1558_v36 = vor.u32 %v1557_v25, %v1554_v12  ;;  %v2807_v7 = vpop.permute.xlu0 %2806 }
 0x138   : > { %v4219_v19 = vld [vmem:[%s4847_s17 + $0x74] sm:$0x1]  ;;  %v1589_v27 = vshrl.u32 %v4218_v59, 16  ;;  %799 = vst.msk [vmem:[#allocation2 + $0x168] sm:$0xf] %vm768_vm7, %v733_v34  ;;  %1234 = vrot.lane.b32.xlu0 %v4175_v13, %s4808_s15  ;;  %706 = vrot.lane.b32.xlu1 %v503_v57, %s4806_s18  ;;  %v488_v10 = vrot.slane %v487_v33, 4  ;;  %v1073_v21 = vpop.permute.xlu1 %1072 }
 0x139   : > { %3190 = vst.msk [vmem:[#allocation2 + $0x170] sm:$0xf] %vm204_vm6, %v3124_v43  ;;  %v1595_v37 = vshll.u32 %v4219_v19, 16  ;;  %v188_v20 = vld [vmem:[%s4847_s17 + $0x60] sm:$0xf]  ;;  %v3127_v48 = vsel %vm4840_vm4, %v3125_v56, %v3126_v18  ;;  %v1587_v54 = vrot.slane %v1585_v14, 5 }
 0x13a   : > { %v4217_v24 = vld [vmem:[%s4847_s17 + $0x6c] sm:$0xf]  ;;  %v827_v47 = vld [vmem:[%s4847_s17 + $0x68] sm:$0x1]  ;;  %v1591_v58 = vrot.slane %v1589_v27, 4  ;;  %v1559_v38 = vrot.slane %v1558_v36, 4 }
 0x13b   : > { %221 = vst.msk [vmem:[#allocation2 + $0xc0] sm:$0xf] %vm204_vm6, %v188_v20  ;;  %v1576_v60 = vshrl.u32 %v4217_v24, 16  ;;  %v4362_v53 = vld [vmem:[%s4847_s17 + $0x7c] sm:$0xf]  ;;  %v1579_v52 = vshll.u32 %v4217_v24, 16  ;;  %v735_v63 = vpop.permute.xlu0 %734 }
 0x13c   : > { %3191 = vst.msk [vmem:[#allocation2 + $0x17c] sm:$0xf] %vm204_vm6, %v3127_v48  ;;  %v1592_v2 = vor.u32 %v1591_v58, %v1587_v54  ;;  %v1597_v42 = vrot.slane %v1595_v37, 5  ;;  %v961_v46 = vrot.slane %v827_v47, 5  ;;  %v1564_v51 = vsel %vm4868_vm5, %v1559_v38, %v6155_v26  ;;  %v4265_v44 = vld [vmem:[%s4847_s17 + $0x6c] sm:$0xe]  ;;  %2820 = vrot.lane.b32.xlu0 %v2589_v50, %s4808_s15 }
 0x13d   : > { %1310 = vst.msk [vmem:[#allocation2 + $0x54] sm:$0xf] %vm1302_vm9, %v1221_v9  ;;  %v1578_v22 = vrot.slane %v1576_v60, 4  ;;  %v1581_v49 = vrot.slane %v1579_v52, 5  ;;  %v2610_v35 = vshll.u32 %v4362_v53, 16  ;;  %v1989_v26 = vsel %vm4840_vm4, %v6184_v29, %v1988_v8  ;;  %v3204_v31 = vld [vmem:[#allocation2 + $0x48] sm:$0xff] }
 0x13e   : > { %2165 = vst.msk [vmem:[#allocation2 + $0x16c] sm:$0xf] %vm768_vm7, %v2100_v62  ;;  %v1593_v32 = vrot.slane %v1592_v2, 4  ;;  %v2614_v41 = vshrl.u32 %v4362_v53, 16  ;;  %v265_v6 = vld [vmem:[%s4847_s17 + $0x70] sm:$0xf]  ;;  %2073 = vrot.lane.b32.xlu1 %v1989_v26, %s4806_s18  ;;  %v493_v29 = vsel %vm4868_vm5, %v488_v10, %v6057_v4  ;;  %v962_v39 = vsel %vm4840_vm4, %v960_v15, %v961_v46  ;;  %v2293_v4 = vpop.permute.xlu1 %2292 }
 0x13f   : > { %1813 = vst.msk [vmem:[#allocation2 + $0xac] sm:$0xf] %vm204_vm6, %v1564_v51  ;;  %v1582_v17 = vor.u32 %v1581_v49, %v1578_v22  ;;  %v4361_v16 = vld [vmem:[%s4847_s17 + $0x78] sm:$0xf]  ;;  %v4297_v12 = vrot.slane %v4265_v44, 9  ;;  %v6274_v61 = vrot.slane %v2610_v35, 5  ;;  %v2102_v27 = vpop.permute.xlu0 %2101 }
 0x140   : > { %2895 = vst.msk [vmem:[#allocation2 + $0x58] sm:$0xf] %vm1302_vm9, %v2807_v7  ;;  %v1598_v11 = vsel %vm4868_vm5, %v1593_v32, %v1597_v42  ;;  %v825_v45 = vld [vmem:[%s4847_s17 + $0x60] sm:$0xe]  ;;  %v4363_v23 = vld [vmem:[%s4847_s17 + $0x80] sm:$0x1]  ;;  %704 = vrot.lane.b32.xlu0 %v493_v29, %s4806_s18 }
 0x141   : > { %1139 = vst.msk [vmem:[#allocation2 + $0x168] sm:$0xf] %vm1108_vm8, %v1073_v21  ;;  %v1583_v8 = vrot.slane %v1582_v17, 4  ;;  %v2616_v55 = vrot.slane %v2614_v41, 4  ;;  %v514_v25 = vshll.u32 %v265_v6, 16  ;;  %v518_v18 = vshrl.u32 %v265_v6, 16 }
 0x142   : > { %1816 = vst.msk [vmem:[#allocation2 + $0xd0] sm:$0xf] %vm204_vm6, %v1598_v11  ;;  %v2601_v59 = vshrl.u32 %v4361_v16, 16  ;;  %v2604_v34 = vshll.u32 %v4361_v16, 16  ;;  %v4153_v13 = vrot.slane %v825_v45, 9  ;;  %1046 = vrot.lane.b32.xlu1 %v962_v39, %s4807_s4  ;;  %v1986_v43 = vsel %vm4840_vm4, %v4297_v12, %v1985_v1  ;;  %v1267_v5 = vpop.permute.xlu1 %1266 }
 0x143   : > { %v1588_v30 = vsel %vm4868_vm5, %v1583_v8, %v1587_v54  ;;  %800 = vst.msk [vmem:[#allocation2 + $0x174] sm:$0xf] %vm768_vm7, %v735_v63  ;;  %v4322_v56 = vld [vmem:[%s4847_s17 + $0x7c] sm:$0xf]  ;;  %v2620_v19 = vshll.u32 %v4363_v23, 16  ;;  %v2617_v37 = vor.u32 %v2616_v55, %v6274_v61  ;;  %v6291_v20 = vrot.slane %v514_v25, 5  ;;  %v1075_v40 = vpop.permute.xlu0 %1074 }
 0x144   : > { %1815 = vst.msk [vmem:[#allocation2 + $0xc4] sm:$0xf] %vm204_vm6, %v1588_v30  ;;  %v264_v14 = vld [vmem:[%s4847_s17 + $0x6c] sm:$0xf]  ;;  %v520_v24 = vrot.slane %v518_v18, 4  ;;  %v2603_v48 = vrot.slane %v2601_v59, 4  ;;  %2071 = vrot.lane.b32.xlu0 %v1986_v43, %s4806_s18  ;;  %v959_v60 = vsel %vm4840_vm4, %v4153_v13, %v958_v3 }
 0x145   : > { %2358 = vst.msk [vmem:[#allocation2 + $0x16c] sm:$0xf] %vm1108_vm8, %v2293_v4  ;;  %v266_v1 = vld [vmem:[%s4847_s17 + $0x74] sm:$0x1]  ;;  %v2606_v54 = vrot.slane %v2604_v34, 5  ;;  %v505_v9 = vshrl.u32 %v264_v14, 16 }
 0x146   : > { %2166 = vst.msk [vmem:[#allocation2 + $0x178] sm:$0xf] %vm768_vm7, %v2102_v27  ;;  %v191_v58 = vld [vmem:[%s4847_s17 + $0x70] sm:$0xf]  ;;  %v508_v57 = vshll.u32 %v264_v14, 16  ;;  %2266 = vrot.lane.b32.xlu1 %v4322_v56, %s4807_s4  ;;  %v2618_v46 = vrot.slane %v2617_v37, 4  ;;  %v521_v51 = vor.u32 %v520_v24, %v6291_v20  ;;  %v2853_v50 = vpop.permute.xlu1 %2852 }
 0x147   : > { %v3206_v33 = vld [vmem:[#allocation2 + $0x54] sm:$0xff]  ;;  %1333 = vst.msk [vmem:[#allocation2 + $0x168] sm:$0xf] %vm1302_vm9, %v1267_v5  ;;  %v4221_v53 = vld [vmem:[%s4847_s17 + $0x7c] sm:$0xf]  ;;  %v2622_v3 = vrot.slane %v2620_v19, 5  ;;  %v2607_v44 = vor.u32 %v2606_v54, %v2603_v48  ;;  %v2295_v12 = vpop.permute.xlu0 %2294 }
 0x148   : > { %v4759_v36 = vld [vmem:[#allocation2 + $0x4c] ss:$12 sps:$4 sm:$0xff]   ;;  %v4459_v47 = vcombine.low %v3204_v31, %v3206_v33  ;;  %224 = vst.msk [vmem:[#allocation2 + $0xe4] sm:$0xf] %vm204_vm6, %v191_v58  ;;  %v6307_v52 = vld [vmem:[%s4847_s17 + $0x7c] sm:$0xf]  ;;  %1044 = vrot.lane.b32.xlu0 %v959_v60, %s4807_s4 }
 0x149   : > { %3752 = vmatprep.mubr.bf16.mxu0 %v4759_v36  ;;  %v4220_v38 = vld [vmem:[%s4847_s17 + $0x78] sm:$0xf]  ;;  %v1609_v62 = vshll.u32 %v4221_v53, 16  ;;  %v1613_v2 = vshrl.u32 %v4221_v53, 16  ;;  %v4178_v15 = vld [vmem:[%s4847_s17 + $0x70] sm:$0xf]  ;;  %v2623_v45 = vsel %vm4868_vm5, %v2618_v46, %v2622_v3 }
 0x14a   : > { %3753 = vmatmul.mubr.bf16.gmra.mxu0 %v4459_v47  ;;  %v1600_v42 = vshrl.u32 %v4220_v38, 16  ;;  %v1603_v22 = vshll.u32 %v4220_v38, 16  ;;  %v524_v49 = vshll.u32 %v266_v1, 16  ;;  %1140 = vst.msk [vmem:[#allocation2 + $0x174] sm:$0xf] %vm1108_vm8, %v1075_v40  ;;  %v1992_v41 = vrot.slane %v6307_v52, 5  ;;  %1240 = vrot.lane.b32.xlu1 %v4178_v15, %s4808_s15  ;;  %v691_v55 = vpop.permute.xlu1 %690 }
 0x14b   : > { %v1611_v10 = vrot.slane %v1609_v62, 5  ;;  %v1615_v35 = vrot.slane %v1613_v2, 4  ;;  %2918 = vst.msk [vmem:[#allocation2 + $0x16c] sm:$0xf] %vm1302_vm9, %v2853_v50  ;;  %v4321_v26 = vld [vmem:[%s4847_s17 + $0x78] sm:$0xf]  ;;  %v1269_v27 = vpop.permute.xlu0 %1268 }
 0x14c   : > { %v1602_v32 = vrot.slane %v1600_v42, 4  ;;  %v1605_v7 = vrot.slane %v1603_v22, 5  ;;  %v507_v17 = vrot.slane %v505_v9, 4  ;;  %v4222_v21 = vld [vmem:[%s4847_s17 + $0x80] sm:$0x1]  ;;  %v510_v11 = vrot.slane %v508_v57, 5  ;;  %2264 = vrot.lane.b32.xlu0 %v4321_v26, %s4807_s4 }
 0x14d   : > { %v4270_v6 = vld [vmem:[%s4847_s17 + $0x80] sm:$0x1]  ;;  %v1616_v16 = vor.u32 %v1615_v35, %v1611_v10  ;;  %v1619_v8 = vshll.u32 %v4222_v21, 16  ;;  %v190_v29 = vld [vmem:[%s4847_s17 + $0x6c] sm:$0xf]  ;;  %v522_v63 = vrot.slane %v521_v51, 4 }
 0x14e   : > { %v1606_v39 = vor.u32 %v1605_v7, %v1602_v32  ;;  %v526_v23 = vrot.slane %v524_v49, 5  ;;  %223 = vst.msk [vmem:[#allocation2 + $0xd8] sm:$0xf] %vm204_vm6, %v190_v29  ;;  %v6325_v25 = vld [vmem:[%s4847_s17 + $0x70] sm:$0xf]  ;;  %v1994_v59 = vrot.slane %v1992_v41, 4  ;;  %2826 = vrot.lane.b32.xlu1 %v2623_v45, %s4808_s15  ;;  %v511_v56 = vor.u32 %v510_v11, %v507_v17  ;;  %v2058_v36 = vpop.permute.xlu1 %2057 }
 0x14f   : > { %2359 = vst.msk [vmem:[#allocation2 + $0x178] sm:$0xf] %vm1108_vm8, %v2295_v12  ;;  %v1617_v18 = vrot.slane %v1616_v16, 4  ;;  %v1621_v30 = vrot.slane %v1619_v8, 5  ;;  %v1995_v34 = vrot.slane %v4270_v6, 5  ;;  %v2608_v43 = vrot.slane %v2607_v44, 4  ;;  %v2855_v54 = vpop.permute.xlu0 %2854 }
 0x150   : > { %v1607_v4 = vrot.slane %v1606_v39, 4  ;;  %778 = vst.msk [vmem:[#allocation2 + $0x6c] sm:$0xf] %vm768_vm7, %v691_v55  ;;  %v4177_v13 = vld [vmem:[%s4847_s17 + $0x6c] sm:$0xf]  ;;  %v527_v31 = vsel %vm4868_vm5, %v522_v63, %v526_v23  ;;  %v965_v33 = vrot.slane %v6325_v25, 5 }
 0x151   : > { %v1622_v19 = vsel %vm4868_vm5, %v1617_v18, %v1621_v30  ;;  %1334 = vst.msk [vmem:[#allocation2 + $0x174] sm:$0xf] %vm1302_vm9, %v1269_v27  ;;  %v830_v37 = vld [vmem:[%s4847_s17 + $0x74] sm:$0x1]  ;;  %v4365_v24 = vld [vmem:[%s4847_s17 + $0x88] sm:$0xf]  ;;  %1238 = vrot.lane.b32.xlu0 %v4177_v13, %s4808_s15  ;;  %v2613_v5 = vsel %vm4868_vm5, %v2608_v43, %v6274_v61  ;;  %v1996_v47 = vsel %vm4840_vm4, %v1994_v59, %v1995_v34 }
 0x152   : > { %v1612_v14 = vsel %vm4868_vm5, %v1607_v4, %v1611_v10  ;;  %1818 = vst.msk [vmem:[#allocation2 + $0xe8] sm:$0xf] %vm204_vm6, %v1622_v19  ;;  %710 = vrot.lane.b32.xlu1 %v527_v31, %s4806_s18  ;;  %v512_v1 = vrot.slane %v511_v56, 4  ;;  %v4268_v48 = vld [vmem:[%s4847_s17 + $0x78] sm:$0xe]  ;;  %v967_v58 = vrot.slane %v965_v33, 4  ;;  %v1031_v38 = vpop.permute.xlu1 %1030 }
 0x153   : > { %1817 = vst.msk [vmem:[#allocation2 + $0xdc] sm:$0xf] %vm204_vm6, %v1612_v14  ;;  %v968_v60 = vrot.slane %v830_v37, 5  ;;  %v2634_v9 = vshll.u32 %v4365_v24, 16  ;;  %v2638_v57 = vshrl.u32 %v4365_v24, 16  ;;  %v4298_v61 = vrot.slane %v4268_v48, 9  ;;  %v2056_v15 = vpop.permute.xlu0 %2055 }
 0x154   : > { %2144 = vst.msk [vmem:[#allocation2 + $0x70] sm:$0xf] %vm768_vm7, %v2058_v36  ;;  %v268_v53 = vld [vmem:[%s4847_s17 + $0x7c] sm:$0xf]  ;;  %v4364_v62 = vld [vmem:[%s4847_s17 + $0x84] sm:$0xf]  ;;  %v517_v2 = vsel %vm4868_vm5, %v512_v1, %v6291_v20 }
 0x155   : > { %2919 = vst.msk [vmem:[#allocation2 + $0x178] sm:$0xf] %vm1302_vm9, %v2855_v54  ;;  %2824 = vrot.lane.b32.xlu0 %v2613_v5, %s4808_s15  ;;  %v828_v42 = vld [vmem:[%s4847_s17 + $0x6c] sm:$0xe]  ;;  %v538_v22 = vshll.u32 %v268_v53, 16  ;;  %v542_v40 = vshrl.u32 %v268_v53, 16  ;;  %v969_v46 = vsel %vm4840_vm4, %v967_v58, %v968_v60  ;;  %v1993_v20 = vsel %vm4840_vm4, %v4298_v61, %v1992_v41 }
 0x156   : > { %1118 = vst.msk [vmem:[#allocation2 + $0x6c] sm:$0xf] %vm1108_vm8, %v1031_v38  ;;  %2077 = vrot.lane.b32.xlu1 %v1996_v47, %s4806_s18  ;;  %v4366_v3 = vld [vmem:[%s4847_s17 + $0x8c] sm:$0x1]  ;;  %v6369_v51 = vrot.slane %v2634_v9, 5  ;;  %v2640_v49 = vrot.slane %v2638_v57, 4  ;;  %v2251_v10 = vpop.permute.xlu1 %2250 }
 0x157   : > { %v2625_v50 = vshrl.u32 %v4364_v62, 16  ;;  %2143 = vst.msk [vmem:[#allocation2 + $0x64] sm:$0xf] %vm768_vm7, %v2056_v15  ;;  %v269_v35 = vld [vmem:[%s4847_s17 + $0x80] sm:$0x1]  ;;  %v2628_v32 = vshll.u32 %v4364_v62, 16  ;;  %v1029_v16 = vpop.permute.xlu0 %1028 }
 0x158   : > { %2337 = vst.msk [vmem:[#allocation2 + $0x70] sm:$0xf] %vm1108_vm8, %v2251_v10  ;;  %v4324_v7 = vld [vmem:[%s4847_s17 + $0x88] sm:$0xf]  ;;  %v4154_v26 = vrot.slane %v828_v42, 9  ;;  %v2644_v21 = vshll.u32 %v4366_v3, 16  ;;  %v2641_v41 = vor.u32 %v2640_v49, %v6369_v51 }
 0x159   : > { %708 = vrot.lane.b32.xlu0 %v517_v2, %s4806_s18  ;;  %v267_v44 = vld [vmem:[%s4847_s17 + $0x78] sm:$0xf]  ;;  %v4765_v17 = vld [vmem:[#allocation2 + $0x8] ss:$12 sps:$4 sm:$0xff]   ;;  %v6382_v6 = vrot.slane %v538_v22, 5  ;;  %v544_v11 = vrot.slane %v542_v40, 4 }
 0x15a   : > { %1050 = vrot.lane.b32.xlu1 %v969_v46, %s4807_s4  ;;  %v3252_v8 = vld [vmem:[#allocation2 + $0x168] sm:$0xff]  ;;  %v548_v39 = vshll.u32 %v269_v35, 16  ;;  %v6385_v12 = vrot.slane %v2625_v50, 4  ;;  %1117 = vst.msk [vmem:[#allocation2 + $0x60] sm:$0xf] %vm1108_vm8, %v1029_v16  ;;  %v1225_v45 = vpop.permute.xlu1 %1224  ;;  %v2630_v23 = vrot.slane %v2628_v32, 5  ;;  %v966_v30 = vsel %vm4840_vm4, %v4154_v26, %v965_v33 }
 0x15b   : > { %v529_v55 = vshrl.u32 %v267_v44, 16  ;;  %v532_v18 = vshll.u32 %v267_v44, 16  ;;  %1312 = vst.msk [vmem:[#allocation2 + $0x6c] sm:$0xf] %vm1302_vm9, %v1225_v45  ;;  %v193_v4 = vld [vmem:[%s4847_s17 + $0x7c] sm:$0xf]  ;;  %v2249_v14 = vpop.permute.xlu0 %2248  ;;  %v545_v33 = vor.u32 %v544_v11, %v6382_v6 }
 0x15c   : > { %v3254_v29 = vld [vmem:[#allocation2 + $0x174] sm:$0xff]  ;;  %v4224_v59 = vld [vmem:[%s4847_s17 + $0x88] sm:$0xf]  ;;  %v4223_v34 = vld [vmem:[%s4847_s17 + $0x84] sm:$0xf]  ;;  %v2642_v25 = vrot.slane %v2641_v41, 4  ;;  %v2631_v58 = vor.u32 %v2630_v23, %v6385_v12 }
 0x15d   : > { %v4761_v52 = vld [vmem:[#allocation2 + $0x16c] ss:$12 sps:$4 sm:$0xff]   ;;  %v4495_v63 = vcombine.low %v3252_v8, %v3254_v29  ;;  %2075 = vrot.lane.b32.xlu0 %v1993_v20, %s4806_s18  ;;  %226 = vst.msk [vmem:[#allocation2 + $0xfc] sm:$0xf] %vm204_vm6, %v193_v4  ;;  %v1633_v13 = vshll.u32 %v4224_v59, 16  ;;  %v1637_v43 = vshrl.u32 %v4224_v59, 16 }
 0x15e   : > { %3848 = vmatprep.mubr.bf16.mxu1 %v4761_v52  ;;  %2270 = vrot.lane.b32.xlu1 %v4324_v7, %s4807_s4  ;;  %v1624_v56 = vshrl.u32 %v4223_v34, 16  ;;  %v1627_v19 = vshll.u32 %v4223_v34, 16  ;;  %v4180_v27 = vld [vmem:[%s4847_s17 + $0x7c] sm:$0xf]  ;;  %v2646_v31 = vrot.slane %v2644_v21, 5  ;;  %v2811_v36 = vpop.permute.xlu1 %2810  ;;  %v550_v54 = vrot.slane %v548_v39, 5 }
 0x15f   : > { %3849 = vmatmul.mubr.bf16.gmra.mxu1 %v4495_v63  ;;  %2336 = vst.msk [vmem:[#allocation2 + $0x64] sm:$0xf] %vm1108_vm8, %v2249_v14  ;;  %v6404_v37 = vld [vmem:[%s4847_s17 + $0x88] sm:$0xf]  ;;  %v1635_v24 = vrot.slane %v1633_v13, 5  ;;  %v1639_v5 = vrot.slane %v1637_v43, 4  ;;  %v1223_v42 = vpop.permute.xlu0 %1222 }
 0x160   : > { %4669 = vmatprep.mubr.msk.bf16.mxu1 %vm3647_vm10, %v4765_v17  ;;  %v1626_v47 = vrot.slane %v1624_v56, 4  ;;  %v1629_v1 = vrot.slane %v1627_v19, 5  ;;  %2897 = vst.msk [vmem:[#allocation2 + $0x70] sm:$0xf] %vm1302_vm9, %v2811_v36  ;;  %v4323_v48 = vld [vmem:[%s4847_s17 + $0x84] sm:$0xf]  ;;  %v2647_v22 = vsel %vm4868_vm5, %v2642_v25, %v2646_v31 }
 0x161   : > { %1048 = vrot.lane.b32.xlu0 %v966_v30, %s4807_s4  ;;  %v531_v60 = vrot.slane %v529_v55, 4  ;;  %v4225_v9 = vld [vmem:[%s4847_s17 + $0x8c] sm:$0x1]  ;;  %v534_v53 = vrot.slane %v532_v18, 5  ;;  %v1640_v38 = vor.u32 %v1639_v5, %v1635_v24  ;;  %v192_v61 = vld [vmem:[%s4847_s17 + $0x78] sm:$0xf] }
 0x162   : > { %1244 = vrot.lane.b32.xlu1 %v4180_v27, %s4808_s15  ;;  %v4766_v57 = vld [vmem:[#allocation2 + $0x20] ss:$12 sps:$4 sm:$0xff]   ;;  %v1643_v62 = vshll.u32 %v4225_v9, 16  ;;  %v1630_v2 = vor.u32 %v1629_v1, %v1626_v47  ;;  %v546_v40 = vrot.slane %v545_v33, 4  ;;  %v4767_v15 = vld [vmem:[#allocation2 + $0x38] ss:$12 sps:$4 sm:$0xff]   ;;  %v695_v49 = vpop.permute.xlu1 %694 }
 0x163   : > { %v4273_v46 = vld [vmem:[%s4847_s17 + $0x8c] sm:$0x1]  ;;  %v1999_v3 = vrot.slane %v6404_v37, 5  ;;  %225 = vst.msk [vmem:[#allocation2 + $0xf0] sm:$0xf] %vm204_vm6, %v192_v61  ;;  %v1641_v10 = vrot.slane %v1640_v38, 4  ;;  %v535_v26 = vor.u32 %v534_v53, %v531_v60  ;;  %v2809_v21 = vpop.permute.xlu0 %2808 }
 0x164   : > { %1311 = vst.msk [vmem:[#allocation2 + $0x60] sm:$0xf] %vm1302_vm9, %v1223_v42  ;;  %v6420_v50 = vld [vmem:[%s4847_s17 + $0x7c] sm:$0xf]  ;;  %v1645_v35 = vrot.slane %v1643_v62, 5  ;;  %v1631_v32 = vrot.slane %v1630_v2, 4  ;;  %v551_v11 = vsel %vm4868_vm5, %v546_v40, %v550_v54 }
 0x165   : > { %2268 = vrot.lane.b32.xlu0 %v4323_v48, %s4807_s4  ;;  %780 = vst.msk [vmem:[#allocation2 + $0x84] sm:$0xf] %vm768_vm7, %v695_v49  ;;  %v4179_v20 = vld [vmem:[%s4847_s17 + $0x78] sm:$0xf]  ;;  %v2632_v7 = vrot.slane %v2631_v58, 4  ;;  %v2001_v16 = vrot.slane %v1999_v3, 4 }
 0x166   : > { %2830 = vrot.lane.b32.xlu1 %v2647_v22, %s4808_s15  ;;  %v1646_v44 = vsel %vm4868_vm5, %v1641_v10, %v1645_v35  ;;  %v1636_v17 = vsel %vm4868_vm5, %v1631_v32, %v1635_v24  ;;  %v2002_v8 = vrot.slane %v4273_v46, 5  ;;  %v972_v29 = vrot.slane %v6420_v50, 5  ;;  %v4368_v52 = vld [vmem:[%s4847_s17 + $0x94] sm:$0xf]  ;;  %2896 = vst.msk [vmem:[#allocation2 + $0x64] sm:$0xf] %vm1302_vm9, %v2809_v21  ;;  %v2062_v41 = vpop.permute.xlu1 %2061 }
 0x167   : > { %4670 = vmatmul.mubr.msk.bf16.vlgmr.msra.gmra.mxu1 %vm3647_vm10, %v4766_v57  ;;  %1820 = vst.msk [vmem:[#allocation2 + $0x100] sm:$0xf] %vm204_vm6, %v1646_v44  ;;  %1819 = vst.msk [vmem:[#allocation2 + $0xf4] sm:$0xf] %vm204_vm6, %v1636_v17  ;;  %v833_v39 = vld [vmem:[%s4847_s17 + $0x80] sm:$0x1]  ;;  %v2637_v12 = vsel %vm4868_vm5, %v2632_v7, %v6369_v51  ;;  %v693_v18 = vpop.permute.xlu0 %692 }
 0x168   : > { %4673 = vmatprep.mubr.msk.bf16.mxu1 %vm3647_vm10, %v4767_v15  ;;  %2146 = vst.msk [vmem:[#allocation2 + $0x88] sm:$0xf] %vm768_vm7, %v2062_v41  ;;  %v4768_v45 = vld [vmem:[#allocation2 + $0x50] ss:$12 sps:$4 sm:$0xff]   ;;  %v536_v63 = vrot.slane %v535_v26, 4  ;;  %v2658_v23 = vshll.u32 %v4368_v52, 16  ;;  %v2003_v30 = vsel %vm4840_vm4, %v2001_v16, %v2002_v8 }
 0x169   : > { %1242 = vrot.lane.b32.xlu0 %v4179_v20, %s4808_s15  ;;  %v2662_v55 = vshrl.u32 %v4368_v52, 16  ;;  %v974_v4 = vrot.slane %v972_v29, 4  ;;  %v975_v59 = vrot.slane %v833_v39, 5  ;;  %v4271_v34 = vld [vmem:[%s4847_s17 + $0x84] sm:$0xe]  ;;  %v3210_v24 = vld [vmem:[#allocation2 + $0x6c] sm:$0xff] }
 0x16a   : > { %714 = vrot.lane.b32.xlu1 %v551_v11, %s4806_s18  ;;  %v4771_v13 = vld [vmem:[#allocation2 + $0x68] ss:$12 sps:$4 sm:$0xff]   ;;  %779 = vst.msk [vmem:[#allocation2 + $0x78] sm:$0xf] %vm768_vm7, %v693_v18  ;;  %v1035_v43 = vpop.permute.xlu1 %1034  ;;  %v4367_v56 = vld [vmem:[%s4847_s17 + $0x90] sm:$0xf]  ;;  %v541_v19 = vsel %vm4868_vm5, %v536_v63, %v6382_v6 }
 0x16b   : > { %v271_v51 = vld [vmem:[%s4847_s17 + $0x88] sm:$0xf]  ;;  %1120 = vst.msk [vmem:[#allocation2 + $0x84] sm:$0xf] %vm1108_vm8, %v1035_v43  ;;  %v4299_v14 = vrot.slane %v4271_v34, 9  ;;  %v6464_v25 = vrot.slane %v2658_v23, 5  ;;  %v2060_v33 = vpop.permute.xlu0 %2059  ;;  %v976_v47 = vsel %vm4840_vm4, %v974_v4, %v975_v59 }
 0x16c   : > { %v831_v27 = vld [vmem:[%s4847_s17 + $0x78] sm:$0xe]  ;;  %v2664_v31 = vrot.slane %v2662_v55, 4  ;;  %v562_v1 = vshll.u32 %v271_v51, 16  ;;  %v566_v48 = vshrl.u32 %v271_v51, 16  ;;  %v2649_v60 = vshrl.u32 %v4367_v56, 16 }
 0x16d   : > { %2828 = vrot.lane.b32.xlu0 %v2637_v12, %s4808_s15  ;;  %v3208_v36 = vld [vmem:[#allocation2 + $0x60] sm:$0xff]  ;;  %2145 = vst.msk [vmem:[#allocation2 + $0x7c] sm:$0xf] %vm768_vm7, %v2060_v33  ;;  %v4369_v58 = vld [vmem:[%s4847_s17 + $0x98] sm:$0x1]  ;;  %v2652_v9 = vshll.u32 %v4367_v56, 16  ;;  %v2000_v38 = vsel %vm4840_vm4, %v4299_v14, %v1999_v3 }
 0x16e   : > { %2081 = vrot.lane.b32.xlu1 %v2003_v30, %s4806_s18  ;;  %v4769_v5 = vld [vmem:[#allocation2 + $0x64] ss:$12 sps:$4 sm:$0xff]   ;;  %v2255_v6 = vpop.permute.xlu1 %2254  ;;  %v4462_v54 = vcombine.low %v3208_v36, %v3210_v24  ;;  %v4155_v57 = vrot.slane %v831_v27, 9  ;;  %v4772_v62 = vld [vmem:[#allocation2 + $0x80] ss:$12 sps:$4 sm:$0xff]   ;;  %v2665_v22 = vor.u32 %v2664_v31, %v6464_v25  ;;  %v2668_v40 = vshll.u32 %v4369_v58, 16 }
 0x16f   : > { %4674 = vmatmul.mubr.msk.bf16.gmra.mxu1 %vm3647_vm10, %v4768_v45  ;;  %3760 = vmatprep.mubr.bf16.mxu0 %v4769_v5  ;;  %2339 = vst.msk [vmem:[#allocation2 + $0x88] sm:$0xf] %vm1108_vm8, %v2255_v6  ;;  %v270_v53 = vld [vmem:[%s4847_s17 + $0x84] sm:$0xf]  ;;  %v4326_v61 = vld [vmem:[%s4847_s17 + $0x94] sm:$0xf]  ;;  %v1033_v2 = vpop.permute.xlu0 %1032 }
 0x170   : > { %4677 = vmatprep.mubr.msk.bf16.mxu1 %vm3647_vm10, %v4771_v13  ;;  %3761 = vmatmul.mubr.bf16.gmra.mxu0 %v4462_v54  ;;  %v4773_v42 = vld [vmem:[#allocation2 + $0x98] ss:$12 sps:$4 sm:$0xff]   ;;  %v6481_v15 = vrot.slane %v562_v1, 5  ;;  %v568_v46 = vrot.slane %v566_v48, 4  ;;  %1119 = vst.msk [vmem:[#allocation2 + $0x78] sm:$0xf] %vm1108_vm8, %v1033_v2  ;;  %v973_v20 = vsel %vm4840_vm4, %v4155_v57, %v972_v29 }
 0x171   : > { %712 = vrot.lane.b32.xlu0 %v541_v19, %s4806_s18  ;;  %v272_v49 = vld [vmem:[%s4847_s17 + $0x8c] sm:$0x1]  ;;  %v2651_v10 = vrot.slane %v2649_v60, 4  ;;  %v2654_v3 = vrot.slane %v2652_v9, 5  ;;  %v553_v35 = vshrl.u32 %v270_v53, 16  ;;  %v556_v32 = vshll.u32 %v270_v53, 16 }
 0x172   : > { %1054 = vrot.lane.b32.xlu1 %v976_v47, %s4807_s4  ;;  %v1229_v37 = vpop.permute.xlu1 %1228  ;;  %v195_v7 = vld [vmem:[%s4847_s17 + $0x88] sm:$0xf]  ;;  %v4227_v26 = vld [vmem:[%s4847_s17 + $0x94] sm:$0xf]  ;;  %v4226_v44 = vld [vmem:[%s4847_s17 + $0x90] sm:$0xf]  ;;  %v569_v39 = vor.u32 %v568_v46, %v6481_v15 }
 0x173   : > { %1314 = vst.msk [vmem:[#allocation2 + $0x84] sm:$0xf] %vm1302_vm9, %v1229_v37  ;;  %v6497_v17 = vld [vmem:[%s4847_s17 + $0x94] sm:$0xf]  ;;  %v1657_v21 = vshll.u32 %v4227_v26, 16  ;;  %v1661_v11 = vshrl.u32 %v4227_v26, 16  ;;  %v2253_v50 = vpop.permute.xlu0 %2252  ;;  %v2655_v59 = vor.u32 %v2654_v3, %v2651_v10 }
 0x174   : > { %228 = vst.msk [vmem:[#allocation2 + $0x114] sm:$0xf] %vm204_vm6, %v195_v7  ;;  %v1648_v16 = vshrl.u32 %v4226_v44, 16  ;;  %v1651_v8 = vshll.u32 %v4226_v44, 16  ;;  %v4182_v52 = vld [vmem:[%s4847_s17 + $0x88] sm:$0xf] }
 0x175   : > { %2079 = vrot.lane.b32.xlu0 %v2000_v38, %s4806_s18  ;;  %v2666_v29 = vrot.slane %v2665_v22, 4  ;;  %v2670_v41 = vrot.slane %v2668_v40, 5  ;;  %v572_v12 = vshll.u32 %v272_v49, 16  ;;  %2338 = vst.msk [vmem:[#allocation2 + $0x7c] sm:$0xf] %vm1108_vm8, %v2253_v50  ;;  %v1659_v23 = vrot.slane %v1657_v21, 5 }
 0x176   : > { %2274 = vrot.lane.b32.xlu1 %v4326_v61, %s4807_s4  ;;  %v2815_v45 = vpop.permute.xlu1 %2814  ;;  %v4325_v63 = vld [vmem:[%s4847_s17 + $0x90] sm:$0xf]  ;;  %v1663_v55 = vrot.slane %v1661_v11, 4  ;;  %v1650_v18 = vrot.slane %v1648_v16, 4  ;;  %v1653_v30 = vrot.slane %v1651_v8, 5  ;;  %v2006_v34 = vrot.slane %v6497_v17, 5 }
 0x177   : > { %4678 = vmatmul.mubr.msk.bf16.gmra.mxu1 %vm3647_vm10, %v4772_v62  ;;  %2899 = vst.msk [vmem:[#allocation2 + $0x88] sm:$0xf] %vm1302_vm9, %v2815_v45  ;;  %v4774_v4 = vld [vmem:[#allocation2 + $0xb0] ss:$12 sps:$4 sm:$0xff]   ;;  %v555_v13 = vrot.slane %v553_v35, 4  ;;  %v558_v56 = vrot.slane %v556_v32, 5  ;;  %v1227_v33 = vpop.permute.xlu0 %1226  ;;  %v2671_v36 = vsel %vm4868_vm5, %v2666_v29, %v2670_v41 }
 0x178   : > { %4681 = vmatprep.mubr.msk.bf16.mxu1 %vm3647_vm10, %v4773_v42  ;;  %v4228_v43 = vld [vmem:[%s4847_s17 + $0x98] sm:$0x1]  ;;  %v1664_v19 = vor.u32 %v1663_v55, %v1659_v23  ;;  %v194_v27 = vld [vmem:[%s4847_s17 + $0x84] sm:$0xf]  ;;  %v1654_v31 = vor.u32 %v1653_v30, %v1650_v18  ;;  %v570_v24 = vrot.slane %v569_v39, 4  ;;  %v574_v5 = vrot.slane %v572_v12, 5 }
 0x179   : > { %1052 = vrot.lane.b32.xlu0 %v973_v20, %s4807_s4  ;;  %v4276_v51 = vld [vmem:[%s4847_s17 + $0x98] sm:$0x1]  ;;  %v1667_v14 = vshll.u32 %v4228_v43, 16  ;;  %v4775_v47 = vld [vmem:[#allocation2 + $0xc8] ss:$12 sps:$4 sm:$0xff]   ;;  %v2656_v60 = vrot.slane %v2655_v59, 4  ;;  %v559_v38 = vor.u32 %v558_v56, %v555_v13 }
 0x17a   : > { %1248 = vrot.lane.b32.xlu1 %v4182_v52, %s4808_s15  ;;  %227 = vst.msk [vmem:[#allocation2 + $0x108] sm:$0xf] %vm204_vm6, %v194_v27  ;;  %v699_v1 = vpop.permute.xlu1 %698  ;;  %v6517_v48 = vld [vmem:[%s4847_s17 + $0x88] sm:$0xf]  ;;  %v1665_v6 = vrot.slane %v1664_v19, 4  ;;  %v1655_v58 = vrot.slane %v1654_v31, 4  ;;  %v575_v42 = vsel %vm4868_vm5, %v570_v24, %v574_v5 }
 0x17b   : > { %1313 = vst.msk [vmem:[#allocation2 + $0x78] sm:$0xf] %vm1302_vm9, %v1227_v33  ;;  %v1669_v54 = vrot.slane %v1667_v14, 5  ;;  %v2009_v9 = vrot.slane %v4276_v51, 5  ;;  %v4181_v57 = vld [vmem:[%s4847_s17 + $0x84] sm:$0xf]  ;;  %v2813_v2 = vpop.permute.xlu0 %2812  ;;  %v2661_v49 = vsel %vm4868_vm5, %v2656_v60, %v6464_v25 }
 0x17c   : > { %782 = vst.msk [vmem:[#allocation2 + $0x9c] sm:$0xf] %vm768_vm7, %v699_v1  ;;  %v2008_v53 = vrot.slane %v2006_v34, 4  ;;  %v1660_v61 = vsel %vm4868_vm5, %v1655_v58, %v1659_v23  ;;  %v979_v22 = vrot.slane %v6517_v48, 5  ;;  %v836_v46 = vld [vmem:[%s4847_s17 + $0x8c] sm:$0x1] }
 0x17d   : > { %2272 = vrot.lane.b32.xlu0 %v4325_v63, %s4807_s4  ;;  %v1670_v62 = vsel %vm4868_vm5, %v1665_v6, %v1669_v54  ;;  %1821 = vst.msk [vmem:[#allocation2 + $0x10c] sm:$0xf] %vm204_vm6, %v1660_v61  ;;  %v4371_v37 = vld [vmem:[%s4847_s17 + $0xa0] sm:$0xf]  ;;  %v560_v35 = vrot.slane %v559_v38, 4  ;;  %v982_v26 = vrot.slane %v836_v46, 5 }
 0x17e   : > { %2834 = vrot.lane.b32.xlu1 %v2671_v36, %s4808_s15  ;;  %1822 = vst.msk [vmem:[#allocation2 + $0x118] sm:$0xf] %vm204_vm6, %v1670_v62  ;;  %v2066_v40 = vpop.permute.xlu1 %2065  ;;  %v4776_v10 = vld [vmem:[#allocation2 + $0xe0] ss:$12 sps:$4 sm:$0xff]   ;;  %v2010_v3 = vsel %vm4840_vm4, %v2008_v53, %v2009_v9  ;;  %v4274_v32 = vld [vmem:[%s4847_s17 + $0x90] sm:$0xe] }
 0x17f   : > { %4682 = vmatmul.mubr.msk.bf16.gmra.mxu1 %vm3647_vm10, %v4774_v4  ;;  %2898 = vst.msk [vmem:[#allocation2 + $0x7c] sm:$0xf] %vm1302_vm9, %v2813_v2  ;;  %v697_v20 = vpop.permute.xlu0 %696  ;;  %v981_v7 = vrot.slane %v979_v22, 4  ;;  %v4779_v44 = vld [vmem:[#allocation2 + $0xf8] ss:$12 sps:$4 sm:$0xff]   ;;  %v2682_v21 = vshll.u32 %v4371_v37, 16  ;;  %v565_v25 = vsel %vm4868_vm5, %v560_v35, %v6481_v15 }
 0x180   : > { %4685 = vmatprep.mubr.msk.bf16.mxu1 %vm3647_vm10, %v4775_v47  ;;  %2148 = vst.msk [vmem:[#allocation2 + $0xa0] sm:$0xf] %vm768_vm7, %v2066_v40  ;;  %v2686_v11 = vshrl.u32 %v4371_v37, 16  ;;  %781 = vst.msk [vmem:[#allocation2 + $0x90] sm:$0xf] %vm768_vm7, %v697_v20  ;;  %v4300_v8 = vrot.slane %v4274_v32, 9 }
 0x181   : > { %1246 = vrot.lane.b32.xlu0 %v4181_v57, %s4808_s15  ;;  %v834_v50 = vld [vmem:[%s4847_s17 + $0x84] sm:$0xe]  ;;  %v4370_v52 = vld [vmem:[%s4847_s17 + $0x9c] sm:$0xf]  ;;  %v983_v45 = vsel %vm4840_vm4, %v981_v7, %v982_v26  ;;  %v6563_v63 = vrot.slane %v2682_v21, 5 }
 0x182   : > { %718 = vrot.lane.b32.xlu1 %v575_v42, %s4806_s18  ;;  %v1039_v16 = vpop.permute.xlu1 %1038  ;;  %v3214_v39 = vld [vmem:[#allocation2 + $0x84] sm:$0xff]  ;;  %v2688_v23 = vrot.slane %v2686_v11, 4  ;;  %v2007_v30 = vsel %vm4840_vm4, %v4300_v8, %v2006_v34  ;;  %v4780_v4 = vld [vmem:[#allocation2 + $0x110] ss:$12 sps:$4 sm:$0xff]   ;;  %v4156_v59 = vrot.slane %v834_v50, 9  ;;  %v2673_v13 = vshrl.u32 %v4370_v52, 16 }
 0x183   : > { %1122 = vst.msk [vmem:[#allocation2 + $0x9c] sm:$0xf] %vm1108_vm8, %v1039_v16  ;;  %v2064_v29 = vpop.permute.xlu0 %2063  ;;  %v4372_v18 = vld [vmem:[%s4847_s17 + $0xa4] sm:$0x1]  ;;  %v2676_v43 = vshll.u32 %v4370_v52, 16 }
 0x184   : > { %2147 = vst.msk [vmem:[#allocation2 + $0x94] sm:$0xf] %vm768_vm7, %v2064_v29  ;;  %v4328_v56 = vld [vmem:[%s4847_s17 + $0xa0] sm:$0xf]  ;;  %v4781_v19 = vld [vmem:[#allocation2 + $0x128] ss:$12 sps:$4 sm:$0xff]   ;;  %v2689_v14 = vor.u32 %v2688_v23, %v6563_v63  ;;  %v980_v17 = vsel %vm4840_vm4, %v4156_v59, %v979_v22 }
 0x185   : > { %2832 = vrot.lane.b32.xlu0 %v2661_v49, %s4808_s15  ;;  %v2692_v27 = vshll.u32 %v4372_v18, 16  ;;  %v2675_v34 = vrot.slane %v2673_v13, 4  ;;  %v2678_v33 = vrot.slane %v2676_v43, 5  ;;  %v4184_v24 = vld [vmem:[%s4847_s17 + $0x94] sm:$0xf] }
 0x186   : > { %2085 = vrot.lane.b32.xlu1 %v2010_v3, %s4806_s18  ;;  %v3212_v41 = vld [vmem:[#allocation2 + $0x78] sm:$0xff]  ;;  %v2259_v55 = vpop.permute.xlu1 %2258  ;;  %v2690_v5 = vrot.slane %v2689_v14, 4  ;;  %v4782_v48 = vld [vmem:[#allocation2 + $0x140] ss:$12 sps:$4 sm:$0xff]   ;;  %v4183_v57 = vld [vmem:[%s4847_s17 + $0x90] sm:$0xf] }
 0x187   : > { %4686 = vmatmul.mubr.msk.bf16.gmra.mxu1 %vm3647_vm10, %v4776_v10  ;;  %v4777_v12 = vld [vmem:[#allocation2 + $0x7c] ss:$12 sps:$4 sm:$0xff]   ;;  %v4465_v15 = vcombine.low %v3212_v41, %v3214_v39  ;;  %2341 = vst.msk [vmem:[#allocation2 + $0xa0] sm:$0xf] %vm1108_vm8, %v2259_v55  ;;  %v1037_v51 = vpop.permute.xlu0 %1036  ;;  %v2694_v47 = vrot.slane %v2692_v27, 5  ;;  %v2679_v6 = vor.u32 %v2678_v33, %v2675_v34 }
 0x188   : > { %4689 = vmatprep.mubr.msk.bf16.mxu1 %vm3647_vm10, %v4779_v44  ;;  %3768 = vmatprep.mubr.bf16.mxu0 %v4777_v12  ;;  %1121 = vst.msk [vmem:[#allocation2 + $0x90] sm:$0xf] %vm1108_vm8, %v1037_v51  ;;  %v4783_v60 = vld [vmem:[#allocation2 + $0x158] ss:$12 sps:$4 sm:$0xff]   ;;  %v4784_v42 = vld [vmem:[#allocation2 + $0x170] ss:$12 sps:$4 sm:$0xff]  }
 0x189   : > { %716 = vrot.lane.b32.xlu0 %v565_v25, %s4806_s18  ;;  %3769 = vmatmul.mubr.bf16.gmra.mxu0 %v4465_v15  ;;  %v2695_v58 = vsel %vm4868_vm5, %v2690_v5, %v2694_v47  ;;  %v2680_v53 = vrot.slane %v2679_v6, 4 }
 0x18a   : > { %1058 = vrot.lane.b32.xlu1 %v983_v45, %s4807_s4  ;;  %v1233_v31 = vpop.permute.xlu1 %1232 }
 0x18b   : > { %1316 = vst.msk [vmem:[#allocation2 + $0x9c] sm:$0xf] %vm1302_vm9, %v1233_v31  ;;  %v2257_v36 = vpop.permute.xlu0 %2256  ;;  %v2685_v2 = vsel %vm4868_vm5, %v2680_v53, %v6563_v63 }
 0x18c   : > { %2340 = vst.msk [vmem:[#allocation2 + $0x94] sm:$0xf] %vm1108_vm8, %v2257_v36 }
 0x18d   : > { %2083 = vrot.lane.b32.xlu0 %v2007_v30, %s4806_s18 }
 0x18e   : > { %2278 = vrot.lane.b32.xlu1 %v4328_v56, %s4807_s4  ;;  %v2819_v1 = vpop.permute.xlu1 %2818 }
 0x18f   : > { %4690 = vmatmul.mubr.msk.bf16.gmra.mxu1 %vm3647_vm10, %v4780_v4  ;;  %2901 = vst.msk [vmem:[#allocation2 + $0xa0] sm:$0xf] %vm1302_vm9, %v2819_v1  ;;  %v1231_v54 = vpop.permute.xlu0 %1230 }
 0x190   : > { %4693 = vmatprep.mubr.msk.bf16.mxu1 %vm3647_vm10, %v4781_v19  ;;  %1315 = vst.msk [vmem:[#allocation2 + $0x90] sm:$0xf] %vm1302_vm9, %v1231_v54 }
 0x191   : > { %1056 = vrot.lane.b32.xlu0 %v980_v17, %s4807_s4 }
 0x192   : > { %1252 = vrot.lane.b32.xlu1 %v4184_v24, %s4808_s15  ;;  %v703_v9 = vpop.permute.xlu1 %702 }
 0x193   : > { %784 = vst.msk [vmem:[#allocation2 + $0xb4] sm:$0xf] %vm768_vm7, %v703_v9  ;;  %v2817_v38 = vpop.permute.xlu0 %2816  ;;  %v4623_v61 = vpop.f32.mrf.mxu1 }
 0x194   : > { %2900 = vst.msk [vmem:[#allocation2 + $0x94] sm:$0xf] %vm1302_vm9, %v2817_v38 }
 0x195   : > { %2276 = vrot.lane.b32.xlu0 %v4327_v0, %s4807_s4  ;;  %v4624_v40 = vpop.f32.mrf.mxu1  ;;  %s4534_s4 = sshll.u32 %s6852_s13, 8 }
 0x196   : > { %2838 = vrot.lane.b32.xlu1 %v2695_v58, %s4808_s15  ;;  %v2070_v62 = vpop.permute.xlu1 %2069  ;;  %v6609_v37 = vadd.f32 %v4624_v40, %v4623_v61  ;;  %v3218_v35 = vld [vmem:[#allocation2 + $0x9c] sm:$0xff]  ;;  %s6698_s10 = scalar_lea.vmem %s6846_s3, %s4534_s4 }
 0x197   : > { %4694 = vmatmul.mubr.msk.bf16.gmra.mxu1 %vm3647_vm10, %v4782_v48  ;;  %2150 = vst.msk [vmem:[#allocation2 + $0xb8] sm:$0xf] %vm768_vm7, %v2070_v62  ;;  %v701_v22 = vpop.permute.xlu0 %700  ;;  %v4626_v49 = vpop.f32.mrf.mxu1 }
 0x198   : > { %4697 = vmatprep.mubr.msk.bf16.mxu1 %vm3647_vm10, %v4783_v60  ;;  %783 = vst.msk [vmem:[#allocation2 + $0xa8] sm:$0xf] %vm768_vm7, %v701_v22 }
 0x199   : > { %1250 = vrot.lane.b32.xlu0 %v4183_v57, %s4808_s15  ;;  %v4627_v32 = vpop.f32.mrf.mxu1 }
 0x19a   : > { %v1043_v46 = vpop.permute.xlu1 %1042  ;;  %v6614_v26 = vadd.f32 %v4627_v32, %v4626_v49  ;;  %v4551_v32 = vpop.f32.mrf.mxu0 }
 0x19b   : > { %1124 = vst.msk [vmem:[#allocation2 + $0xb4] sm:$0xf] %vm1108_vm8, %v1043_v46  ;;  %v2068_v10 = vpop.permute.xlu0 %2067  ;;  %v3216_v3 = vld [vmem:[#allocation2 + $0x90] sm:$0xff] }
 0x19c   : > { %v4785_v28 = vld [vmem:[#allocation2 + $0x94] ss:$12 sps:$4 sm:$0xff]   ;;  %2149 = vst.msk [vmem:[#allocation2 + $0xac] sm:$0xf] %vm768_vm7, %v2068_v10  ;;  %v4468_v7 = vcombine.low %v3216_v3, %v3218_v35 }
 0x19d   : > { %2836 = vrot.lane.b32.xlu0 %v2685_v2, %s4808_s15  ;;  %3776 = vmatprep.mubr.bf16.mxu0 %v4785_v28 }
 0x19e   : > { %v2263_v20 = vpop.permute.xlu1 %2262  ;;  %3777 = vmatmul.mubr.bf16.gmra.mxu0 %v4468_v7 }
 0x19f   : > { %4698 = vmatmul.mubr.msk.bf16.gmra.mxu1 %vm3647_vm10, %v4784_v42  ;;  %2343 = vst.msk [vmem:[#allocation2 + $0xb8] sm:$0xf] %vm1108_vm8, %v2263_v20  ;;  %v1041_v44 = vpop.permute.xlu0 %1040 }
 0x1a0   : > { %1123 = vst.msk [vmem:[#allocation2 + $0xa8] sm:$0xf] %vm1108_vm8, %v1041_v44 }
 0x1a2   : > { %v1237_v21 = vpop.permute.xlu1 %1236 }
 0x1a3   : > { %1318 = vst.msk [vmem:[#allocation2 + $0xb4] sm:$0xf] %vm1302_vm9, %v1237_v21  ;;  %v2261_v11 = vpop.permute.xlu0 %2260 }
 0x1a4   : > { %2342 = vst.msk [vmem:[#allocation2 + $0xac] sm:$0xf] %vm1108_vm8, %v2261_v11 }
 0x1a6   : > { %v2823_v16 = vpop.permute.xlu1 %2822 }
 0x1a7   : > { %2903 = vst.msk [vmem:[#allocation2 + $0xb8] sm:$0xf] %vm1302_vm9, %v2823_v16  ;;  %v4552_v16 = vpop.f32.mrf.mxu0 }
 0x1aa   : > { %v1235_v25 = vpop.permute.xlu0 %1234  ;;  %v707_v8 = vpop.permute.xlu1 %706 }
 0x1ab   : > { %1317 = vst.msk [vmem:[#allocation2 + $0xa8] sm:$0xf] %vm1302_vm9, %v1235_v25 }
 0x1ac   : > { %786 = vst.msk [vmem:[#allocation2 + $0xcc] sm:$0xf] %vm768_vm7, %v707_v8 }
 0x1ae   : > { %v2821_v50 = vpop.permute.xlu0 %2820  ;;  %v3222_v45 = vld [vmem:[#allocation2 + $0xb4] sm:$0xff] }
 0x1af   : > { %2902 = vst.msk [vmem:[#allocation2 + $0xac] sm:$0xf] %vm1302_vm9, %v2821_v50 }
 0x1b0   : > { %v2074_v52 = vpop.permute.xlu1 %2073 }
 0x1b1   : > { %2152 = vst.msk [vmem:[#allocation2 + $0xd0] sm:$0xf] %vm768_vm7, %v2074_v52 }
 0x1b2   : > { %v705_v29 = vpop.permute.xlu0 %704 }
 0x1b3   : > { %785 = vst.msk [vmem:[#allocation2 + $0xc0] sm:$0xf] %vm768_vm7, %v705_v29 }
 0x1b4   : > { %v1047_v41 = vpop.permute.xlu1 %1046 }
 0x1b5   : > { %1126 = vst.msk [vmem:[#allocation2 + $0xcc] sm:$0xf] %vm1108_vm8, %v1047_v41  ;;  %v4554_v41 = vpop.f32.mrf.mxu0 }
 0x1b6   : > { %v2072_v39 = vpop.permute.xlu0 %2071  ;;  %v3220_v12 = vld [vmem:[#allocation2 + $0xa8] sm:$0xff] }
 0x1b7   : > { %v4787_v63 = vld [vmem:[#allocation2 + $0xac] ss:$12 sps:$4 sm:$0xff]   ;;  %2151 = vst.msk [vmem:[#allocation2 + $0xc4] sm:$0xf] %vm768_vm7, %v2072_v39  ;;  %v4471_v55 = vcombine.low %v3220_v12, %v3222_v45 }
 0x1b8   : > { %v2267_v23 = vpop.permute.xlu1 %2266  ;;  %3784 = vmatprep.mubr.bf16.mxu0 %v4787_v63 }
 0x1b9   : > { %2345 = vst.msk [vmem:[#allocation2 + $0xd0] sm:$0xf] %vm1108_vm8, %v2267_v23  ;;  %3785 = vmatmul.mubr.bf16.gmra.mxu0 %v4471_v55  ;;  %v4555_v55 = vpop.f32.mrf.mxu0 }
 0x1ba   : > { %v1045_v15 = vpop.permute.xlu0 %1044 }
 0x1bb   : > { %1125 = vst.msk [vmem:[#allocation2 + $0xc0] sm:$0xf] %vm1108_vm8, %v1045_v15 }
 0x1bc   : > { %v1241_v18 = vpop.permute.xlu1 %1240 }
 0x1bd   : > { %1320 = vst.msk [vmem:[#allocation2 + $0xcc] sm:$0xf] %vm1302_vm9, %v1241_v18 }
 0x1be   : > { %v2265_v30 = vpop.permute.xlu0 %2264 }
 0x1bf   : > { %2344 = vst.msk [vmem:[#allocation2 + $0xc4] sm:$0xf] %vm1108_vm8, %v2265_v30  ;;  %v4557_v30 = vpop.f32.mrf.mxu0 }
 0x1c0   : > { %v2827_v4 = vpop.permute.xlu1 %2826  ;;  %v4629_v43 = vpop.f32.mrf.mxu1 }
 0x1c1   : > { %2905 = vst.msk [vmem:[#allocation2 + $0xd0] sm:$0xf] %vm1302_vm9, %v2827_v4 }
 0x1c2   : > { %v4630_v56 = vpop.f32.mrf.mxu1 }
 0x1c3   : > { %v1239_v59 = vpop.permute.xlu0 %1238  ;;  %v6636_v14 = vadd.f32 %v4630_v56, %v4629_v43 }
 0x1c4   : > { %1319 = vst.msk [vmem:[#allocation2 + $0xc0] sm:$0xf] %vm1302_vm9, %v1239_v59  ;;  %v711_v13 = vpop.permute.xlu1 %710  ;;  %v4632_v27 = vpop.f32.mrf.mxu1 }
 0x1c5   : > { %788 = vst.msk [vmem:[#allocation2 + $0xe4] sm:$0xf] %vm768_vm7, %v711_v13  ;;  %v4558_v13 = vpop.f32.mrf.mxu0 }
 0x1c6   : > { %v4633_v17 = vpop.f32.mrf.mxu1 }
 0x1c7   : > { %v2825_v51 = vpop.permute.xlu0 %2824  ;;  %v6640_v33 = vadd.f32 %v4633_v17, %v4632_v27  ;;  %v4560_v56 = vpop.f32.mrf.mxu0 }
 0x1c8   : > { %2904 = vst.msk [vmem:[#allocation2 + $0xc4] sm:$0xf] %vm1302_vm9, %v2825_v51  ;;  %v2078_v19 = vpop.permute.xlu1 %2077  ;;  %v3226_v5 = vld [vmem:[#allocation2 + $0xcc] sm:$0xff] }
 0x1c9   : > { %2154 = vst.msk [vmem:[#allocation2 + $0xe8] sm:$0xf] %vm768_vm7, %v2078_v19  ;;  %v4561_v27 = vpop.f32.mrf.mxu0 }
 0x1cb   : > { %v709_v31 = vpop.permute.xlu0 %708 }
 0x1cc   : > { %787 = vst.msk [vmem:[#allocation2 + $0xd8] sm:$0xf] %vm768_vm7, %v709_v31  ;;  %v1051_v34 = vpop.permute.xlu1 %1050 }
 0x1cd   : > { %1128 = vst.msk [vmem:[#allocation2 + $0xe4] sm:$0xf] %vm1108_vm8, %v1051_v34 }
 0x1cf   : > { %v2076_v36 = vpop.permute.xlu0 %2075  ;;  %v3224_v24 = vld [vmem:[#allocation2 + $0xc0] sm:$0xff] }
 0x1d0   : > { %v4789_v47 = vld [vmem:[#allocation2 + $0xc4] ss:$12 sps:$4 sm:$0xff]   ;;  %2153 = vst.msk [vmem:[#allocation2 + $0xdc] sm:$0xf] %vm768_vm7, %v2076_v36  ;;  %v2271_v1 = vpop.permute.xlu1 %2270  ;;  %v4474_v0 = vcombine.low %v3224_v24, %v3226_v5 }
 0x1d1   : > { %3792 = vmatprep.mubr.bf16.mxu0 %v4789_v47  ;;  %2347 = vst.msk [vmem:[#allocation2 + $0xe8] sm:$0xf] %vm1108_vm8, %v2271_v1 }
 0x1d2   : > { %3793 = vmatmul.mubr.bf16.gmra.mxu0 %v4474_v0 }
 0x1d3   : > { %v1049_v48 = vpop.permute.xlu0 %1048 }
 0x1d4   : > { %1127 = vst.msk [vmem:[#allocation2 + $0xd8] sm:$0xf] %vm1108_vm8, %v1049_v48  ;;  %v1245_v6 = vpop.permute.xlu1 %1244  ;;  %v4563_v17 = vpop.f32.mrf.mxu0 }
 0x1d5   : > { %1322 = vst.msk [vmem:[#allocation2 + $0xe4] sm:$0xf] %vm1302_vm9, %v1245_v6  ;;  %v4559_v6 = vadd.f32 %v4558_v13, %v4557_v30 }
 0x1d6   : > { %v4564_v34 = vpop.f32.mrf.mxu0 }
 0x1d7   : > { %v2269_v54 = vpop.permute.xlu0 %2268 }
 0x1d8   : > { %2346 = vst.msk [vmem:[#allocation2 + $0xdc] sm:$0xf] %vm1108_vm8, %v2269_v54  ;;  %v2831_v58 = vpop.permute.xlu1 %2830  ;;  %v4566_v5 = vpop.f32.mrf.mxu0 }
 0x1d9   : > { %2907 = vst.msk [vmem:[#allocation2 + $0xe8] sm:$0xf] %vm1302_vm9, %v2831_v58 }
 0x1da   : > { %v4567_v47 = vpop.f32.mrf.mxu0 }
 0x1db   : > { %v1243_v60 = vpop.permute.xlu0 %1242 }
 0x1dc   : > { %1321 = vst.msk [vmem:[#allocation2 + $0xd8] sm:$0xf] %vm1302_vm9, %v1243_v60  ;;  %v715_v9 = vpop.permute.xlu1 %714  ;;  %v4553_v60 = vadd.f32 %v4552_v16, %v4551_v32  ;;  %v4565_v32 = vadd.f32 %v4564_v34, %v4563_v17 }
 0x1dd   : > { %790 = vst.msk [vmem:[#allocation2 + $0xfc] sm:$0xf] %vm768_vm7, %v715_v9 }
 0x1df   : > { %v2829_v57 = vpop.permute.xlu0 %2828 }
 0x1e0   : > { %2906 = vst.msk [vmem:[#allocation2 + $0xdc] sm:$0xf] %vm1302_vm9, %v2829_v57  ;;  %v2082_v53 = vpop.permute.xlu1 %2081  ;;  %v3230_v42 = vld [vmem:[#allocation2 + $0xe4] sm:$0xff]  ;;  %v6690_v57 = vld [vmem:[%s6845_s2] ss:$0 sm:$0xff] }
 0x1e1   : > { %2156 = vst.msk [vmem:[#allocation2 + $0x100] sm:$0xf] %vm768_vm7, %v2082_v53  ;;  %v4562_v53 = vadd.f32 %v4561_v27, %v4560_v56 }
 0x1e3   : > { %v713_v38 = vpop.permute.xlu0 %712 }
 0x1e4   : > { %789 = vst.msk [vmem:[#allocation2 + $0xf0] sm:$0xf] %vm768_vm7, %v713_v38  ;;  %v1055_v62 = vpop.permute.xlu1 %1054  ;;  %v3739_v38 = vadd.f32 %v4559_v6, %v6690_v57 }
 0x1e5   : > { %1130 = vst.msk [vmem:[#allocation2 + $0xfc] sm:$0xf] %vm1108_vm8, %v1055_v62 }
 0x1e7   : > { %v2080_v61 = vpop.permute.xlu0 %2079  ;;  %v3228_v2 = vld [vmem:[#allocation2 + $0xd8] sm:$0xff] }
 0x1e8   : > { %v4791_v22 = vld [vmem:[#allocation2 + $0xdc] ss:$12 sps:$4 sm:$0xff]   ;;  %2155 = vst.msk [vmem:[#allocation2 + $0xf4] sm:$0xf] %vm768_vm7, %v2080_v61  ;;  %v2275_v40 = vpop.permute.xlu1 %2274  ;;  %v4477_v46 = vcombine.low %v3228_v2, %v3230_v42  ;;  %v4556_v2 = vadd.f32 %v4555_v55, %v4554_v41  ;;  %v4568_v41 = vadd.f32 %v4567_v47, %v4566_v5 }
 0x1e9   : > { %3800 = vmatprep.mubr.bf16.mxu0 %v4791_v22  ;;  %2349 = vst.msk [vmem:[#allocation2 + $0x100] sm:$0xf] %vm1108_vm8, %v2275_v40  ;;  %v3731_v22 = vadd.f32 %v4553_v60, %v6690_v57 }
 0x1ea   : > { %3801 = vmatmul.mubr.bf16.gmra.mxu0 %v4477_v46  ;;  %v3750_v13 = vadd.f32 %v4568_v41, %v6690_v57 }
 0x1eb   : > { %v1053_v49 = vpop.permute.xlu0 %1052 }
 0x1ec   : > { %1129 = vst.msk [vmem:[#allocation2 + $0xf0] sm:$0xf] %vm1108_vm8, %v1053_v49  ;;  %v1249_v10 = vpop.permute.xlu1 %1248 }
 0x1ed   : > { %1324 = vst.msk [vmem:[#allocation2 + $0xfc] sm:$0xf] %vm1302_vm9, %v1249_v10 }
 0x1ef   : > { %v2273_v3 = vpop.permute.xlu0 %2272 }
 0x1f0   : > { %2348 = vst.msk [vmem:[#allocation2 + $0xf4] sm:$0xf] %vm1108_vm8, %v2273_v3  ;;  %v2835_v35 = vpop.permute.xlu1 %2834  ;;  %v3742_v3 = vadd.f32 %v4562_v53, %v6690_v57 }
 0x1f1   : > { %2909 = vst.msk [vmem:[#allocation2 + $0x100] sm:$0xf] %vm1302_vm9, %v2835_v35 }
 0x1f3   : > { %v4635_v28 = vpop.f32.mrf.mxu1  ;;  %v1247_v20 = vpop.permute.xlu0 %1246 }
 0x1f4   : > { %1323 = vst.msk [vmem:[#allocation2 + $0xf0] sm:$0xf] %vm1302_vm9, %v1247_v20  ;;  %v719_v44 = vpop.permute.xlu1 %718 }
 0x1f5   : > { %v4636_v7 = vpop.f32.mrf.mxu1  ;;  %792 = vst.msk [vmem:[#allocation2 + $0x114] sm:$0xf] %vm768_vm7, %v719_v44  ;;  %v3734_v44 = vadd.f32 %v4556_v2, %v6690_v57 }
 0x1f6   : > { %v6662_v21 = vadd.f32 %v4636_v7, %v4635_v28 }
 0x1f7   : > { %v4638_v11 = vpop.f32.mrf.mxu1  ;;  %v2833_v25 = vpop.permute.xlu0 %2832 }
 0x1f8   : > { %2908 = vst.msk [vmem:[#allocation2 + $0xf4] sm:$0xf] %vm1302_vm9, %v2833_v25  ;;  %v2086_v50 = vpop.permute.xlu1 %2085  ;;  %v3234_v63 = vld [vmem:[#allocation2 + $0xfc] sm:$0xff] }
 0x1f9   : > { %v4639_v8 = vpop.f32.mrf.mxu1  ;;  %2158 = vst.msk [vmem:[#allocation2 + $0x118] sm:$0xf] %vm768_vm7, %v2086_v50 }
 0x1fa   : > { %v6666_v52 = vadd.f32 %v4639_v8, %v4638_v11 }
 0x1fb   : > { %v717_v29 = vpop.permute.xlu0 %716 }
 0x1fc   : > { %791 = vst.msk [vmem:[#allocation2 + $0x108] sm:$0xf] %vm768_vm7, %v717_v29  ;;  %v1059_v39 = vpop.permute.xlu1 %1058 }
 0x1fd   : > { %1132 = vst.msk [vmem:[#allocation2 + $0x114] sm:$0xf] %vm1108_vm8, %v1059_v39 }
 0x1ff   : > { %v2084_v12 = vpop.permute.xlu0 %2083  ;;  %v3232_v45 = vld [vmem:[#allocation2 + $0xf0] sm:$0xff] }
 0x200   : > { %v4793_v23 = vld [vmem:[#allocation2 + $0xf4] ss:$12 sps:$4 sm:$0xff]   ;;  %2157 = vst.msk [vmem:[#allocation2 + $0x10c] sm:$0xf] %vm768_vm7, %v2084_v12  ;;  %v2279_v15 = vpop.permute.xlu1 %2278  ;;  %v4480_v18 = vcombine.low %v3232_v45, %v3234_v63  ;;  %v3747_v45 = vadd.f32 %v4565_v32, %v6690_v57 }
 0x201   : > { %3808 = vmatprep.mubr.bf16.mxu0 %v4793_v23  ;;  %2351 = vst.msk [vmem:[#allocation2 + $0x118] sm:$0xf] %vm1108_vm8, %v2279_v15 }
 0x202   : > { %3809 = vmatmul.mubr.bf16.gmra.mxu0 %v4480_v18 }
 0x203   : > { %v1057_v4 = vpop.permute.xlu0 %1056 }
 0x204   : > { %1131 = vst.msk [vmem:[#allocation2 + $0x108] sm:$0xf] %vm1108_vm8, %v1057_v4  ;;  %v1253_v59 = vpop.permute.xlu1 %1252 }
 0x205   : > { %1326 = vst.msk [vmem:[#allocation2 + $0x114] sm:$0xf] %vm1302_vm9, %v1253_v59 }
 0x207   : > { %v2277_v43 = vpop.permute.xlu0 %2276 }
 0x208   : > { %2350 = vst.msk [vmem:[#allocation2 + $0x10c] sm:$0xf] %vm1108_vm8, %v2277_v43  ;;  %v2839_v51 = vpop.permute.xlu1 %2838 }
 0x209   : > { %2911 = vst.msk [vmem:[#allocation2 + $0x118] sm:$0xf] %vm1302_vm9, %v2839_v51 }
 0x20a   : > { %v4569_v1 = vpop.f32.mrf.mxu0 }
 0x20b   : > { %v1251_v19 = vpop.permute.xlu0 %1250 }
 0x20c   : > { %1325 = vst.msk [vmem:[#allocation2 + $0x108] sm:$0xf] %vm1302_vm9, %v1251_v19  ;;  %v4570_v54 = vpop.f32.mrf.mxu0 }
 0x20d   : > { %v4571_v46 = vadd.f32 %v4570_v54, %v4569_v1 }
 0x20e   : > { %v4572_v62 = vpop.f32.mrf.mxu0 }
 0x20f   : > { %v2837_v31 = vpop.permute.xlu0 %2836  ;;  %v3755_v50 = vadd.f32 %v4571_v46, %v6690_v57 }
 0x210   : > { %2910 = vst.msk [vmem:[#allocation2 + $0x10c] sm:$0xf] %vm1302_vm9, %v2837_v31  ;;  %v4573_v35 = vpop.f32.mrf.mxu0 }
 0x211   : > { %v4574_v16 = vadd.f32 %v4573_v35, %v4572_v62 }
 0x213   : > { %v4797_v24 = vld [vmem:[#allocation2 + $0x108] ss:$12 sps:$4 sm:$0xff]   ;;  %v3758_v15 = vadd.f32 %v4574_v16, %v6690_v57 }
 0x217   : > { %v4795_v36 = vld [vmem:[#allocation2 + $0x10c] ss:$12 sps:$4 sm:$0xff]  }
 0x218   : > { %3816 = vmatprep.mubr.bf16.mxu0 %v4795_v36 }
 0x219   : > { %3817 = vmatmul.mubr.bf16.gmra.mxu0 %v4797_v24 }
 0x21f   : > { %v6679_v0 = vpop.f32.mrf.mxu1 }
 0x221   : > { %v6681_v48 = vpop.f32.mrf.mxu1 }
 0x223   : > { %v6683_v58 = vpop.f32.mrf.mxu1 }
 0x225   : > { %v6685_v9 = vpop.f32.mrf.mxu1 }
 0x227   : > { %v4671_v61 = vpop.f32.mrf.mxu1 }
 0x228   : > { %v3900_v42 = vadd.f32 %v4671_v61, %v3739_v38 }
 0x229   : > { %v3891_v40 = vpop.f32.mrf.mxu1 }
 0x22a   : > { %v4020_v49 = vmax.f32 %v3900_v42, 0.0  ;;  %v3892_v10 = vadd.f32 %v3891_v40, %v3731_v22 }
 0x22b   : > { %v4672_v28 = vpop.f32.mrf.mxu1 }
 0x22c   : > { %4052 = vst.msk [vmem:[%s6698_s10 + $0x10] sm:$0xff] %vm3647_vm10, %v4020_v49  ;;  %v4018_v20 = vmax.f32 %v3892_v10, 0.0  ;;  %v3903_v7 = vadd.f32 %v4672_v28, %v3742_v3 }
 0x22d   : > { %v3894_v11 = vpop.f32.mrf.mxu1 }
 0x22e   : > { %4050 = vst.msk [vmem:[%s6698_s10] sm:$0xff] %vm3647_vm10, %v4018_v20  ;;  %v4021_v25 = vmax.f32 %v3903_v7, 0.0  ;;  %v3895_v8 = vadd.f32 %v3894_v11, %v3734_v44 }
 0x22f   : > { %v4675_v29 = vpop.f32.mrf.mxu1 }
 0x230   : > { %4053 = vst.msk [vmem:[%s6698_s10 + $0x18] sm:$0xff] %vm3647_vm10, %v4021_v25  ;;  %v4019_v39 = vmax.f32 %v3895_v8, 0.0  ;;  %v3916_v12 = vadd.f32 %v4675_v29, %v3755_v50  ;;  %v4575_v18 = vpop.f32.mrf.mxu0 }
 0x231   : > { %v3907_v63 = vpop.f32.mrf.mxu1 }
 0x232   : > { %4051 = vst.msk [vmem:[%s6698_s10 + $0x8] sm:$0xff] %vm3647_vm10, %v4019_v39  ;;  %v4024_v23 = vmax.f32 %v3916_v12, 0.0  ;;  %v3908_v55 = vadd.f32 %v3907_v63, %v3747_v45  ;;  %v4576_v43 = vpop.f32.mrf.mxu0  ;;  %v3835_v12 = vadd.f32 %v6636_v14, %v6690_v57 }
 0x233   : > { %v4676_v30 = vpop.f32.mrf.mxu1  ;;  %v4577_v19 = vadd.f32 %v4576_v43, %v4575_v18  ;;  %v4643_v18 = vadd.f32 %v6681_v48, %v6679_v0  ;;  %v4646_v0 = vadd.f32 %v6685_v9, %v6683_v58 }
 0x234   : > { %4056 = vst.msk [vmem:[%s6698_s10 + $0x30] sm:$0xff] %vm3647_vm10, %v4024_v23  ;;  %v4022_v4 = vmax.f32 %v3908_v55, 0.0  ;;  %v3919_v59 = vadd.f32 %v4676_v30, %v3758_v15  ;;  %v4578_v31 = vpop.f32.mrf.mxu0  ;;  %v3827_v55 = vadd.f32 %v6609_v37, %v6690_v57  ;;  %v3830_v37 = vadd.f32 %v6614_v26, %v6690_v57 }
 0x235   : > { %v3910_v51 = vpop.f32.mrf.mxu1  ;;  %v3763_v36 = vadd.f32 %v4577_v19, %v6690_v57  ;;  %v3843_v26 = vadd.f32 %v6662_v21, %v6690_v57 }
 0x236   : > { %4054 = vst.msk [vmem:[%s6698_s10 + $0x20] sm:$0xff] %vm3647_vm10, %v4022_v4  ;;  %v4025_v56 = vmax.f32 %v3919_v59, 0.0  ;;  %v3911_v27 = vadd.f32 %v3910_v51, %v3750_v13  ;;  %v4579_v24 = vpop.f32.mrf.mxu0  ;;  %v3838_v59 = vadd.f32 %v6640_v33, %v6690_v57  ;;  %v3851_v33 = vadd.f32 %v4643_v18, %v6690_v57 }
 0x237   : > { %v4679_v17 = vpop.f32.mrf.mxu1  ;;  %v4580_v47 = vadd.f32 %v4579_v24, %v4578_v31 }
 0x238   : > { %4057 = vst.msk [vmem:[%s6698_s10 + $0x38] sm:$0xff] %vm3647_vm10, %v4025_v56  ;;  %v4023_v34 = vmax.f32 %v3911_v27, 0.0 }
 0x239   : > { %v3923_v5 = vpop.f32.mrf.mxu1  ;;  %v3766_v60 = vadd.f32 %v4580_v47, %v6690_v57 }
 0x23a   : > { %4055 = vst.msk [vmem:[%s6698_s10 + $0x28] sm:$0xff] %vm3647_vm10, %v4023_v34  ;;  %v3924_v1 = vadd.f32 %v3923_v5, %v3763_v36  ;;  %v3854_v34 = vadd.f32 %v4646_v0, %v6690_v57 }
 0x23b   : > { %v4680_v6 = vpop.f32.mrf.mxu1 }
 0x23c   : > { %v4026_v54 = vmax.f32 %v3924_v1, 0.0  ;;  %v3846_v1 = vadd.f32 %v6666_v52, %v6690_v57 }
 0x23d   : > { %v3926_v53 = vpop.f32.mrf.mxu1 }
 0x23e   : > { %4058 = vst.msk [vmem:[%s6698_s10 + $0x40] sm:$0xff] %vm3647_vm10, %v4026_v54  ;;  %v3927_v38 = vadd.f32 %v3926_v53, %v3766_v60 }
 0x23f   : > { %v6726_v62 = vpop.f32.mrf.mxu1 }
 0x240   : > { %v4027_v61 = vmax.f32 %v3927_v38, 0.0 }
 0x241   : > { %v6728_v2 = vpop.f32.mrf.mxu1 }
 0x242   : > { %4059 = vst.msk [vmem:[%s6698_s10 + $0x48] sm:$0xff] %vm3647_vm10, %v4027_v61 }
 0x243   : > { %v6732_v42 = vpop.f32.mrf.mxu1 }
 0x245   : > { %v6734_v22 = vpop.f32.mrf.mxu1 }
 0x247   : > { %v6736_v40 = vpop.f32.mrf.mxu1 }
 0x249   : > { %v6738_v46 = vpop.f32.mrf.mxu1  ;;  %v4581_v49 = vpop.f32.mrf.mxu0 }
 0x24b   : > { %v6740_v10 = vpop.f32.mrf.mxu1  ;;  %v4582_v3 = vpop.f32.mrf.mxu0 }
 0x24c   : > { %v4583_v28 = vadd.f32 %v4582_v3, %v4581_v49 }
 0x24d   : > { %v6742_v35 = vpop.f32.mrf.mxu1  ;;  %v4584_v32 = vpop.f32.mrf.mxu0 }
 0x24e   : > { %v3771_v7 = vadd.f32 %v4583_v28, %v6690_v57 }
 0x24f   : > { %v6744_v20 = vpop.f32.mrf.mxu1  ;;  %v4585_v44 = vpop.f32.mrf.mxu0 }
 0x250   : > { %v3932_v16 = vadd.f32 %v4679_v17, %v3771_v7  ;;  %v4586_v25 = vadd.f32 %v4585_v44, %v4584_v32 }
 0x251   : > { %v6747_v11 = vpop.f32.mrf.mxu1 }
 0x252   : > { %v4028_v50 = vmax.f32 %v3932_v16, 0.0  ;;  %v3774_v29 = vadd.f32 %v4586_v25, %v6690_v57 }
 0x253   : > { %v6749_v8 = vpop.f32.mrf.mxu1 }
 0x254   : > { %4060 = vst.msk [vmem:[%s6698_s10 + $0x50] sm:$0xff] %vm3647_vm10, %v4028_v50  ;;  %v3935_v39 = vadd.f32 %v4680_v6, %v3774_v29 }
 0x255   : > { %v6752_v41 = vpop.f32.mrf.mxu1 }
 0x256   : > { %v4029_v63 = vmax.f32 %v3935_v39, 0.0 }
 0x257   : > { %v4695_v45 = vpop.f32.mrf.mxu1 }
 0x258   : > { %v3996_v23 = vadd.f32 %v4695_v45, %v3835_v12  ;;  %4061 = vst.msk [vmem:[%s6698_s10 + $0x58] sm:$0xff] %vm3647_vm10, %v4029_v63 }
 0x259   : > { %v3987_v15 = vpop.f32.mrf.mxu1 }
 0x25a   : > { %v4044_v30 = vmax.f32 %v3996_v23, 0.0  ;;  %v3988_v4 = vadd.f32 %v3987_v15, %v3827_v55 }
 0x25b   : > { %v4696_v14 = vpop.f32.mrf.mxu1 }
 0x25c   : > { %4076 = vst.msk [vmem:[%s6698_s10 + $0xd0] sm:$0xff] %vm3647_vm10, %v4044_v30  ;;  %v4042_v13 = vmax.f32 %v3988_v4, 0.0  ;;  %v3999_v43 = vadd.f32 %v4696_v14, %v3838_v59 }
 0x25d   : > { %v3990_v51 = vpop.f32.mrf.mxu1 }
 0x25e   : > { %4074 = vst.msk [vmem:[%s6698_s10 + $0xc0] sm:$0xff] %vm3647_vm10, %v4042_v13  ;;  %v4045_v48 = vmax.f32 %v3999_v43, 0.0  ;;  %v3991_v56 = vadd.f32 %v3990_v51, %v3830_v37  ;;  %v4587_v36 = vpop.f32.mrf.mxu0 }
 0x25f   : > { %v4699_v19 = vpop.f32.mrf.mxu1 }
 0x260   : > { %4077 = vst.msk [vmem:[%s6698_s10 + $0xd8] sm:$0xff] %vm3647_vm10, %v4045_v48  ;;  %v4043_v27 = vmax.f32 %v3991_v56, 0.0  ;;  %v4012_v31 = vadd.f32 %v4699_v19, %v3851_v33  ;;  %v4588_v6 = vpop.f32.mrf.mxu0 }
 0x261   : > { %v4003_v17 = vpop.f32.mrf.mxu1  ;;  %v4589_v60 = vadd.f32 %v4588_v6, %v4587_v36 }
 0x262   : > { %4075 = vst.msk [vmem:[%s6698_s10 + $0xc8] sm:$0xff] %vm3647_vm10, %v4043_v27  ;;  %v4048_v58 = vmax.f32 %v4012_v31, 0.0  ;;  %v4004_v9 = vadd.f32 %v4003_v17, %v3843_v26  ;;  %v4590_v38 = vpop.f32.mrf.mxu0 }
 0x263   : > { %v4700_v24 = vpop.f32.mrf.mxu1  ;;  %v3779_v61 = vadd.f32 %v4589_v60, %v6690_v57 }
 0x264   : > { %4080 = vst.msk [vmem:[%s6698_s10 + $0xf0] sm:$0xff] %vm3647_vm10, %v4048_v58  ;;  %v4046_v5 = vmax.f32 %v4004_v9, 0.0  ;;  %v4015_v47 = vadd.f32 %v4700_v24, %v3854_v34  ;;  %v4591_v3 = vpop.f32.mrf.mxu0 }
 0x265   : > { %v4006_v21 = vpop.f32.mrf.mxu1  ;;  %v3940_v28 = vadd.f32 %v6728_v2, %v3779_v61  ;;  %v4592_v52 = vadd.f32 %v4591_v3, %v4590_v38 }
 0x266   : > { %4078 = vst.msk [vmem:[%s6698_s10 + $0xe0] sm:$0xff] %vm3647_vm10, %v4046_v5  ;;  %v4049_v54 = vmax.f32 %v4015_v47, 0.0  ;;  %v4007_v53 = vadd.f32 %v4006_v21, %v3846_v1 }
 0x267   : > { %v4030_v32 = vmax.f32 %v3940_v28, 0.0  ;;  %v3782_v7 = vadd.f32 %v4592_v52, %v6690_v57 }
 0x268   : > { %4081 = vst.msk [vmem:[%s6698_s10 + $0xf8] sm:$0xff] %vm3647_vm10, %v4049_v54  ;;  %v4047_v49 = vmax.f32 %v4007_v53, 0.0 }
 0x269   : > { %4062 = vst.msk [vmem:[%s6698_s10 + $0x60] sm:$0xff] %vm3647_vm10, %v4030_v32  ;;  %v3943_v44 = vadd.f32 %v6734_v22, %v3782_v7 }
 0x26a   : > { %4079 = vst.msk [vmem:[%s6698_s10 + $0xe8] sm:$0xff] %vm3647_vm10, %v4047_v49 }
 0x26b   : > { %v4031_v16 = vmax.f32 %v3943_v44, 0.0 }
 0x26d   : > { %4063 = vst.msk [vmem:[%s6698_s10 + $0x68] sm:$0xff] %vm3647_vm10, %v4031_v16 }
 0x279   : > { %v4593_v25 = vpop.f32.mrf.mxu0 }
 0x27b   : > { %v4594_v50 = vpop.f32.mrf.mxu0 }
 0x27c   : > { %v4595_v29 = vadd.f32 %v4594_v50, %v4593_v25 }
 0x27d   : > { %v4596_v39 = vpop.f32.mrf.mxu0 }
 0x27e   : > { %v3787_v2 = vadd.f32 %v4595_v29, %v6690_v57 }
 0x27f   : > { %v4597_v12 = vpop.f32.mrf.mxu0 }
 0x280   : > { %v3948_v45 = vadd.f32 %v6726_v62, %v3787_v2  ;;  %v4598_v63 = vadd.f32 %v4597_v12, %v4596_v39 }
 0x282   : > { %v4032_v23 = vmax.f32 %v3948_v45, 0.0  ;;  %v3790_v55 = vadd.f32 %v4598_v63, %v6690_v57 }
 0x284   : > { %4064 = vst.msk [vmem:[%s6698_s10 + $0x70] sm:$0xff] %vm3647_vm10, %v4032_v23  ;;  %v3951_v22 = vadd.f32 %v6732_v42, %v3790_v55 }
 0x286   : > { %v4033_v15 = vmax.f32 %v3951_v22, 0.0 }
 0x288   : > { %4065 = vst.msk [vmem:[%s6698_s10 + $0x78] sm:$0xff] %vm3647_vm10, %v4033_v15 }
 0x292   : > { %v4599_v18 = vpop.f32.mrf.mxu0 }
 0x294   : > { %v4600_v30 = vpop.f32.mrf.mxu0 }
 0x295   : > { %v4601_v4 = vadd.f32 %v4600_v30, %v4599_v18 }
 0x296   : > { %v4602_v59 = vpop.f32.mrf.mxu0 }
 0x297   : > { %v3795_v14 = vadd.f32 %v4601_v4, %v6690_v57 }
 0x298   : > { %v4603_v62 = vpop.f32.mrf.mxu0 }
 0x299   : > { %v3956_v13 = vadd.f32 %v6738_v46, %v3795_v14  ;;  %v4604_v43 = vadd.f32 %v4603_v62, %v4602_v59 }
 0x29b   : > { %v4034_v37 = vmax.f32 %v3956_v13, 0.0  ;;  %v3798_v51 = vadd.f32 %v4604_v43, %v6690_v57 }
 0x29d   : > { %4066 = vst.msk [vmem:[%s6698_s10 + $0x80] sm:$0xff] %vm3647_vm10, %v4034_v37  ;;  %v3959_v42 = vadd.f32 %v6742_v35, %v3798_v51 }
 0x29f   : > { %v4035_v0 = vmax.f32 %v3959_v42, 0.0 }
 0x2a1   : > { %4067 = vst.msk [vmem:[%s6698_s10 + $0x88] sm:$0xff] %vm3647_vm10, %v4035_v0 }
 0x2aa   : > { %v4605_v48 = vpop.f32.mrf.mxu0 }
 0x2ac   : > { %v4606_v56 = vpop.f32.mrf.mxu0 }
 0x2ad   : > { %v4607_v33 = vadd.f32 %v4606_v56, %v4605_v48 }
 0x2ae   : > { %v4608_v19 = vpop.f32.mrf.mxu0 }
 0x2af   : > { %v3803_v27 = vadd.f32 %v4607_v33, %v6690_v57 }
 0x2b0   : > { %v4609_v46 = vpop.f32.mrf.mxu0 }
 0x2b1   : > { %v3964_v31 = vadd.f32 %v6736_v40, %v3803_v27  ;;  %v4610_v26 = vadd.f32 %v4609_v46, %v4608_v19 }
 0x2b3   : > { %v4036_v17 = vmax.f32 %v3964_v31, 0.0  ;;  %v3806_v58 = vadd.f32 %v4610_v26, %v6690_v57 }
 0x2b5   : > { %4068 = vst.msk [vmem:[%s6698_s10 + $0x90] sm:$0xff] %vm3647_vm10, %v4036_v17  ;;  %v3967_v35 = vadd.f32 %v6740_v10, %v3806_v58 }
 0x2b7   : > { %v4037_v9 = vmax.f32 %v3967_v35, 0.0 }
 0x2b9   : > { %4069 = vst.msk [vmem:[%s6698_s10 + $0x98] sm:$0xff] %vm3647_vm10, %v4037_v9 }
 0x2c2   : > { %v4611_v34 = vpop.f32.mrf.mxu0 }
 0x2c4   : > { %v4612_v36 = vpop.f32.mrf.mxu0 }
 0x2c5   : > { %v4613_v24 = vadd.f32 %v4612_v36, %v4611_v34 }
 0x2c6   : > { %v4614_v5 = vpop.f32.mrf.mxu0 }
 0x2c7   : > { %v3811_v47 = vadd.f32 %v4613_v24, %v6690_v57 }
 0x2c8   : > { %v4615_v40 = vpop.f32.mrf.mxu0 }
 0x2c9   : > { %v3972_v1 = vadd.f32 %v6747_v11, %v3811_v47  ;;  %v4616_v6 = vadd.f32 %v4615_v40, %v4614_v5 }
 0x2cb   : > { %v4038_v21 = vmax.f32 %v3972_v1, 0.0  ;;  %v3814_v54 = vadd.f32 %v4616_v6, %v6690_v57 }
 0x2cd   : > { %4070 = vst.msk [vmem:[%s6698_s10 + $0xa0] sm:$0xff] %vm3647_vm10, %v4038_v21  ;;  %v3975_v10 = vadd.f32 %v6752_v41, %v3814_v54 }
 0x2cf   : > { %v4039_v60 = vmax.f32 %v3975_v10, 0.0 }
 0x2d1   : > { %4071 = vst.msk [vmem:[%s6698_s10 + $0xa8] sm:$0xff] %vm3647_vm10, %v4039_v60 }
 0x2d9   : > { %v4617_v53 = vpop.f32.mrf.mxu0 }
 0x2db   : > { %v4618_v38 = vpop.f32.mrf.mxu0 }
 0x2dc   : > { %v4619_v61 = vadd.f32 %v4618_v38, %v4617_v53 }
 0x2dd   : > { %v4620_v49 = vpop.f32.mrf.mxu0 }
 0x2de   : > { %v3819_v3 = vadd.f32 %v4619_v61, %v6690_v57 }
 0x2df   : > { %v4621_v11 = vpop.f32.mrf.mxu0 }
 0x2e0   : > { %v3980_v28 = vadd.f32 %v6744_v20, %v3819_v3  ;;  %v4622_v52 = vadd.f32 %v4621_v11, %v4620_v49 }
 0x2e2   : > { %v4040_v32 = vmax.f32 %v3980_v28, 0.0  ;;  %v3822_v7 = vadd.f32 %v4622_v52, %v6690_v57 }
 0x2e4   : > { %4072 = vst.msk [vmem:[%s6698_s10 + $0xb0] sm:$0xff] %vm3647_vm10, %v4040_v32  ;;  %v3983_v41 = vadd.f32 %v6749_v8, %v3822_v7 }
 0x2e6   : > { %v4041_v44 = vmax.f32 %v3983_v41, 0.0 }
 0x2e8   : > { %4073 = vst.msk [vmem:[%s6698_s10 + $0xb8] sm:$0xff] %vm3647_vm10, %v4041_v44 }
 0x2e9 PF: > { %s13_s12 = sadd.s32 1, %s4804_s12  }
 0x2ea   : > { %p10_p4 = scmp.ge.s32.totalorder %s13_s12, 4  }
 0x2ec   :  { %12 = sbr.rel (!%p10_p4) target bundleno = 1 (0x1), region = 64 }

</bundles_post_ra>
